<compile_context>
chip_gen: v7x
topology: tpu7x:2x2x1
jax: 0.10.0
libtpu: 0.0.40
codegen_flags: <defaults>
</compile_context>

<pallas_src>
import functools

import jax
import jax.numpy as jnp
from jax.experimental import pallas as pl
from jax.experimental.pallas import tpu as pltpu

# ---- synthetic text-encoder config (small but structurally faithful) --------
VOCAB = 64
SEQ = 8
HIDDEN = 32
HEADS = 4
HEAD_DIM = HIDDEN // HEADS
MLP = 4 * HIDDEN
LAYERS = 2
EPS = 1e-5

# Row layout of the packed per-layer vector table vecs[l] : (6, HIDDEN)
_LN1_G, _LN1_B, _LN2_G, _LN2_B, _BO, _BFC2 = range(6)
N_VECS = 6


def _layer_norm(x, gamma, beta):
    mean = jnp.mean(x, axis=-1, keepdims=True)
    var = jnp.mean((x - mean) ** 2, axis=-1, keepdims=True)
    return (x - mean) * jax.lax.rsqrt(var + EPS) * gamma + beta


# ---------------------------- Pallas kernel ----------------------------------
def text_encoder_kernel(ids_ref, tok_ref, pos_ref, wqkv_ref, wo_ref, wfc1_ref,
                        wfc2_ref, vecs_ref, bqkv_ref, bfc1_ref, fln_ref,
                        o_ref, x_scr, *, batch):
    """Whole CLIP-style text encoder (embed + all layers + final LN).

    ids_ref  : (B*S,)        int32 token ids (SMEM)
    tok_ref  : (V, D)        token embedding table, f32
    pos_ref  : (S, D)        positional embedding, f32
    wqkv_ref : (L, D, 3D)    fused Q/K/V weights, bf16 (Q cols pre-scaled)
    wo_ref   : (L, H, hd, D) output projection, head-major, bf16
    wfc1_ref : (L, D, 4D)    bf16
    wfc2_ref : (L, 4D, D)    bf16
    vecs_ref : (L, 6, D)     packed LN gains/betas + b_o + b_fc2, f32
    bqkv_ref : (L, 1, 3D)    fused q/k/v bias (q part pre-scaled), f32
    bfc1_ref : (L, 1, 4D)    f32
    fln_ref  : (2, D)        final LayerNorm gamma / beta, f32
    o_ref    : (B*S, D)      last_hidden_state (flattened), f32
    x_scr    : (B*S, D)      VMEM scratch for the gathered embeddings
    """
    n_rows = batch * SEQ

    # ---- fused token + positional embedding (ids in SMEM, dynamic row loads)
    def gather_row(i, carry):
        tok = ids_ref[i]                    # SMEM scalar read (dynamic index)
        s = i % SEQ                         # position within the sequence
        x_scr[pl.ds(i, 1), :] = (tok_ref[pl.ds(tok, 1), :] +
                                 pos_ref[pl.ds(s, 1), :])
        return carry

    jax.lax.fori_loop(0, n_rows, gather_row, 0, unroll=True)
    x = x_scr[...]                          # (BS, D) f32 residual stream

    row = jax.lax.broadcasted_iota(jnp.int32, (SEQ, SEQ), 0)
    col = jax.lax.broadcasted_iota(jnp.int32, (SEQ, SEQ), 1)
    causal = (col <= row)[None]             # (1, S, S) -> broadcasts over H*B
    neg = jnp.float32(-1e30)                # mask stays in f32

    def to_heads(t):
        # (BS, H*hd) -> (H*B, S, hd).  Per-head lane slice + leading-axis
        # concat: Mosaic cannot lower the rank-4 (B,S,H,d)->(B,H,S,d)
        # transpose, so this is the supported relayout; the matmuls below are
        # batched over the fused H*B dim (one push stream, not a head loop).
        return jnp.concatenate(
            [t[:, hh * HEAD_DIM:(hh + 1) * HEAD_DIM]
               .reshape(batch, SEQ, HEAD_DIM) for hh in range(HEADS)],
            axis=0)

    # NOTE: static unroll is fine at LAYERS=2; at real depth move this to an
    # "arbitrary" grid axis (see TODO at top).
    for l in range(LAYERS):
        vb = vecs_ref[l]                                      # (6, D) f32
        ln1_g, ln1_b = vb[_LN1_G:_LN1_G + 1], vb[_LN1_B:_LN1_B + 1]
        ln2_g, ln2_b = vb[_LN2_G:_LN2_G + 1], vb[_LN2_B:_LN2_B + 1]
        bo, bfc2 = vb[_BO:_BO + 1], vb[_BFC2:_BFC2 + 1]

        # ---- self-attention block (pre-LN, causal) ----
        h = _layer_norm(x, ln1_g, ln1_b)                      # f32
        # bf16 x bf16 MXU matmul, f32 accumulate; single fused bias add
        # (scale 1/sqrt(hd) already folded into the Q columns + bias).
        qkv = jnp.dot(h.astype(jnp.bfloat16), wqkv_ref[l],
                      preferred_element_type=jnp.float32) + bqkv_ref[l]

        qh = to_heads(qkv[:, 0 * HIDDEN:1 * HIDDEN])          # (H*B, S, hd)
        kh = to_heads(qkv[:, 1 * HIDDEN:2 * HIDDEN])
        vh = to_heads(qkv[:, 2 * HIDDEN:3 * HIDDEN])

        # ONE batched einsum for scores over the fused H*B batch dim.
        s = jnp.einsum('bqd,bkd->bqk', qh, kh,
                       preferred_element_type=jnp.float32)    # (H*B, S, S)
        s = jnp.where(causal, s, neg)
        m = jnp.max(s, axis=-1, keepdims=True)
        p = jnp.exp(s - m)
        p = p * pl.reciprocal(jnp.sum(p, axis=-1, keepdims=True), approx=True)

        # ONE batched einsum for p @ v.
        av = jnp.einsum('bqk,bkd->bqd', p, vh,
                        preferred_element_type=jnp.float32)   # (H*B, S, hd)

        # Output projection: one batched matmul over heads + cheap head-sum
        # (== concat(heads) @ W_o without a lane-axis concatenate); bias once.
        av3 = av.reshape(HEADS, batch * SEQ, HEAD_DIM)        # (H, BS, hd)
        proj = jnp.einsum('hmd,hdn->hmn', av3.astype(jnp.bfloat16), wo_ref[l],
                          preferred_element_type=jnp.float32)  # (H, BS, D)
        x = x + jnp.sum(proj, axis=0) + bo

        # ---- MLP block (pre-LN, quick_gelu), elementwise math in f32 ----
        h2 = _layer_norm(x, ln2_g, ln2_b)
        f = jnp.dot(h2.astype(jnp.bfloat16), wfc1_ref[l],
                    preferred_element_type=jnp.float32) + bfc1_ref[l]
        f = f * jax.nn.sigmoid(1.702 * f)                     # quick_gelu
        x = x + jnp.dot(f.astype(jnp.bfloat16), wfc2_ref[l],
                        preferred_element_type=jnp.float32) + bfc2

    # ---- final LayerNorm, fused epilogue ----
    fln = fln_ref[...]
    # Note: D=32 (<128) -> lane-masked stores; an in-kernel (BS,D)->(.,128)
    # fold would need a cross-lane relayout costing more than it saves here.
    o_ref[...] = _layer_norm(x, fln[0:1], fln[1:2])


# ---------------------------- wrapper -----------------------------------------
def neuron_text_encoder_forward(enc_params, input_ids, attention_mask=None):
    """Mirrors NeuronTextEncoder.forward: returns [last_hidden_state].

    attention_mask is accepted for interface parity but (like the wrapped
    call in the original module) it is not forwarded to the encoder, so
    padding tokens attend -- intentional.
    """
    del attention_mask
    B, S = input_ids.shape
    ids = input_ids.reshape(B * S).astype(jnp.int32)

    operands = (ids, enc_params["tok_emb"], enc_params["pos_emb"],
                enc_params["w_qkv"], enc_params["w_o"], enc_params["w_fc1"],
                enc_params["w_fc2"], enc_params["vecs"], enc_params["b_qkv"],
                enc_params["b_fc1"], enc_params["fln"])

    smem_spec = pl.BlockSpec(memory_space=pltpu.MemorySpace.SMEM)
    vmem_spec = pl.BlockSpec(memory_space=pltpu.MemorySpace.VMEM)

    out = pl.pallas_call(
        functools.partial(text_encoder_kernel, batch=B),
        out_shape=jax.ShapeDtypeStruct((B * S, HIDDEN), jnp.float32),
        in_specs=[smem_spec] + [vmem_spec] * (len(operands) - 1),
        out_specs=vmem_spec,
        scratch_shapes=[pltpu.VMEM((B * S, HIDDEN), jnp.float32)],
    )(*operands)
    return [out.reshape(B, S, HIDDEN)]


# ---------------------------- params ------------------------------------------
def init_params(key):
    """Raw CLIP-style parameters (natural layout, f32)."""
    ks = jax.random.split(key, 17)

    def w(k, shape, scale=0.02):
        return scale * jax.random.normal(k, shape, dtype=jnp.float32)

    def bf16_vals(t):
        # Store bf16-representable weight values so the bf16 kernel path and
        # the f32 reference use identical weights.
        return t.astype(jnp.bfloat16).astype(jnp.float32)

    ln1 = w(ks[0], (LAYERS, 2, HIDDEN)).at[:, 0].add(1.0)
    ln2 = w(ks[1], (LAYERS, 2, HIDDEN)).at[:, 0].add(1.0)
    fln = w(ks[2], (2, HIDDEN)).at[0].add(1.0)

    return {
        "tok_emb": w(ks[3], (VOCAB, HIDDEN)),
        "pos_emb": w(ks[4], (SEQ, HIDDEN)),
        "ln1": ln1, "ln2": ln2, "fln": fln,
        "w_q": bf16_vals(w(ks[5], (LAYERS, HIDDEN, HIDDEN))),
        "w_k": bf16_vals(w(ks[6], (LAYERS, HIDDEN, HIDDEN))),
        "w_v": bf16_vals(w(ks[7], (LAYERS, HIDDEN, HIDDEN))),
        "b_q": w(ks[8], (LAYERS, HIDDEN)),
        "b_k": w(ks[9], (LAYERS, HIDDEN)),
        "b_v": w(ks[10], (LAYERS, HIDDEN)),
        "w_o": bf16_vals(w(ks[11], (LAYERS, HIDDEN, HIDDEN))),
        "b_o": w(ks[12], (LAYERS, HIDDEN)),
        "w_fc1": bf16_vals(w(ks[13], (LAYERS, HIDDEN, MLP))),
        "b_fc1": w(ks[14], (LAYERS, MLP)),
        "w_fc2": bf16_vals(w(ks[15], (LAYERS, MLP, HIDDEN))),
        "b_fc2": w(ks[16], (LAYERS, HIDDEN)),
    }


def prepare_operands(params):
    """One-time host-side folding: fuse QKV, pre-scale Q, pack biases, bf16."""
    scale = jnp.float32(1.0 / (HEAD_DIM ** 0.5))
    w_qkv = jnp.concatenate(
        [params["w_q"] * scale, params["w_k"], params["w_v"]],
        axis=-1).astype(jnp.bfloat16)                            # (L, D, 3D)
    b_qkv = jnp.concatenate(
        [params["b_q"] * scale, params["b_k"], params["b_v"]],
        axis=-1).reshape(LAYERS, 1, 3 * HIDDEN)                  # (L, 1, 3D)
    w_o = params["w_o"].reshape(LAYERS, HEADS, HEAD_DIM,
                                HIDDEN).astype(jnp.bfloat16)     # head-major
    vecs = jnp.stack([params["ln1"][:, 0], params["ln1"][:, 1],
                      params["ln2"][:, 0], params["ln2"][:, 1],
                      params["b_o"], params["b_fc2"]], axis=1)   # (L, 6, D)
    return {
        "tok_emb": params["tok_emb"],
        "pos_emb": params["pos_emb"],
        "w_qkv": w_qkv,
        "w_o": w_o,
        "w_fc1": params["w_fc1"].astype(jnp.bfloat16),
        "w_fc2": params["w_fc2"].astype(jnp.bfloat16),
        "vecs": vecs,
        "b_qkv": b_qkv,
        "b_fc1": params["b_fc1"].reshape(LAYERS, 1, MLP),
        "fln": params["fln"],
    }


# ---------------------------- pure-JAX reference -------------------------------
def reference_forward(params, input_ids):
    B, S = input_ids.shape
    x = (params["tok_emb"][input_ids]
         + params["pos_emb"][None, :S]).astype(jnp.float32)
    causal = jnp.tril(jnp.ones((S, S), bool))
    scale = 1.0 / (HEAD_DIM ** 0.5)
    for l in range(LAYERS):
        h = _layer_norm(x, params["ln1"][l, 0], params["ln1"][l, 1])
        q = h @ params["w_q"][l] + params["b_q"][l]
        k = h @ params["w_k"][l] + params["b_k"][l]
        v = h @ params["w_v"][l] + params["b_v"][l]
        qh = q.reshape(B, S, HEADS, HEAD_DIM).transpose(0, 2, 1, 3)
        kh = k.reshape(B, S, HEADS, HEAD_DIM).transpose(0, 2, 1, 3)
        vh = v.reshape(B, S, HEADS, HEAD_DIM).transpose(0, 2, 1, 3)
        s = jnp.einsum('bhqd,bhkd->bhqk', qh, kh) * scale
        s = jnp.where(causal, s, -1e30)
        p = jax.nn.softmax(s, axis=-1)
        av = jnp.einsum('bhqk,bhkd->bhqd', p, vh)
        av = av.transpose(0, 2, 1, 3).reshape(B, S, HIDDEN)
        x = x + av @ params["w_o"][l] + params["b_o"][l]
        h2 = _layer_norm(x, params["ln2"][l, 0], params["ln2"][l, 1])
        f = h2 @ params["w_fc1"][l] + params["b_fc1"][l]
        f = f * jax.nn.sigmoid(1.702 * f)
        x = x + f @ params["w_fc2"][l] + params["b_fc2"][l]
    return _layer_norm(x, params["fln"][0], params["fln"][1])


if __name__ == "__main__":
    key = jax.random.PRNGKey(0)
    pkey, ikey = jax.random.split(key)
    params = init_params(pkey)
    enc_params = prepare_operands(params)     # one-time host-side folding

    # `emb` in NeuronTextEncoder.forward is the tokenized prompt (input ids).
    input_ids = jax.random.randint(ikey, (2, SEQ), 0, VOCAB, dtype=jnp.int32)

    outputs = neuron_text_encoder_forward(enc_params, input_ids)
    last_hidden_state = jax.block_until_ready(outputs[0])

    assert last_hidden_state.shape == (2, SEQ, HIDDEN)
    assert last_hidden_state.dtype == jnp.float32
    assert bool(jnp.all(jnp.isfinite(last_hidden_state)))

    ref = jax.block_until_ready(reference_forward(params, input_ids))
    max_err = float(jnp.max(jnp.abs(last_hidden_state - ref)))
    # bf16 matmul inputs + approx reciprocal vs. pure-f32 reference.
    assert jnp.allclose(last_hidden_state, ref, atol=3e-2, rtol=3e-2), max_err

    print("KERNEL_OK")
</pallas_src>

<mosaic_0001>
module attributes {stable_mosaic.version = 11 : i64} {
  func.func @text_encoder_kernel(%arg0: memref<16xi32, #tpu.memory_space<smem>>, %arg1: memref<64x32xf32, #tpu.memory_space<vmem>>, %arg2: memref<8x32xf32, #tpu.memory_space<vmem>>, %arg3: memref<2x32x96xbf16, #tpu.memory_space<vmem>>, %arg4: memref<2x4x8x32xbf16, #tpu.memory_space<vmem>>, %arg5: memref<2x32x128xbf16, #tpu.memory_space<vmem>>, %arg6: memref<2x128x32xbf16, #tpu.memory_space<vmem>>, %arg7: memref<2x6x32xf32, #tpu.memory_space<vmem>>, %arg8: memref<2x1x96xf32, #tpu.memory_space<vmem>>, %arg9: memref<2x1x128xf32, #tpu.memory_space<vmem>>, %arg10: memref<2x32xf32, #tpu.memory_space<vmem>>, %arg11: memref<16x32xf32, #tpu.memory_space<vmem>>, %arg12: memref<16x32xf32, #tpu.memory_space<vmem>>) attributes {dimension_semantics = [], scalar_prefetch = 0 : i64, scratch_operands = 1 : i64, tpu.core_type = #tpu.core_type<tc>} {
    %c0_i32 = arith.constant 0 : i32
    %0 = arith.index_cast %c0_i32 : i32 to index
    %1 = memref.load %arg0[%0] : memref<16xi32, #tpu.memory_space<smem>>
    %c8_i32 = arith.constant 8 : i32
    %c0_i32_0 = arith.constant 0 : i32
    %2 = arith.cmpi eq, %c8_i32, %c0_i32_0 : i32
    %c1_i32 = arith.constant 1 : i32
    %3 = arith.select %2, %c1_i32, %c8_i32 : i32
    %4 = arith.remsi %c0_i32, %3 : i32
    %c0_i32_1 = arith.constant 0 : i32
    %5 = arith.cmpi ne, %4, %c0_i32_1 : i32
    %c0_i32_2 = arith.constant 0 : i32
    %6 = arith.cmpi slt, %4, %c0_i32_2 : i32
    %c0_i32_3 = arith.constant 0 : i32
    %7 = arith.cmpi slt, %3, %c0_i32_3 : i32
    %8 = arith.xori %6, %7 : i1
    %9 = arith.andi %8, %5 : i1
    %10 = arith.addi %4, %3 : i32
    %11 = arith.select %9, %10, %4 : i32
    %12 = arith.index_cast %1 : i32 to index
    %c0 = arith.constant 0 : index
    %13 = vector.load %arg1[%12, %c0] : memref<64x32xf32, #tpu.memory_space<vmem>>, vector<1x32xf32>
    %14 = arith.index_cast %11 : i32 to index
    %c0_4 = arith.constant 0 : index
    %15 = vector.load %arg2[%14, %c0_4] : memref<8x32xf32, #tpu.memory_space<vmem>>, vector<1x32xf32>
    %16 = arith.addf %13, %15 : vector<1x32xf32>
    %17 = arith.index_cast %c0_i32 : i32 to index
    %c0_5 = arith.constant 0 : index
    %18 = vector.load %arg12[%17, %c0_5] : memref<16x32xf32, #tpu.memory_space<vmem>>, vector<1x32xf32>
    tpu.vector_store %arg12[%17, %c0_5], %16 {strides = array<i32>} : memref<16x32xf32, #tpu.memory_space<vmem>>, vector<1x32xf32>,
    %c1_i32_6 = arith.constant 1 : i32
    %19 = arith.index_cast %c1_i32_6 : i32 to index
    %20 = memref.load %arg0[%19] : memref<16xi32, #tpu.memory_space<smem>>
    %c8_i32_7 = arith.constant 8 : i32
    %c0_i32_8 = arith.constant 0 : i32
    %21 = arith.cmpi eq, %c8_i32_7, %c0_i32_8 : i32
    %c1_i32_9 = arith.constant 1 : i32
    %22 = arith.select %21, %c1_i32_9, %c8_i32_7 : i32
    %23 = arith.remsi %c1_i32_6, %22 : i32
    %c0_i32_10 = arith.constant 0 : i32
    %24 = arith.cmpi ne, %23, %c0_i32_10 : i32
    %c0_i32_11 = arith.constant 0 : i32
    %25 = arith.cmpi slt, %23, %c0_i32_11 : i32
    %c0_i32_12 = arith.constant 0 : i32
    %26 = arith.cmpi slt, %22, %c0_i32_12 : i32
    %27 = arith.xori %25, %26 : i1
    %28 = arith.andi %27, %24 : i1
    %29 = arith.addi %23, %22 : i32
    %30 = arith.select %28, %29, %23 : i32
    %31 = arith.index_cast %20 : i32 to index
    %c0_13 = arith.constant 0 : index
    %32 = vector.load %arg1[%31, %c0_13] : memref<64x32xf32, #tpu.memory_space<vmem>>, vector<1x32xf32>
    %33 = arith.index_cast %30 : i32 to index
    %c0_14 = arith.constant 0 : index
    %34 = vector.load %arg2[%33, %c0_14] : memref<8x32xf32, #tpu.memory_space<vmem>>, vector<1x32xf32>
    %35 = arith.addf %32, %34 : vector<1x32xf32>
    %36 = arith.index_cast %c1_i32_6 : i32 to index
    %c0_15 = arith.constant 0 : index
    %37 = vector.load %arg12[%36, %c0_15] : memref<16x32xf32, #tpu.memory_space<vmem>>, vector<1x32xf32>
    tpu.vector_store %arg12[%36, %c0_15], %35 {strides = array<i32>} : memref<16x32xf32, #tpu.memory_space<vmem>>, vector<1x32xf32>,
    %c2_i32 = arith.constant 2 : i32
    %38 = arith.index_cast %c2_i32 : i32 to index
    %39 = memref.load %arg0[%38] : memref<16xi32, #tpu.memory_space<smem>>
    %c8_i32_16 = arith.constant 8 : i32
    %c0_i32_17 = arith.constant 0 : i32
    %40 = arith.cmpi eq, %c8_i32_16, %c0_i32_17 : i32
    %c1_i32_18 = arith.constant 1 : i32
    %41 = arith.select %40, %c1_i32_18, %c8_i32_16 : i32
    %42 = arith.remsi %c2_i32, %41 : i32
    %c0_i32_19 = arith.constant 0 : i32
    %43 = arith.cmpi ne, %42, %c0_i32_19 : i32
    %c0_i32_20 = arith.constant 0 : i32
    %44 = arith.cmpi slt, %42, %c0_i32_20 : i32
    %c0_i32_21 = arith.constant 0 : i32
    %45 = arith.cmpi slt, %41, %c0_i32_21 : i32
    %46 = arith.xori %44, %45 : i1
    %47 = arith.andi %46, %43 : i1
    %48 = arith.addi %42, %41 : i32
    %49 = arith.select %47, %48, %42 : i32
    %50 = arith.index_cast %39 : i32 to index
    %c0_22 = arith.constant 0 : index
    %51 = vector.load %arg1[%50, %c0_22] : memref<64x32xf32, #tpu.memory_space<vmem>>, vector<1x32xf32>
    %52 = arith.index_cast %49 : i32 to index
    %c0_23 = arith.constant 0 : index
    %53 = vector.load %arg2[%52, %c0_23] : memref<8x32xf32, #tpu.memory_space<vmem>>, vector<1x32xf32>
    %54 = arith.addf %51, %53 : vector<1x32xf32>
    %55 = arith.index_cast %c2_i32 : i32 to index
    %c0_24 = arith.constant 0 : index
    %56 = vector.load %arg12[%55, %c0_24] : memref<16x32xf32, #tpu.memory_space<vmem>>, vector<1x32xf32>
    tpu.vector_store %arg12[%55, %c0_24], %54 {strides = array<i32>} : memref<16x32xf32, #tpu.memory_space<vmem>>, vector<1x32xf32>,
    %c3_i32 = arith.constant 3 : i32
    %57 = arith.index_cast %c3_i32 : i32 to index
    %58 = memref.load %arg0[%57] : memref<16xi32, #tpu.memory_space<smem>>
    %c8_i32_25 = arith.constant 8 : i32
    %c0_i32_26 = arith.constant 0 : i32
    %59 = arith.cmpi eq, %c8_i32_25, %c0_i32_26 : i32
    %c1_i32_27 = arith.constant 1 : i32
    %60 = arith.select %59, %c1_i32_27, %c8_i32_25 : i32
    %61 = arith.remsi %c3_i32, %60 : i32
    %c0_i32_28 = arith.constant 0 : i32
    %62 = arith.cmpi ne, %61, %c0_i32_28 : i32
    %c0_i32_29 = arith.constant 0 : i32
    %63 = arith.cmpi slt, %61, %c0_i32_29 : i32
    %c0_i32_30 = arith.constant 0 : i32
    %64 = arith.cmpi slt, %60, %c0_i32_30 : i32
    %65 = arith.xori %63, %64 : i1
    %66 = arith.andi %65, %62 : i1
    %67 = arith.addi %61, %60 : i32
    %68 = arith.select %66, %67, %61 : i32
    %69 = arith.index_cast %58 : i32 to index
    %c0_31 = arith.constant 0 : index
    %70 = vector.load %arg1[%69, %c0_31] : memref<64x32xf32, #tpu.memory_space<vmem>>, vector<1x32xf32>
    %71 = arith.index_cast %68 : i32 to index
    %c0_32 = arith.constant 0 : index
    %72 = vector.load %arg2[%71, %c0_32] : memref<8x32xf32, #tpu.memory_space<vmem>>, vector<1x32xf32>
    %73 = arith.addf %70, %72 : vector<1x32xf32>
    %74 = arith.index_cast %c3_i32 : i32 to index
    %c0_33 = arith.constant 0 : index
    %75 = vector.load %arg12[%74, %c0_33] : memref<16x32xf32, #tpu.memory_space<vmem>>, vector<1x32xf32>
    tpu.vector_store %arg12[%74, %c0_33], %73 {strides = array<i32>} : memref<16x32xf32, #tpu.memory_space<vmem>>, vector<1x32xf32>,
    %c4_i32 = arith.constant 4 : i32
    %76 = arith.index_cast %c4_i32 : i32 to index
    %77 = memref.load %arg0[%76] : memref<16xi32, #tpu.memory_space<smem>>
    %c8_i32_34 = arith.constant 8 : i32
    %c0_i32_35 = arith.constant 0 : i32
    %78 = arith.cmpi eq, %c8_i32_34, %c0_i32_35 : i32
    %c1_i32_36 = arith.constant 1 : i32
    %79 = arith.select %78, %c1_i32_36, %c8_i32_34 : i32
    %80 = arith.remsi %c4_i32, %79 : i32
    %c0_i32_37 = arith.constant 0 : i32
    %81 = arith.cmpi ne, %80, %c0_i32_37 : i32
    %c0_i32_38 = arith.constant 0 : i32
    %82 = arith.cmpi slt, %80, %c0_i32_38 : i32
    %c0_i32_39 = arith.constant 0 : i32
    %83 = arith.cmpi slt, %79, %c0_i32_39 : i32
    %84 = arith.xori %82, %83 : i1
    %85 = arith.andi %84, %81 : i1
    %86 = arith.addi %80, %79 : i32
    %87 = arith.select %85, %86, %80 : i32
    %88 = arith.index_cast %77 : i32 to index
    %c0_40 = arith.constant 0 : index
    %89 = vector.load %arg1[%88, %c0_40] : memref<64x32xf32, #tpu.memory_space<vmem>>, vector<1x32xf32>
    %90 = arith.index_cast %87 : i32 to index
    %c0_41 = arith.constant 0 : index
    %91 = vector.load %arg2[%90, %c0_41] : memref<8x32xf32, #tpu.memory_space<vmem>>, vector<1x32xf32>
    %92 = arith.addf %89, %91 : vector<1x32xf32>
    %93 = arith.index_cast %c4_i32 : i32 to index
    %c0_42 = arith.constant 0 : index
    %94 = vector.load %arg12[%93, %c0_42] : memref<16x32xf32, #tpu.memory_space<vmem>>, vector<1x32xf32>
    tpu.vector_store %arg12[%93, %c0_42], %92 {strides = array<i32>} : memref<16x32xf32, #tpu.memory_space<vmem>>, vector<1x32xf32>,
    %c5_i32 = arith.constant 5 : i32
    %95 = arith.index_cast %c5_i32 : i32 to index
    %96 = memref.load %arg0[%95] : memref<16xi32, #tpu.memory_space<smem>>
    %c8_i32_43 = arith.constant 8 : i32
    %c0_i32_44 = arith.constant 0 : i32
    %97 = arith.cmpi eq, %c8_i32_43, %c0_i32_44 : i32
    %c1_i32_45 = arith.constant 1 : i32
    %98 = arith.select %97, %c1_i32_45, %c8_i32_43 : i32
    %99 = arith.remsi %c5_i32, %98 : i32
    %c0_i32_46 = arith.constant 0 : i32
    %100 = arith.cmpi ne, %99, %c0_i32_46 : i32
    %c0_i32_47 = arith.constant 0 : i32
    %101 = arith.cmpi slt, %99, %c0_i32_47 : i32
    %c0_i32_48 = arith.constant 0 : i32
    %102 = arith.cmpi slt, %98, %c0_i32_48 : i32
    %103 = arith.xori %101, %102 : i1
    %104 = arith.andi %103, %100 : i1
    %105 = arith.addi %99, %98 : i32
    %106 = arith.select %104, %105, %99 : i32
    %107 = arith.index_cast %96 : i32 to index
    %c0_49 = arith.constant 0 : index
    %108 = vector.load %arg1[%107, %c0_49] : memref<64x32xf32, #tpu.memory_space<vmem>>, vector<1x32xf32>
    %109 = arith.index_cast %106 : i32 to index
    %c0_50 = arith.constant 0 : index
    %110 = vector.load %arg2[%109, %c0_50] : memref<8x32xf32, #tpu.memory_space<vmem>>, vector<1x32xf32>
    %111 = arith.addf %108, %110 : vector<1x32xf32>
    %112 = arith.index_cast %c5_i32 : i32 to index
    %c0_51 = arith.constant 0 : index
    %113 = vector.load %arg12[%112, %c0_51] : memref<16x32xf32, #tpu.memory_space<vmem>>, vector<1x32xf32>
    tpu.vector_store %arg12[%112, %c0_51], %111 {strides = array<i32>} : memref<16x32xf32, #tpu.memory_space<vmem>>, vector<1x32xf32>,
    %c6_i32 = arith.constant 6 : i32
    %114 = arith.index_cast %c6_i32 : i32 to index
    %115 = memref.load %arg0[%114] : memref<16xi32, #tpu.memory_space<smem>>
    %c8_i32_52 = arith.constant 8 : i32
    %c0_i32_53 = arith.constant 0 : i32
    %116 = arith.cmpi eq, %c8_i32_52, %c0_i32_53 : i32
    %c1_i32_54 = arith.constant 1 : i32
    %117 = arith.select %116, %c1_i32_54, %c8_i32_52 : i32
    %118 = arith.remsi %c6_i32, %117 : i32
    %c0_i32_55 = arith.constant 0 : i32
    %119 = arith.cmpi ne, %118, %c0_i32_55 : i32
    %c0_i32_56 = arith.constant 0 : i32
    %120 = arith.cmpi slt, %118, %c0_i32_56 : i32
    %c0_i32_57 = arith.constant 0 : i32
    %121 = arith.cmpi slt, %117, %c0_i32_57 : i32
    %122 = arith.xori %120, %121 : i1
    %123 = arith.andi %122, %119 : i1
    %124 = arith.addi %118, %117 : i32
    %125 = arith.select %123, %124, %118 : i32
    %126 = arith.index_cast %115 : i32 to index
    %c0_58 = arith.constant 0 : index
    %127 = vector.load %arg1[%126, %c0_58] : memref<64x32xf32, #tpu.memory_space<vmem>>, vector<1x32xf32>
    %128 = arith.index_cast %125 : i32 to index
    %c0_59 = arith.constant 0 : index
    %129 = vector.load %arg2[%128, %c0_59] : memref<8x32xf32, #tpu.memory_space<vmem>>, vector<1x32xf32>
    %130 = arith.addf %127, %129 : vector<1x32xf32>
    %131 = arith.index_cast %c6_i32 : i32 to index
    %c0_60 = arith.constant 0 : index
    %132 = vector.load %arg12[%131, %c0_60] : memref<16x32xf32, #tpu.memory_space<vmem>>, vector<1x32xf32>
    tpu.vector_store %arg12[%131, %c0_60], %130 {strides = array<i32>} : memref<16x32xf32, #tpu.memory_space<vmem>>, vector<1x32xf32>,
    %c7_i32 = arith.constant 7 : i32
    %133 = arith.index_cast %c7_i32 : i32 to index
    %134 = memref.load %arg0[%133] : memref<16xi32, #tpu.memory_space<smem>>
    %c8_i32_61 = arith.constant 8 : i32
    %c0_i32_62 = arith.constant 0 : i32
    %135 = arith.cmpi eq, %c8_i32_61, %c0_i32_62 : i32
    %c1_i32_63 = arith.constant 1 : i32
    %136 = arith.select %135, %c1_i32_63, %c8_i32_61 : i32
    %137 = arith.remsi %c7_i32, %136 : i32
    %c0_i32_64 = arith.constant 0 : i32
    %138 = arith.cmpi ne, %137, %c0_i32_64 : i32
    %c0_i32_65 = arith.constant 0 : i32
    %139 = arith.cmpi slt, %137, %c0_i32_65 : i32
    %c0_i32_66 = arith.constant 0 : i32
    %140 = arith.cmpi slt, %136, %c0_i32_66 : i32
    %141 = arith.xori %139, %140 : i1
    %142 = arith.andi %141, %138 : i1
    %143 = arith.addi %137, %136 : i32
    %144 = arith.select %142, %143, %137 : i32
    %145 = arith.index_cast %134 : i32 to index
    %c0_67 = arith.constant 0 : index
    %146 = vector.load %arg1[%145, %c0_67] : memref<64x32xf32, #tpu.memory_space<vmem>>, vector<1x32xf32>
    %147 = arith.index_cast %144 : i32 to index
    %c0_68 = arith.constant 0 : index
    %148 = vector.load %arg2[%147, %c0_68] : memref<8x32xf32, #tpu.memory_space<vmem>>, vector<1x32xf32>
    %149 = arith.addf %146, %148 : vector<1x32xf32>
    %150 = arith.index_cast %c7_i32 : i32 to index
    %c0_69 = arith.constant 0 : index
    %151 = vector.load %arg12[%150, %c0_69] : memref<16x32xf32, #tpu.memory_space<vmem>>, vector<1x32xf32>
    tpu.vector_store %arg12[%150, %c0_69], %149 {strides = array<i32>} : memref<16x32xf32, #tpu.memory_space<vmem>>, vector<1x32xf32>,
    %c8_i32_70 = arith.constant 8 : i32
    %152 = arith.index_cast %c8_i32_70 : i32 to index
    %153 = memref.load %arg0[%152] : memref<16xi32, #tpu.memory_space<smem>>
    %c8_i32_71 = arith.constant 8 : i32
    %c0_i32_72 = arith.constant 0 : i32
    %154 = arith.cmpi eq, %c8_i32_71, %c0_i32_72 : i32
    %c1_i32_73 = arith.constant 1 : i32
    %155 = arith.select %154, %c1_i32_73, %c8_i32_71 : i32
    %156 = arith.remsi %c8_i32_70, %155 : i32
    %c0_i32_74 = arith.constant 0 : i32
    %157 = arith.cmpi ne, %156, %c0_i32_74 : i32
    %c0_i32_75 = arith.constant 0 : i32
    %158 = arith.cmpi slt, %156, %c0_i32_75 : i32
    %c0_i32_76 = arith.constant 0 : i32
    %159 = arith.cmpi slt, %155, %c0_i32_76 : i32
    %160 = arith.xori %158, %159 : i1
    %161 = arith.andi %160, %157 : i1
    %162 = arith.addi %156, %155 : i32
    %163 = arith.select %161, %162, %156 : i32
    %164 = arith.index_cast %153 : i32 to index
    %c0_77 = arith.constant 0 : index
    %165 = vector.load %arg1[%164, %c0_77] : memref<64x32xf32, #tpu.memory_space<vmem>>, vector<1x32xf32>
    %166 = arith.index_cast %163 : i32 to index
    %c0_78 = arith.constant 0 : index
    %167 = vector.load %arg2[%166, %c0_78] : memref<8x32xf32, #tpu.memory_space<vmem>>, vector<1x32xf32>
    %168 = arith.addf %165, %167 : vector<1x32xf32>
    %169 = arith.index_cast %c8_i32_70 : i32 to index
    %c0_79 = arith.constant 0 : index
    %170 = vector.load %arg12[%169, %c0_79] : memref<16x32xf32, #tpu.memory_space<vmem>>, vector<1x32xf32>
    tpu.vector_store %arg12[%169, %c0_79], %168 {strides = array<i32>} : memref<16x32xf32, #tpu.memory_space<vmem>>, vector<1x32xf32>,
    %c9_i32 = arith.constant 9 : i32
    %171 = arith.index_cast %c9_i32 : i32 to index
    %172 = memref.load %arg0[%171] : memref<16xi32, #tpu.memory_space<smem>>
    %c8_i32_80 = arith.constant 8 : i32
    %c0_i32_81 = arith.constant 0 : i32
    %173 = arith.cmpi eq, %c8_i32_80, %c0_i32_81 : i32
    %c1_i32_82 = arith.constant 1 : i32
    %174 = arith.select %173, %c1_i32_82, %c8_i32_80 : i32
    %175 = arith.remsi %c9_i32, %174 : i32
    %c0_i32_83 = arith.constant 0 : i32
    %176 = arith.cmpi ne, %175, %c0_i32_83 : i32
    %c0_i32_84 = arith.constant 0 : i32
    %177 = arith.cmpi slt, %175, %c0_i32_84 : i32
    %c0_i32_85 = arith.constant 0 : i32
    %178 = arith.cmpi slt, %174, %c0_i32_85 : i32
    %179 = arith.xori %177, %178 : i1
    %180 = arith.andi %179, %176 : i1
    %181 = arith.addi %175, %174 : i32
    %182 = arith.select %180, %181, %175 : i32
    %183 = arith.index_cast %172 : i32 to index
    %c0_86 = arith.constant 0 : index
    %184 = vector.load %arg1[%183, %c0_86] : memref<64x32xf32, #tpu.memory_space<vmem>>, vector<1x32xf32>
    %185 = arith.index_cast %182 : i32 to index
    %c0_87 = arith.constant 0 : index
    %186 = vector.load %arg2[%185, %c0_87] : memref<8x32xf32, #tpu.memory_space<vmem>>, vector<1x32xf32>
    %187 = arith.addf %184, %186 : vector<1x32xf32>
    %188 = arith.index_cast %c9_i32 : i32 to index
    %c0_88 = arith.constant 0 : index
    %189 = vector.load %arg12[%188, %c0_88] : memref<16x32xf32, #tpu.memory_space<vmem>>, vector<1x32xf32>
    tpu.vector_store %arg12[%188, %c0_88], %187 {strides = array<i32>} : memref<16x32xf32, #tpu.memory_space<vmem>>, vector<1x32xf32>,
    %c10_i32 = arith.constant 10 : i32
    %190 = arith.index_cast %c10_i32 : i32 to index
    %191 = memref.load %arg0[%190] : memref<16xi32, #tpu.memory_space<smem>>
    %c8_i32_89 = arith.constant 8 : i32
    %c0_i32_90 = arith.constant 0 : i32
    %192 = arith.cmpi eq, %c8_i32_89, %c0_i32_90 : i32
    %c1_i32_91 = arith.constant 1 : i32
    %193 = arith.select %192, %c1_i32_91, %c8_i32_89 : i32
    %194 = arith.remsi %c10_i32, %193 : i32
    %c0_i32_92 = arith.constant 0 : i32
    %195 = arith.cmpi ne, %194, %c0_i32_92 : i32
    %c0_i32_93 = arith.constant 0 : i32
    %196 = arith.cmpi slt, %194, %c0_i32_93 : i32
    %c0_i32_94 = arith.constant 0 : i32
    %197 = arith.cmpi slt, %193, %c0_i32_94 : i32
    %198 = arith.xori %196, %197 : i1
    %199 = arith.andi %198, %195 : i1
    %200 = arith.addi %194, %193 : i32
    %201 = arith.select %199, %200, %194 : i32
    %202 = arith.index_cast %191 : i32 to index
    %c0_95 = arith.constant 0 : index
    %203 = vector.load %arg1[%202, %c0_95] : memref<64x32xf32, #tpu.memory_space<vmem>>, vector<1x32xf32>
    %204 = arith.index_cast %201 : i32 to index
    %c0_96 = arith.constant 0 : index
    %205 = vector.load %arg2[%204, %c0_96] : memref<8x32xf32, #tpu.memory_space<vmem>>, vector<1x32xf32>
    %206 = arith.addf %203, %205 : vector<1x32xf32>
    %207 = arith.index_cast %c10_i32 : i32 to index
    %c0_97 = arith.constant 0 : index
    %208 = vector.load %arg12[%207, %c0_97] : memref<16x32xf32, #tpu.memory_space<vmem>>, vector<1x32xf32>
    tpu.vector_store %arg12[%207, %c0_97], %206 {strides = array<i32>} : memref<16x32xf32, #tpu.memory_space<vmem>>, vector<1x32xf32>,
    %c11_i32 = arith.constant 11 : i32
    %209 = arith.index_cast %c11_i32 : i32 to index
    %210 = memref.load %arg0[%209] : memref<16xi32, #tpu.memory_space<smem>>
    %c8_i32_98 = arith.constant 8 : i32
    %c0_i32_99 = arith.constant 0 : i32
    %211 = arith.cmpi eq, %c8_i32_98, %c0_i32_99 : i32
    %c1_i32_100 = arith.constant 1 : i32
    %212 = arith.select %211, %c1_i32_100, %c8_i32_98 : i32
    %213 = arith.remsi %c11_i32, %212 : i32
    %c0_i32_101 = arith.constant 0 : i32
    %214 = arith.cmpi ne, %213, %c0_i32_101 : i32
    %c0_i32_102 = arith.constant 0 : i32
    %215 = arith.cmpi slt, %213, %c0_i32_102 : i32
    %c0_i32_103 = arith.constant 0 : i32
    %216 = arith.cmpi slt, %212, %c0_i32_103 : i32
    %217 = arith.xori %215, %216 : i1
    %218 = arith.andi %217, %214 : i1
    %219 = arith.addi %213, %212 : i32
    %220 = arith.select %218, %219, %213 : i32
    %221 = arith.index_cast %210 : i32 to index
    %c0_104 = arith.constant 0 : index
    %222 = vector.load %arg1[%221, %c0_104] : memref<64x32xf32, #tpu.memory_space<vmem>>, vector<1x32xf32>
    %223 = arith.index_cast %220 : i32 to index
    %c0_105 = arith.constant 0 : index
    %224 = vector.load %arg2[%223, %c0_105] : memref<8x32xf32, #tpu.memory_space<vmem>>, vector<1x32xf32>
    %225 = arith.addf %222, %224 : vector<1x32xf32>
    %226 = arith.index_cast %c11_i32 : i32 to index
    %c0_106 = arith.constant 0 : index
    %227 = vector.load %arg12[%226, %c0_106] : memref<16x32xf32, #tpu.memory_space<vmem>>, vector<1x32xf32>
    tpu.vector_store %arg12[%226, %c0_106], %225 {strides = array<i32>} : memref<16x32xf32, #tpu.memory_space<vmem>>, vector<1x32xf32>,
    %c12_i32 = arith.constant 12 : i32
    %228 = arith.index_cast %c12_i32 : i32 to index
    %229 = memref.load %arg0[%228] : memref<16xi32, #tpu.memory_space<smem>>
    %c8_i32_107 = arith.constant 8 : i32
    %c0_i32_108 = arith.constant 0 : i32
    %230 = arith.cmpi eq, %c8_i32_107, %c0_i32_108 : i32
    %c1_i32_109 = arith.constant 1 : i32
    %231 = arith.select %230, %c1_i32_109, %c8_i32_107 : i32
    %232 = arith.remsi %c12_i32, %231 : i32
    %c0_i32_110 = arith.constant 0 : i32
    %233 = arith.cmpi ne, %232, %c0_i32_110 : i32
    %c0_i32_111 = arith.constant 0 : i32
    %234 = arith.cmpi slt, %232, %c0_i32_111 : i32
    %c0_i32_112 = arith.constant 0 : i32
    %235 = arith.cmpi slt, %231, %c0_i32_112 : i32
    %236 = arith.xori %234, %235 : i1
    %237 = arith.andi %236, %233 : i1
    %238 = arith.addi %232, %231 : i32
    %239 = arith.select %237, %238, %232 : i32
    %240 = arith.index_cast %229 : i32 to index
    %c0_113 = arith.constant 0 : index
    %241 = vector.load %arg1[%240, %c0_113] : memref<64x32xf32, #tpu.memory_space<vmem>>, vector<1x32xf32>
    %242 = arith.index_cast %239 : i32 to index
    %c0_114 = arith.constant 0 : index
    %243 = vector.load %arg2[%242, %c0_114] : memref<8x32xf32, #tpu.memory_space<vmem>>, vector<1x32xf32>
    %244 = arith.addf %241, %243 : vector<1x32xf32>
    %245 = arith.index_cast %c12_i32 : i32 to index
    %c0_115 = arith.constant 0 : index
    %246 = vector.load %arg12[%245, %c0_115] : memref<16x32xf32, #tpu.memory_space<vmem>>, vector<1x32xf32>
    tpu.vector_store %arg12[%245, %c0_115], %244 {strides = array<i32>} : memref<16x32xf32, #tpu.memory_space<vmem>>, vector<1x32xf32>,
    %c13_i32 = arith.constant 13 : i32
    %247 = arith.index_cast %c13_i32 : i32 to index
    %248 = memref.load %arg0[%247] : memref<16xi32, #tpu.memory_space<smem>>
    %c8_i32_116 = arith.constant 8 : i32
    %c0_i32_117 = arith.constant 0 : i32
    %249 = arith.cmpi eq, %c8_i32_116, %c0_i32_117 : i32
    %c1_i32_118 = arith.constant 1 : i32
    %250 = arith.select %249, %c1_i32_118, %c8_i32_116 : i32
    %251 = arith.remsi %c13_i32, %250 : i32
    %c0_i32_119 = arith.constant 0 : i32
    %252 = arith.cmpi ne, %251, %c0_i32_119 : i32
    %c0_i32_120 = arith.constant 0 : i32
    %253 = arith.cmpi slt, %251, %c0_i32_120 : i32
    %c0_i32_121 = arith.constant 0 : i32
    %254 = arith.cmpi slt, %250, %c0_i32_121 : i32
    %255 = arith.xori %253, %254 : i1
    %256 = arith.andi %255, %252 : i1
    %257 = arith.addi %251, %250 : i32
    %258 = arith.select %256, %257, %251 : i32
    %259 = arith.index_cast %248 : i32 to index
    %c0_122 = arith.constant 0 : index
    %260 = vector.load %arg1[%259, %c0_122] : memref<64x32xf32, #tpu.memory_space<vmem>>, vector<1x32xf32>
    %261 = arith.index_cast %258 : i32 to index
    %c0_123 = arith.constant 0 : index
    %262 = vector.load %arg2[%261, %c0_123] : memref<8x32xf32, #tpu.memory_space<vmem>>, vector<1x32xf32>
    %263 = arith.addf %260, %262 : vector<1x32xf32>
    %264 = arith.index_cast %c13_i32 : i32 to index
    %c0_124 = arith.constant 0 : index
    %265 = vector.load %arg12[%264, %c0_124] : memref<16x32xf32, #tpu.memory_space<vmem>>, vector<1x32xf32>
    tpu.vector_store %arg12[%264, %c0_124], %263 {strides = array<i32>} : memref<16x32xf32, #tpu.memory_space<vmem>>, vector<1x32xf32>,
    %c14_i32 = arith.constant 14 : i32
    %266 = arith.index_cast %c14_i32 : i32 to index
    %267 = memref.load %arg0[%266] : memref<16xi32, #tpu.memory_space<smem>>
    %c8_i32_125 = arith.constant 8 : i32
    %c0_i32_126 = arith.constant 0 : i32
    %268 = arith.cmpi eq, %c8_i32_125, %c0_i32_126 : i32
    %c1_i32_127 = arith.constant 1 : i32
    %269 = arith.select %268, %c1_i32_127, %c8_i32_125 : i32
    %270 = arith.remsi %c14_i32, %269 : i32
    %c0_i32_128 = arith.constant 0 : i32
    %271 = arith.cmpi ne, %270, %c0_i32_128 : i32
    %c0_i32_129 = arith.constant 0 : i32
    %272 = arith.cmpi slt, %270, %c0_i32_129 : i32
    %c0_i32_130 = arith.constant 0 : i32
    %273 = arith.cmpi slt, %269, %c0_i32_130 : i32
    %274 = arith.xori %272, %273 : i1
    %275 = arith.andi %274, %271 : i1
    %276 = arith.addi %270, %269 : i32
    %277 = arith.select %275, %276, %270 : i32
    %278 = arith.index_cast %267 : i32 to index
    %c0_131 = arith.constant 0 : index
    %279 = vector.load %arg1[%278, %c0_131] : memref<64x32xf32, #tpu.memory_space<vmem>>, vector<1x32xf32>
    %280 = arith.index_cast %277 : i32 to index
    %c0_132 = arith.constant 0 : index
    %281 = vector.load %arg2[%280, %c0_132] : memref<8x32xf32, #tpu.memory_space<vmem>>, vector<1x32xf32>
    %282 = arith.addf %279, %281 : vector<1x32xf32>
    %283 = arith.index_cast %c14_i32 : i32 to index
    %c0_133 = arith.constant 0 : index
    %284 = vector.load %arg12[%283, %c0_133] : memref<16x32xf32, #tpu.memory_space<vmem>>, vector<1x32xf32>
    tpu.vector_store %arg12[%283, %c0_133], %282 {strides = array<i32>} : memref<16x32xf32, #tpu.memory_space<vmem>>, vector<1x32xf32>,
    %c15_i32 = arith.constant 15 : i32
    %285 = arith.index_cast %c15_i32 : i32 to index
    %286 = memref.load %arg0[%285] : memref<16xi32, #tpu.memory_space<smem>>
    %c8_i32_134 = arith.constant 8 : i32
    %c0_i32_135 = arith.constant 0 : i32
    %287 = arith.cmpi eq, %c8_i32_134, %c0_i32_135 : i32
    %c1_i32_136 = arith.constant 1 : i32
    %288 = arith.select %287, %c1_i32_136, %c8_i32_134 : i32
    %289 = arith.remsi %c15_i32, %288 : i32
    %c0_i32_137 = arith.constant 0 : i32
    %290 = arith.cmpi ne, %289, %c0_i32_137 : i32
    %c0_i32_138 = arith.constant 0 : i32
    %291 = arith.cmpi slt, %289, %c0_i32_138 : i32
    %c0_i32_139 = arith.constant 0 : i32
    %292 = arith.cmpi slt, %288, %c0_i32_139 : i32
    %293 = arith.xori %291, %292 : i1
    %294 = arith.andi %293, %290 : i1
    %295 = arith.addi %289, %288 : i32
    %296 = arith.select %294, %295, %289 : i32
    %297 = arith.index_cast %286 : i32 to index
    %c0_140 = arith.constant 0 : index
    %298 = vector.load %arg1[%297, %c0_140] : memref<64x32xf32, #tpu.memory_space<vmem>>, vector<1x32xf32>
    %299 = arith.index_cast %296 : i32 to index
    %c0_141 = arith.constant 0 : index
    %300 = vector.load %arg2[%299, %c0_141] : memref<8x32xf32, #tpu.memory_space<vmem>>, vector<1x32xf32>
    %301 = arith.addf %298, %300 : vector<1x32xf32>
    %302 = arith.index_cast %c15_i32 : i32 to index
    %c0_142 = arith.constant 0 : index
    %303 = vector.load %arg12[%302, %c0_142] : memref<16x32xf32, #tpu.memory_space<vmem>>, vector<1x32xf32>
    tpu.vector_store %arg12[%302, %c0_142], %301 {strides = array<i32>} : memref<16x32xf32, #tpu.memory_space<vmem>>, vector<1x32xf32>,
    %c16_i32 = arith.constant 16 : i32
    %c0_143 = arith.constant 0 : index
    %c0_144 = arith.constant 0 : index
    %304 = vector.load %arg12[%c0_143, %c0_144] : memref<16x32xf32, #tpu.memory_space<vmem>>, vector<16x32xf32>
    %305 = tpu.iota {dimensions = array<i32: 0>} : vector<8x8xi32>
    %306 = tpu.iota {dimensions = array<i32: 1>} : vector<8x8xi32>
    %307 = arith.cmpi sle, %306, %305 : vector<8x8xi32>
    %308 = vector.shape_cast %307 : vector<8x8xi1> to vector<1x8x8xi1>
    %c0_145 = arith.constant 0 : index
    %c0_146 = arith.constant 0 : index
    %c0_147 = arith.constant 0 : index
    %309 = vector.load %arg7[%c0_145, %c0_146, %c0_147] : memref<2x6x32xf32, #tpu.memory_space<vmem>>, vector<1x6x32xf32>
    %310 = vector.shape_cast %309 : vector<1x6x32xf32> to vector<6x32xf32>
    %311 = vector.extract_strided_slice %310 {offsets = [0, 0], sizes = [1, 32], strides = [1, 1]} : vector<6x32xf32> to vector<1x32xf32>
    %312 = vector.extract_strided_slice %310 {offsets = [1, 0], sizes = [1, 32], strides = [1, 1]} : vector<6x32xf32> to vector<1x32xf32>
    %313 = vector.extract_strided_slice %310 {offsets = [2, 0], sizes = [1, 32], strides = [1, 1]} : vector<6x32xf32> to vector<1x32xf32>
    %314 = vector.extract_strided_slice %310 {offsets = [3, 0], sizes = [1, 32], strides = [1, 1]} : vector<6x32xf32> to vector<1x32xf32>
    %315 = vector.extract_strided_slice %310 {offsets = [4, 0], sizes = [1, 32], strides = [1, 1]} : vector<6x32xf32> to vector<1x32xf32>
    %316 = vector.extract_strided_slice %310 {offsets = [5, 0], sizes = [1, 32], strides = [1, 1]} : vector<6x32xf32> to vector<1x32xf32>
    %cst = arith.constant dense<0.000000e+00> : vector<16xf32>
    %317 = vector.multi_reduction <add>, %304, %cst [1] : vector<16x32xf32> to vector<16xf32>
    %318 = vector.shape_cast %317 : vector<16xf32> to vector<16x1xf32>
    %cst_148 = arith.constant 3.200000e+01 : f32
    %319 = vector.broadcast %cst_148 : f32 to vector<16x1xf32>
    %320 = arith.divf %318, %319 : vector<16x1xf32>
    %321 = vector.broadcast %320 : vector<16x1xf32> to vector<16x32xf32>
    %322 = arith.subf %304, %321 : vector<16x32xf32>
    %323 = arith.mulf %322, %322 : vector<16x32xf32>
    %cst_149 = arith.constant dense<0.000000e+00> : vector<16xf32>
    %324 = vector.multi_reduction <add>, %323, %cst_149 [1] : vector<16x32xf32> to vector<16xf32>
    %325 = vector.shape_cast %324 : vector<16xf32> to vector<16x1xf32>
    %cst_150 = arith.constant 3.200000e+01 : f32
    %326 = vector.broadcast %cst_150 : f32 to vector<16x1xf32>
    %327 = arith.divf %325, %326 : vector<16x1xf32>
    %328 = vector.broadcast %320 : vector<16x1xf32> to vector<16x32xf32>
    %329 = arith.subf %304, %328 : vector<16x32xf32>
    %cst_151 = arith.constant 9.99999974E-6 : f32
    %330 = vector.broadcast %cst_151 : f32 to vector<16x1xf32>
    %331 = arith.addf %327, %330 : vector<16x1xf32>
    %332 = math.rsqrt %331 : vector<16x1xf32>
    %333 = vector.broadcast %332 : vector<16x1xf32> to vector<16x32xf32>
    %334 = arith.mulf %329, %333 : vector<16x32xf32>
    %335 = vector.broadcast %311 : vector<1x32xf32> to vector<16x32xf32>
    %336 = arith.mulf %334, %335 : vector<16x32xf32>
    %337 = vector.broadcast %312 : vector<1x32xf32> to vector<16x32xf32>
    %338 = arith.addf %336, %337 : vector<16x32xf32>
    %339 = arith.truncf %338 : vector<16x32xf32> to vector<16x32xbf16>
    %c0_152 = arith.constant 0 : index
    %c0_153 = arith.constant 0 : index
    %c0_154 = arith.constant 0 : index
    %340 = vector.load %arg3[%c0_152, %c0_153, %c0_154] : memref<2x32x96xbf16, #tpu.memory_space<vmem>>, vector<1x32x96xbf16>
    %341 = vector.shape_cast %340 : vector<1x32x96xbf16> to vector<32x96xbf16>
    %cst_155 = arith.constant dense<0.000000e+00> : vector<16x96xf32>
    %342 = tpu.matmul %339, %341, %cst_155 {dimension_numbers = #tpu.dot_dimension_numbers<[1], [0], [0], [1], [0, 0, 1, 1], [], []>} : vector<16x32xbf16>, vector<32x96xbf16>, vector<16x96xf32> -> vector<16x96xf32>
    %c0_156 = arith.constant 0 : index
    %c0_157 = arith.constant 0 : index
    %c0_158 = arith.constant 0 : index
    %343 = vector.load %arg8[%c0_156, %c0_157, %c0_158] : memref<2x1x96xf32, #tpu.memory_space<vmem>>, vector<1x1x96xf32>
    %344 = vector.shape_cast %343 : vector<1x1x96xf32> to vector<1x96xf32>
    %345 = vector.broadcast %344 : vector<1x96xf32> to vector<16x96xf32>
    %346 = arith.addf %342, %345 : vector<16x96xf32>
    %347 = vector.extract_strided_slice %346 {offsets = [0, 0], sizes = [16, 32], strides = [1, 1]} : vector<16x96xf32> to vector<16x32xf32>
    %348 = vector.extract_strided_slice %347 {offsets = [0, 0], sizes = [16, 8], strides = [1, 1]} : vector<16x32xf32> to vector<16x8xf32>
    %349 = vector.shape_cast %348 : vector<16x8xf32> to vector<2x8x8xf32>
    %350 = vector.extract_strided_slice %347 {offsets = [0, 8], sizes = [16, 8], strides = [1, 1]} : vector<16x32xf32> to vector<16x8xf32>
    %351 = vector.shape_cast %350 : vector<16x8xf32> to vector<2x8x8xf32>
    %352 = vector.extract_strided_slice %347 {offsets = [0, 16], sizes = [16, 8], strides = [1, 1]} : vector<16x32xf32> to vector<16x8xf32>
    %353 = vector.shape_cast %352 : vector<16x8xf32> to vector<2x8x8xf32>
    %354 = vector.extract_strided_slice %347 {offsets = [0, 24], sizes = [16, 8], strides = [1, 1]} : vector<16x32xf32> to vector<16x8xf32>
    %355 = vector.shape_cast %354 : vector<16x8xf32> to vector<2x8x8xf32>
    %356 = tpu.concatenate %349, %351, %353, %355 in 0 : vector<2x8x8xf32>, vector<2x8x8xf32>, vector<2x8x8xf32>, vector<2x8x8xf32> -> vector<8x8x8xf32>
    %357 = vector.extract_strided_slice %346 {offsets = [0, 32], sizes = [16, 32], strides = [1, 1]} : vector<16x96xf32> to vector<16x32xf32>
    %358 = vector.extract_strided_slice %357 {offsets = [0, 0], sizes = [16, 8], strides = [1, 1]} : vector<16x32xf32> to vector<16x8xf32>
    %359 = vector.shape_cast %358 : vector<16x8xf32> to vector<2x8x8xf32>
    %360 = vector.extract_strided_slice %357 {offsets = [0, 8], sizes = [16, 8], strides = [1, 1]} : vector<16x32xf32> to vector<16x8xf32>
    %361 = vector.shape_cast %360 : vector<16x8xf32> to vector<2x8x8xf32>
    %362 = vector.extract_strided_slice %357 {offsets = [0, 16], sizes = [16, 8], strides = [1, 1]} : vector<16x32xf32> to vector<16x8xf32>
    %363 = vector.shape_cast %362 : vector<16x8xf32> to vector<2x8x8xf32>
    %364 = vector.extract_strided_slice %357 {offsets = [0, 24], sizes = [16, 8], strides = [1, 1]} : vector<16x32xf32> to vector<16x8xf32>
    %365 = vector.shape_cast %364 : vector<16x8xf32> to vector<2x8x8xf32>
    %366 = tpu.concatenate %359, %361, %363, %365 in 0 : vector<2x8x8xf32>, vector<2x8x8xf32>, vector<2x8x8xf32>, vector<2x8x8xf32> -> vector<8x8x8xf32>
    %367 = vector.extract_strided_slice %346 {offsets = [0, 64], sizes = [16, 32], strides = [1, 1]} : vector<16x96xf32> to vector<16x32xf32>
    %368 = vector.extract_strided_slice %367 {offsets = [0, 0], sizes = [16, 8], strides = [1, 1]} : vector<16x32xf32> to vector<16x8xf32>
    %369 = vector.shape_cast %368 : vector<16x8xf32> to vector<2x8x8xf32>
    %370 = vector.extract_strided_slice %367 {offsets = [0, 8], sizes = [16, 8], strides = [1, 1]} : vector<16x32xf32> to vector<16x8xf32>
    %371 = vector.shape_cast %370 : vector<16x8xf32> to vector<2x8x8xf32>
    %372 = vector.extract_strided_slice %367 {offsets = [0, 16], sizes = [16, 8], strides = [1, 1]} : vector<16x32xf32> to vector<16x8xf32>
    %373 = vector.shape_cast %372 : vector<16x8xf32> to vector<2x8x8xf32>
    %374 = vector.extract_strided_slice %367 {offsets = [0, 24], sizes = [16, 8], strides = [1, 1]} : vector<16x32xf32> to vector<16x8xf32>
    %375 = vector.shape_cast %374 : vector<16x8xf32> to vector<2x8x8xf32>
    %376 = tpu.concatenate %369, %371, %373, %375 in 0 : vector<2x8x8xf32>, vector<2x8x8xf32>, vector<2x8x8xf32>, vector<2x8x8xf32> -> vector<8x8x8xf32>
    "tpu.trace_start"() <{level = 10 : i32, message = "bqd,bkd->bqk"}> : () -> ()
    %cst_159 = arith.constant dense<0.000000e+00> : vector<8x8x8xf32>
    %377 = tpu.matmul %356, %366, %cst_159 {dimension_numbers = #tpu.dot_dimension_numbers<[2], [2], [1], [1], [0, 0, 0, 1, 1, 1], [0], [0]>} : vector<8x8x8xf32>, vector<8x8x8xf32>, vector<8x8x8xf32> -> vector<8x8x8xf32>
    %cst_160 = arith.constant -1.000000e+30 : f32
    "tpu.trace_stop"() : () -> ()
    %378 = vector.shape_cast %308 : vector<1x8x8xi1> to vector<1x8x8xi1>
    %379 = vector.broadcast %378 : vector<1x8x8xi1> to vector<8x8x8xi1>
    %380 = vector.broadcast %cst_160 : f32 to vector<8x8x8xf32>
    %381 = arith.select %379, %377, %380 : vector<8x8x8xi1>, vector<8x8x8xf32>
    %cst_161 = arith.constant dense<0xFF800000> : vector<8x8xf32>
    %382 = vector.multi_reduction <maximumf>, %381, %cst_161 [2] : vector<8x8x8xf32> to vector<8x8xf32>
    %383 = vector.shape_cast %382 : vector<8x8xf32> to vector<8x8x1xf32>
    %384 = vector.broadcast %383 : vector<8x8x1xf32> to vector<8x8x8xf32>
    %385 = arith.subf %381, %384 : vector<8x8x8xf32>
    %386 = math.exp %385 : vector<8x8x8xf32>
    %cst_162 = arith.constant dense<0.000000e+00> : vector<8x8xf32>
    %387 = vector.multi_reduction <add>, %386, %cst_162 [2] : vector<8x8x8xf32> to vector<8x8xf32>
    %388 = vector.shape_cast %387 : vector<8x8xf32> to vector<8x8x1xf32>
    %389 = tpu.reciprocal %388 {approx = true} : vector<8x8x1xf32> -> vector<8x8x1xf32>
    %390 = vector.broadcast %389 : vector<8x8x1xf32> to vector<8x8x8xf32>
    %391 = arith.mulf %386, %390 : vector<8x8x8xf32>
    "tpu.trace_start"() <{level = 10 : i32, message = "bqk,bkd->bqd"}> : () -> ()
    %cst_163 = arith.constant dense<0.000000e+00> : vector<8x8x8xf32>
    %392 = tpu.matmul %391, %376, %cst_163 {dimension_numbers = #tpu.dot_dimension_numbers<[2], [1], [1], [2], [0, 0, 0, 1, 1, 2], [0], [0]>} : vector<8x8x8xf32>, vector<8x8x8xf32>, vector<8x8x8xf32> -> vector<8x8x8xf32>
    "tpu.trace_stop"() : () -> ()
    %393 = vector.shape_cast %392 : vector<8x8x8xf32> to vector<4x16x8xf32>
    %394 = arith.truncf %393 : vector<4x16x8xf32> to vector<4x16x8xbf16>
    %c0_164 = arith.constant 0 : index
    %c0_165 = arith.constant 0 : index
    %c0_166 = arith.constant 0 : index
    %c0_167 = arith.constant 0 : index
    %395 = vector.load %arg4[%c0_164, %c0_165, %c0_166, %c0_167] : memref<2x4x8x32xbf16, #tpu.memory_space<vmem>>, vector<1x4x8x32xbf16>
    %396 = vector.shape_cast %395 : vector<1x4x8x32xbf16> to vector<4x8x32xbf16>
    "tpu.trace_start"() <{level = 10 : i32, message = "hmd,hdn->hmn"}> : () -> ()
    %cst_168 = arith.constant dense<0.000000e+00> : vector<4x16x32xf32>
    %397 = tpu.matmul %394, %396, %cst_168 {dimension_numbers = #tpu.dot_dimension_numbers<[2], [1], [1], [2], [0, 0, 0, 1, 1, 2], [0], [0]>} : vector<4x16x8xbf16>, vector<4x8x32xbf16>, vector<4x16x32xf32> -> vector<4x16x32xf32>
    "tpu.trace_stop"() : () -> ()
    %cst_169 = arith.constant dense<0.000000e+00> : vector<16x32xf32>
    %398 = vector.multi_reduction <add>, %397, %cst_169 [0] : vector<4x16x32xf32> to vector<16x32xf32>
    %399 = arith.addf %304, %398 : vector<16x32xf32>
    %400 = vector.broadcast %315 : vector<1x32xf32> to vector<16x32xf32>
    %401 = arith.addf %399, %400 : vector<16x32xf32>
    %cst_170 = arith.constant dense<0.000000e+00> : vector<16xf32>
    %402 = vector.multi_reduction <add>, %401, %cst_170 [1] : vector<16x32xf32> to vector<16xf32>
    %403 = vector.shape_cast %402 : vector<16xf32> to vector<16x1xf32>
    %cst_171 = arith.constant 3.200000e+01 : f32
    %404 = vector.broadcast %cst_171 : f32 to vector<16x1xf32>
    %405 = arith.divf %403, %404 : vector<16x1xf32>
    %406 = vector.broadcast %405 : vector<16x1xf32> to vector<16x32xf32>
    %407 = arith.subf %401, %406 : vector<16x32xf32>
    %408 = arith.mulf %407, %407 : vector<16x32xf32>
    %cst_172 = arith.constant dense<0.000000e+00> : vector<16xf32>
    %409 = vector.multi_reduction <add>, %408, %cst_172 [1] : vector<16x32xf32> to vector<16xf32>
    %410 = vector.shape_cast %409 : vector<16xf32> to vector<16x1xf32>
    %cst_173 = arith.constant 3.200000e+01 : f32
    %411 = vector.broadcast %cst_173 : f32 to vector<16x1xf32>
    %412 = arith.divf %410, %411 : vector<16x1xf32>
    %413 = vector.broadcast %405 : vector<16x1xf32> to vector<16x32xf32>
    %414 = arith.subf %401, %413 : vector<16x32xf32>
    %cst_174 = arith.constant 9.99999974E-6 : f32
    %415 = vector.broadcast %cst_174 : f32 to vector<16x1xf32>
    %416 = arith.addf %412, %415 : vector<16x1xf32>
    %417 = math.rsqrt %416 : vector<16x1xf32>
    %418 = vector.broadcast %417 : vector<16x1xf32> to vector<16x32xf32>
    %419 = arith.mulf %414, %418 : vector<16x32xf32>
    %420 = vector.broadcast %313 : vector<1x32xf32> to vector<16x32xf32>
    %421 = arith.mulf %419, %420 : vector<16x32xf32>
    %422 = vector.broadcast %314 : vector<1x32xf32> to vector<16x32xf32>
    %423 = arith.addf %421, %422 : vector<16x32xf32>
    %424 = arith.truncf %423 : vector<16x32xf32> to vector<16x32xbf16>
    %c0_175 = arith.constant 0 : index
    %c0_176 = arith.constant 0 : index
    %c0_177 = arith.constant 0 : index
    %425 = vector.load %arg5[%c0_175, %c0_176, %c0_177] : memref<2x32x128xbf16, #tpu.memory_space<vmem>>, vector<1x32x128xbf16>
    %426 = vector.shape_cast %425 : vector<1x32x128xbf16> to vector<32x128xbf16>
    %cst_178 = arith.constant dense<0.000000e+00> : vector<16x128xf32>
    %427 = tpu.matmul %424, %426, %cst_178 {dimension_numbers = #tpu.dot_dimension_numbers<[1], [0], [0], [1], [0, 0, 1, 1], [], []>} : vector<16x32xbf16>, vector<32x128xbf16>, vector<16x128xf32> -> vector<16x128xf32>
    %c0_179 = arith.constant 0 : index
    %c0_180 = arith.constant 0 : index
    %c0_181 = arith.constant 0 : index
    %428 = vector.load %arg9[%c0_179, %c0_180, %c0_181] : memref<2x1x128xf32, #tpu.memory_space<vmem>>, vector<1x1x128xf32>
    %429 = vector.shape_cast %428 : vector<1x1x128xf32> to vector<1x128xf32>
    %430 = vector.broadcast %429 : vector<1x128xf32> to vector<16x128xf32>
    %431 = arith.addf %427, %430 : vector<16x128xf32>
    %cst_182 = arith.constant 1.702000e+00 : f32
    %432 = vector.broadcast %cst_182 : f32 to vector<16x128xf32>
    %433 = arith.mulf %432, %431 : vector<16x128xf32>
    %434 = arith.negf %433 : vector<16x128xf32>
    %435 = math.exp %434 : vector<16x128xf32>
    %cst_183 = arith.constant 1.000000e+00 : f32
    %436 = vector.broadcast %cst_183 : f32 to vector<16x128xf32>
    %437 = arith.addf %436, %435 : vector<16x128xf32>
    %438 = arith.divf %436, %437 : vector<16x128xf32>
    %439 = arith.mulf %431, %438 : vector<16x128xf32>
    %440 = arith.truncf %439 : vector<16x128xf32> to vector<16x128xbf16>
    %c0_184 = arith.constant 0 : index
    %c0_185 = arith.constant 0 : index
    %c0_186 = arith.constant 0 : index
    %441 = vector.load %arg6[%c0_184, %c0_185, %c0_186] : memref<2x128x32xbf16, #tpu.memory_space<vmem>>, vector<1x128x32xbf16>
    %442 = vector.shape_cast %441 : vector<1x128x32xbf16> to vector<128x32xbf16>
    %cst_187 = arith.constant dense<0.000000e+00> : vector<16x32xf32>
    %443 = tpu.matmul %440, %442, %cst_187 {dimension_numbers = #tpu.dot_dimension_numbers<[1], [0], [0], [1], [0, 0, 1, 1], [], []>} : vector<16x128xbf16>, vector<128x32xbf16>, vector<16x32xf32> -> vector<16x32xf32>
    %444 = arith.addf %401, %443 : vector<16x32xf32>
    %445 = vector.broadcast %316 : vector<1x32xf32> to vector<16x32xf32>
    %446 = arith.addf %444, %445 : vector<16x32xf32>
    %c1 = arith.constant 1 : index
    %c0_188 = arith.constant 0 : index
    %c0_189 = arith.constant 0 : index
    %447 = vector.load %arg7[%c1, %c0_188, %c0_189] : memref<2x6x32xf32, #tpu.memory_space<vmem>>, vector<1x6x32xf32>
    %448 = vector.shape_cast %447 : vector<1x6x32xf32> to vector<6x32xf32>
    %449 = vector.extract_strided_slice %448 {offsets = [0, 0], sizes = [1, 32], strides = [1, 1]} : vector<6x32xf32> to vector<1x32xf32>
    %450 = vector.extract_strided_slice %448 {offsets = [1, 0], sizes = [1, 32], strides = [1, 1]} : vector<6x32xf32> to vector<1x32xf32>
    %451 = vector.extract_strided_slice %448 {offsets = [2, 0], sizes = [1, 32], strides = [1, 1]} : vector<6x32xf32> to vector<1x32xf32>
    %452 = vector.extract_strided_slice %448 {offsets = [3, 0], sizes = [1, 32], strides = [1, 1]} : vector<6x32xf32> to vector<1x32xf32>
    %453 = vector.extract_strided_slice %448 {offsets = [4, 0], sizes = [1, 32], strides = [1, 1]} : vector<6x32xf32> to vector<1x32xf32>
    %454 = vector.extract_strided_slice %448 {offsets = [5, 0], sizes = [1, 32], strides = [1, 1]} : vector<6x32xf32> to vector<1x32xf32>
    %cst_190 = arith.constant dense<0.000000e+00> : vector<16xf32>
    %455 = vector.multi_reduction <add>, %446, %cst_190 [1] : vector<16x32xf32> to vector<16xf32>
    %456 = vector.shape_cast %455 : vector<16xf32> to vector<16x1xf32>
    %cst_191 = arith.constant 3.200000e+01 : f32
    %457 = vector.broadcast %cst_191 : f32 to vector<16x1xf32>
    %458 = arith.divf %456, %457 : vector<16x1xf32>
    %459 = vector.broadcast %458 : vector<16x1xf32> to vector<16x32xf32>
    %460 = arith.subf %446, %459 : vector<16x32xf32>
    %461 = arith.mulf %460, %460 : vector<16x32xf32>
    %cst_192 = arith.constant dense<0.000000e+00> : vector<16xf32>
    %462 = vector.multi_reduction <add>, %461, %cst_192 [1] : vector<16x32xf32> to vector<16xf32>
    %463 = vector.shape_cast %462 : vector<16xf32> to vector<16x1xf32>
    %cst_193 = arith.constant 3.200000e+01 : f32
    %464 = vector.broadcast %cst_193 : f32 to vector<16x1xf32>
    %465 = arith.divf %463, %464 : vector<16x1xf32>
    %466 = vector.broadcast %458 : vector<16x1xf32> to vector<16x32xf32>
    %467 = arith.subf %446, %466 : vector<16x32xf32>
    %cst_194 = arith.constant 9.99999974E-6 : f32
    %468 = vector.broadcast %cst_194 : f32 to vector<16x1xf32>
    %469 = arith.addf %465, %468 : vector<16x1xf32>
    %470 = math.rsqrt %469 : vector<16x1xf32>
    %471 = vector.broadcast %470 : vector<16x1xf32> to vector<16x32xf32>
    %472 = arith.mulf %467, %471 : vector<16x32xf32>
    %473 = vector.broadcast %449 : vector<1x32xf32> to vector<16x32xf32>
    %474 = arith.mulf %472, %473 : vector<16x32xf32>
    %475 = vector.broadcast %450 : vector<1x32xf32> to vector<16x32xf32>
    %476 = arith.addf %474, %475 : vector<16x32xf32>
    %477 = arith.truncf %476 : vector<16x32xf32> to vector<16x32xbf16>
    %c1_195 = arith.constant 1 : index
    %c0_196 = arith.constant 0 : index
    %c0_197 = arith.constant 0 : index
    %478 = vector.load %arg3[%c1_195, %c0_196, %c0_197] : memref<2x32x96xbf16, #tpu.memory_space<vmem>>, vector<1x32x96xbf16>
    %479 = vector.shape_cast %478 : vector<1x32x96xbf16> to vector<32x96xbf16>
    %cst_198 = arith.constant dense<0.000000e+00> : vector<16x96xf32>
    %480 = tpu.matmul %477, %479, %cst_198 {dimension_numbers = #tpu.dot_dimension_numbers<[1], [0], [0], [1], [0, 0, 1, 1], [], []>} : vector<16x32xbf16>, vector<32x96xbf16>, vector<16x96xf32> -> vector<16x96xf32>
    %c1_199 = arith.constant 1 : index
    %c0_200 = arith.constant 0 : index
    %c0_201 = arith.constant 0 : index
    %481 = vector.load %arg8[%c1_199, %c0_200, %c0_201] : memref<2x1x96xf32, #tpu.memory_space<vmem>>, vector<1x1x96xf32>
    %482 = vector.shape_cast %481 : vector<1x1x96xf32> to vector<1x96xf32>
    %483 = vector.broadcast %482 : vector<1x96xf32> to vector<16x96xf32>
    %484 = arith.addf %480, %483 : vector<16x96xf32>
    %485 = vector.extract_strided_slice %484 {offsets = [0, 0], sizes = [16, 32], strides = [1, 1]} : vector<16x96xf32> to vector<16x32xf32>
    %486 = vector.extract_strided_slice %485 {offsets = [0, 0], sizes = [16, 8], strides = [1, 1]} : vector<16x32xf32> to vector<16x8xf32>
    %487 = vector.shape_cast %486 : vector<16x8xf32> to vector<2x8x8xf32>
    %488 = vector.extract_strided_slice %485 {offsets = [0, 8], sizes = [16, 8], strides = [1, 1]} : vector<16x32xf32> to vector<16x8xf32>
    %489 = vector.shape_cast %488 : vector<16x8xf32> to vector<2x8x8xf32>
    %490 = vector.extract_strided_slice %485 {offsets = [0, 16], sizes = [16, 8], strides = [1, 1]} : vector<16x32xf32> to vector<16x8xf32>
    %491 = vector.shape_cast %490 : vector<16x8xf32> to vector<2x8x8xf32>
    %492 = vector.extract_strided_slice %485 {offsets = [0, 24], sizes = [16, 8], strides = [1, 1]} : vector<16x32xf32> to vector<16x8xf32>
    %493 = vector.shape_cast %492 : vector<16x8xf32> to vector<2x8x8xf32>
    %494 = tpu.concatenate %487, %489, %491, %493 in 0 : vector<2x8x8xf32>, vector<2x8x8xf32>, vector<2x8x8xf32>, vector<2x8x8xf32> -> vector<8x8x8xf32>
    %495 = vector.extract_strided_slice %484 {offsets = [0, 32], sizes = [16, 32], strides = [1, 1]} : vector<16x96xf32> to vector<16x32xf32>
    %496 = vector.extract_strided_slice %495 {offsets = [0, 0], sizes = [16, 8], strides = [1, 1]} : vector<16x32xf32> to vector<16x8xf32>
    %497 = vector.shape_cast %496 : vector<16x8xf32> to vector<2x8x8xf32>
    %498 = vector.extract_strided_slice %495 {offsets = [0, 8], sizes = [16, 8], strides = [1, 1]} : vector<16x32xf32> to vector<16x8xf32>
    %499 = vector.shape_cast %498 : vector<16x8xf32> to vector<2x8x8xf32>
    %500 = vector.extract_strided_slice %495 {offsets = [0, 16], sizes = [16, 8], strides = [1, 1]} : vector<16x32xf32> to vector<16x8xf32>
    %501 = vector.shape_cast %500 : vector<16x8xf32> to vector<2x8x8xf32>
    %502 = vector.extract_strided_slice %495 {offsets = [0, 24], sizes = [16, 8], strides = [1, 1]} : vector<16x32xf32> to vector<16x8xf32>
    %503 = vector.shape_cast %502 : vector<16x8xf32> to vector<2x8x8xf32>
    %504 = tpu.concatenate %497, %499, %501, %503 in 0 : vector<2x8x8xf32>, vector<2x8x8xf32>, vector<2x8x8xf32>, vector<2x8x8xf32> -> vector<8x8x8xf32>
    %505 = vector.extract_strided_slice %484 {offsets = [0, 64], sizes = [16, 32], strides = [1, 1]} : vector<16x96xf32> to vector<16x32xf32>
    %506 = vector.extract_strided_slice %505 {offsets = [0, 0], sizes = [16, 8], strides = [1, 1]} : vector<16x32xf32> to vector<16x8xf32>
    %507 = vector.shape_cast %506 : vector<16x8xf32> to vector<2x8x8xf32>
    %508 = vector.extract_strided_slice %505 {offsets = [0, 8], sizes = [16, 8], strides = [1, 1]} : vector<16x32xf32> to vector<16x8xf32>
    %509 = vector.shape_cast %508 : vector<16x8xf32> to vector<2x8x8xf32>
    %510 = vector.extract_strided_slice %505 {offsets = [0, 16], sizes = [16, 8], strides = [1, 1]} : vector<16x32xf32> to vector<16x8xf32>
    %511 = vector.shape_cast %510 : vector<16x8xf32> to vector<2x8x8xf32>
    %512 = vector.extract_strided_slice %505 {offsets = [0, 24], sizes = [16, 8], strides = [1, 1]} : vector<16x32xf32> to vector<16x8xf32>
    %513 = vector.shape_cast %512 : vector<16x8xf32> to vector<2x8x8xf32>
    %514 = tpu.concatenate %507, %509, %511, %513 in 0 : vector<2x8x8xf32>, vector<2x8x8xf32>, vector<2x8x8xf32>, vector<2x8x8xf32> -> vector<8x8x8xf32>
    "tpu.trace_start"() <{level = 10 : i32, message = "bqd,bkd->bqk"}> : () -> ()
    %cst_202 = arith.constant dense<0.000000e+00> : vector<8x8x8xf32>
    %515 = tpu.matmul %494, %504, %cst_202 {dimension_numbers = #tpu.dot_dimension_numbers<[2], [2], [1], [1], [0, 0, 0, 1, 1, 1], [0], [0]>} : vector<8x8x8xf32>, vector<8x8x8xf32>, vector<8x8x8xf32> -> vector<8x8x8xf32>
    %cst_203 = arith.constant -1.000000e+30 : f32
    "tpu.trace_stop"() : () -> ()
    %516 = vector.shape_cast %308 : vector<1x8x8xi1> to vector<1x8x8xi1>
    %517 = vector.broadcast %516 : vector<1x8x8xi1> to vector<8x8x8xi1>
    %518 = vector.broadcast %cst_203 : f32 to vector<8x8x8xf32>
    %519 = arith.select %517, %515, %518 : vector<8x8x8xi1>, vector<8x8x8xf32>
    %cst_204 = arith.constant dense<0xFF800000> : vector<8x8xf32>
    %520 = vector.multi_reduction <maximumf>, %519, %cst_204 [2] : vector<8x8x8xf32> to vector<8x8xf32>
    %521 = vector.shape_cast %520 : vector<8x8xf32> to vector<8x8x1xf32>
    %522 = vector.broadcast %521 : vector<8x8x1xf32> to vector<8x8x8xf32>
    %523 = arith.subf %519, %522 : vector<8x8x8xf32>
    %524 = math.exp %523 : vector<8x8x8xf32>
    %cst_205 = arith.constant dense<0.000000e+00> : vector<8x8xf32>
    %525 = vector.multi_reduction <add>, %524, %cst_205 [2] : vector<8x8x8xf32> to vector<8x8xf32>
    %526 = vector.shape_cast %525 : vector<8x8xf32> to vector<8x8x1xf32>
    %527 = tpu.reciprocal %526 {approx = true} : vector<8x8x1xf32> -> vector<8x8x1xf32>
    %528 = vector.broadcast %527 : vector<8x8x1xf32> to vector<8x8x8xf32>
    %529 = arith.mulf %524, %528 : vector<8x8x8xf32>
    "tpu.trace_start"() <{level = 10 : i32, message = "bqk,bkd->bqd"}> : () -> ()
    %cst_206 = arith.constant dense<0.000000e+00> : vector<8x8x8xf32>
    %530 = tpu.matmul %529, %514, %cst_206 {dimension_numbers = #tpu.dot_dimension_numbers<[2], [1], [1], [2], [0, 0, 0, 1, 1, 2], [0], [0]>} : vector<8x8x8xf32>, vector<8x8x8xf32>, vector<8x8x8xf32> -> vector<8x8x8xf32>
    "tpu.trace_stop"() : () -> ()
    %531 = vector.shape_cast %530 : vector<8x8x8xf32> to vector<4x16x8xf32>
    %532 = arith.truncf %531 : vector<4x16x8xf32> to vector<4x16x8xbf16>
    %c1_207 = arith.constant 1 : index
    %c0_208 = arith.constant 0 : index
    %c0_209 = arith.constant 0 : index
    %c0_210 = arith.constant 0 : index
    %533 = vector.load %arg4[%c1_207, %c0_208, %c0_209, %c0_210] : memref<2x4x8x32xbf16, #tpu.memory_space<vmem>>, vector<1x4x8x32xbf16>
    %534 = vector.shape_cast %533 : vector<1x4x8x32xbf16> to vector<4x8x32xbf16>
    "tpu.trace_start"() <{level = 10 : i32, message = "hmd,hdn->hmn"}> : () -> ()
    %cst_211 = arith.constant dense<0.000000e+00> : vector<4x16x32xf32>
    %535 = tpu.matmul %532, %534, %cst_211 {dimension_numbers = #tpu.dot_dimension_numbers<[2], [1], [1], [2], [0, 0, 0, 1, 1, 2], [0], [0]>} : vector<4x16x8xbf16>, vector<4x8x32xbf16>, vector<4x16x32xf32> -> vector<4x16x32xf32>
    "tpu.trace_stop"() : () -> ()
    %cst_212 = arith.constant dense<0.000000e+00> : vector<16x32xf32>
    %536 = vector.multi_reduction <add>, %535, %cst_212 [0] : vector<4x16x32xf32> to vector<16x32xf32>
    %537 = arith.addf %446, %536 : vector<16x32xf32>
    %538 = vector.broadcast %453 : vector<1x32xf32> to vector<16x32xf32>
    %539 = arith.addf %537, %538 : vector<16x32xf32>
    %cst_213 = arith.constant dense<0.000000e+00> : vector<16xf32>
    %540 = vector.multi_reduction <add>, %539, %cst_213 [1] : vector<16x32xf32> to vector<16xf32>
    %541 = vector.shape_cast %540 : vector<16xf32> to vector<16x1xf32>
    %cst_214 = arith.constant 3.200000e+01 : f32
    %542 = vector.broadcast %cst_214 : f32 to vector<16x1xf32>
    %543 = arith.divf %541, %542 : vector<16x1xf32>
    %544 = vector.broadcast %543 : vector<16x1xf32> to vector<16x32xf32>
    %545 = arith.subf %539, %544 : vector<16x32xf32>
    %546 = arith.mulf %545, %545 : vector<16x32xf32>
    %cst_215 = arith.constant dense<0.000000e+00> : vector<16xf32>
    %547 = vector.multi_reduction <add>, %546, %cst_215 [1] : vector<16x32xf32> to vector<16xf32>
    %548 = vector.shape_cast %547 : vector<16xf32> to vector<16x1xf32>
    %cst_216 = arith.constant 3.200000e+01 : f32
    %549 = vector.broadcast %cst_216 : f32 to vector<16x1xf32>
    %550 = arith.divf %548, %549 : vector<16x1xf32>
    %551 = vector.broadcast %543 : vector<16x1xf32> to vector<16x32xf32>
    %552 = arith.subf %539, %551 : vector<16x32xf32>
    %cst_217 = arith.constant 9.99999974E-6 : f32
    %553 = vector.broadcast %cst_217 : f32 to vector<16x1xf32>
    %554 = arith.addf %550, %553 : vector<16x1xf32>
    %555 = math.rsqrt %554 : vector<16x1xf32>
    %556 = vector.broadcast %555 : vector<16x1xf32> to vector<16x32xf32>
    %557 = arith.mulf %552, %556 : vector<16x32xf32>
    %558 = vector.broadcast %451 : vector<1x32xf32> to vector<16x32xf32>
    %559 = arith.mulf %557, %558 : vector<16x32xf32>
    %560 = vector.broadcast %452 : vector<1x32xf32> to vector<16x32xf32>
    %561 = arith.addf %559, %560 : vector<16x32xf32>
    %562 = arith.truncf %561 : vector<16x32xf32> to vector<16x32xbf16>
    %c1_218 = arith.constant 1 : index
    %c0_219 = arith.constant 0 : index
    %c0_220 = arith.constant 0 : index
    %563 = vector.load %arg5[%c1_218, %c0_219, %c0_220] : memref<2x32x128xbf16, #tpu.memory_space<vmem>>, vector<1x32x128xbf16>
    %564 = vector.shape_cast %563 : vector<1x32x128xbf16> to vector<32x128xbf16>
    %cst_221 = arith.constant dense<0.000000e+00> : vector<16x128xf32>
    %565 = tpu.matmul %562, %564, %cst_221 {dimension_numbers = #tpu.dot_dimension_numbers<[1], [0], [0], [1], [0, 0, 1, 1], [], []>} : vector<16x32xbf16>, vector<32x128xbf16>, vector<16x128xf32> -> vector<16x128xf32>
    %c1_222 = arith.constant 1 : index
    %c0_223 = arith.constant 0 : index
    %c0_224 = arith.constant 0 : index
    %566 = vector.load %arg9[%c1_222, %c0_223, %c0_224] : memref<2x1x128xf32, #tpu.memory_space<vmem>>, vector<1x1x128xf32>
    %567 = vector.shape_cast %566 : vector<1x1x128xf32> to vector<1x128xf32>
    %568 = vector.broadcast %567 : vector<1x128xf32> to vector<16x128xf32>
    %569 = arith.addf %565, %568 : vector<16x128xf32>
    %cst_225 = arith.constant 1.702000e+00 : f32
    %570 = vector.broadcast %cst_225 : f32 to vector<16x128xf32>
    %571 = arith.mulf %570, %569 : vector<16x128xf32>
    %572 = arith.negf %571 : vector<16x128xf32>
    %573 = math.exp %572 : vector<16x128xf32>
    %cst_226 = arith.constant 1.000000e+00 : f32
    %574 = vector.broadcast %cst_226 : f32 to vector<16x128xf32>
    %575 = arith.addf %574, %573 : vector<16x128xf32>
    %576 = arith.divf %574, %575 : vector<16x128xf32>
    %577 = arith.mulf %569, %576 : vector<16x128xf32>
    %578 = arith.truncf %577 : vector<16x128xf32> to vector<16x128xbf16>
    %c1_227 = arith.constant 1 : index
    %c0_228 = arith.constant 0 : index
    %c0_229 = arith.constant 0 : index
    %579 = vector.load %arg6[%c1_227, %c0_228, %c0_229] : memref<2x128x32xbf16, #tpu.memory_space<vmem>>, vector<1x128x32xbf16>
    %580 = vector.shape_cast %579 : vector<1x128x32xbf16> to vector<128x32xbf16>
    %cst_230 = arith.constant dense<0.000000e+00> : vector<16x32xf32>
    %581 = tpu.matmul %578, %580, %cst_230 {dimension_numbers = #tpu.dot_dimension_numbers<[1], [0], [0], [1], [0, 0, 1, 1], [], []>} : vector<16x128xbf16>, vector<128x32xbf16>, vector<16x32xf32> -> vector<16x32xf32>
    %582 = arith.addf %539, %581 : vector<16x32xf32>
    %583 = vector.broadcast %454 : vector<1x32xf32> to vector<16x32xf32>
    %584 = arith.addf %582, %583 : vector<16x32xf32>
    %c0_231 = arith.constant 0 : index
    %c0_232 = arith.constant 0 : index
    %585 = vector.load %arg10[%c0_231, %c0_232] : memref<2x32xf32, #tpu.memory_space<vmem>>, vector<2x32xf32>
    %586 = vector.extract_strided_slice %585 {offsets = [0, 0], sizes = [1, 32], strides = [1, 1]} : vector<2x32xf32> to vector<1x32xf32>
    %587 = vector.extract_strided_slice %585 {offsets = [1, 0], sizes = [1, 32], strides = [1, 1]} : vector<2x32xf32> to vector<1x32xf32>
    %cst_233 = arith.constant dense<0.000000e+00> : vector<16xf32>
    %588 = vector.multi_reduction <add>, %584, %cst_233 [1] : vector<16x32xf32> to vector<16xf32>
    %589 = vector.shape_cast %588 : vector<16xf32> to vector<16x1xf32>
    %cst_234 = arith.constant 3.200000e+01 : f32
    %590 = vector.broadcast %cst_234 : f32 to vector<16x1xf32>
    %591 = arith.divf %589, %590 : vector<16x1xf32>
    %592 = vector.broadcast %591 : vector<16x1xf32> to vector<16x32xf32>
    %593 = arith.subf %584, %592 : vector<16x32xf32>
    %594 = arith.mulf %593, %593 : vector<16x32xf32>
    %cst_235 = arith.constant dense<0.000000e+00> : vector<16xf32>
    %595 = vector.multi_reduction <add>, %594, %cst_235 [1] : vector<16x32xf32> to vector<16xf32>
    %596 = vector.shape_cast %595 : vector<16xf32> to vector<16x1xf32>
    %cst_236 = arith.constant 3.200000e+01 : f32
    %597 = vector.broadcast %cst_236 : f32 to vector<16x1xf32>
    %598 = arith.divf %596, %597 : vector<16x1xf32>
    %599 = vector.broadcast %591 : vector<16x1xf32> to vector<16x32xf32>
    %600 = arith.subf %584, %599 : vector<16x32xf32>
    %cst_237 = arith.constant 9.99999974E-6 : f32
    %601 = vector.broadcast %cst_237 : f32 to vector<16x1xf32>
    %602 = arith.addf %598, %601 : vector<16x1xf32>
    %603 = math.rsqrt %602 : vector<16x1xf32>
    %604 = vector.broadcast %603 : vector<16x1xf32> to vector<16x32xf32>
    %605 = arith.mulf %600, %604 : vector<16x32xf32>
    %606 = vector.broadcast %586 : vector<1x32xf32> to vector<16x32xf32>
    %607 = arith.mulf %605, %606 : vector<16x32xf32>
    %608 = vector.broadcast %587 : vector<1x32xf32> to vector<16x32xf32>
    %609 = arith.addf %607, %608 : vector<16x32xf32>
    %c0_238 = arith.constant 0 : index
    %c0_239 = arith.constant 0 : index
    %610 = vector.load %arg11[%c0_238, %c0_239] : memref<16x32xf32, #tpu.memory_space<vmem>>, vector<16x32xf32>
    tpu.vector_store %arg11[%c0_238, %c0_239], %609 {strides = array<i32>} : memref<16x32xf32, #tpu.memory_space<vmem>>, vector<16x32xf32>,
    return
  }
}

</mosaic_0001>

<bundles_post_ra>
// kernel: tpu_custom_call.1
= control target key start
LH: loop header
LB: loop body
LE: loop exit
PB: predicated region body
PF: predicated region fallthrough
CT: control target
= control target key end

     0   :  { %s5649_s0 = inlined_call_operand.vmem [shape: s32[16], index: 0, kind: input, shape index: {}]   ;;  %s5650_s1 = inlined_call_operand.vmem [shape: f32[64,32], index: 1, kind: input, shape index: {}]   ;;  %s5651_s2 = inlined_call_operand.vmem [shape: f32[8,32], index: 2, kind: input, shape index: {}]   ;;  %s5652_s3 = inlined_call_operand.vmem [shape: bf16[2,32,96], index: 3, kind: input, shape index: {}]   ;;  %s5653_s4 = inlined_call_operand.vmem [shape: bf16[2,4,8,32], index: 4, kind: input, shape index: {}]   ;;  %s5654_s5 = inlined_call_operand.vmem [shape: bf16[2,32,128], index: 5, kind: input, shape index: {}]   ;;  %s5655_s6 = inlined_call_operand.vmem [shape: bf16[2,128,32], index: 6, kind: input, shape index: {}]   ;;  %s5656_s7 = inlined_call_operand.vmem [shape: f32[2,6,32], index: 7, kind: input, shape index: {}]   ;;  %s5657_s8 = inlined_call_operand.vmem [shape: f32[2,1,96], index: 8, kind: input, shape index: {}]   ;;  %s5658_s9 = inlined_call_operand.vmem [shape: f32[2,1,128], index: 9, kind: input, shape index: {}]   ;;  %s5659_s10 = inlined_call_operand.vmem [shape: f32[2,32], index: 10, kind: input, shape index: {}]   ;;  %s5660_s11 = inlined_call_operand.hbm [shape: f32[16,32], index: 11, kind: output, shape index: {}]  }
   0x1   :  { %5662 = sst [smem:[#allocation9_spill]] %s5660_s11 }
   0x2   :  { %16 = vsyncpa [#allocation5], 0 }
   0x3   :  { %17 = vsyncpa [#allocation4], 0  ;;  %s24_s19 = sshll.u32 %s5649_s0, 4  ;;  %s25_s19 = int_to_ptr.vmem [resolvable:$true] %s24_s19 }
   0x4   :  { %s4681_s20 = scalar_lea.vmem %s25_s19, 16  ;;  %p4686_p1 = scmp.lt.s32.totalorder %s25_s19, %s25_s19 }
   0x5   :  { %p4682_p0 = scmp.ne.s32.totalorder %s25_s19, %s4681_s20  ;;  %p4687_p2 = scmp.lt.s32.totalorder %s4681_s20, %s4681_s20 }
   0x7   :  { %p4688_p3 = por %p4687_p2, %p4686_p1 }
   0x9   :  { %p4689_p4 = pnand %p4688_p3, %p4682_p0 }
   0xb   :  { %4692 = shalt.err (!%p4689_p4)
}
   0xc   :  { %s4719_s21 = smov [#allocation3]  }
   0xd   :  { %27 = dma.vmem_to_smem %s25_s19, 16, %s4719_s21, [#allocation5]  }
   0xe   :  { %4715 = dma.done.wait [#allocation5], 16  }
   0xf   :  { %4716 = vsyncadd [#allocation5], 4294967280 }
  0x10   :  { %51 = sfence }
  0x11   :  { %s53_s22 = sld [smem:[#allocation3]]  ;;  %s4018_s23 = sld [smem:[#allocation3 + $0x1]]  ;;  %v56_v0 = vld [vmem:[%s5651_s2] sm:$0x1]  ;;  %vm58_vm0 = vcmask 253952   ;;  %vm158_vm1 = vcmask 261120  }
  0x12   :  { %s4019_s24 = sld [smem:[#allocation3 + $0x2]]  ;;  %s4020_s25 = sld [smem:[#allocation3 + $0x3]]  ;;  %v63_v1 = vld [vmem:[%s5651_s2 + $0x1] sm:$0x1]  ;;  %v69_v2 = vld [vmem:[%s5651_s2 + $0x2] sm:$0x1] }
  0x13   :  { %s4796_s0 = sld [smem:[#allocation3 + $0x4]]  ;;  %s4798_s28 = sld [smem:[#allocation3 + $0x5]]  ;;  %v75_v3 = vld [vmem:[%s5651_s2 + $0x3] sm:$0x1]  ;;  %v81_v4 = vld [vmem:[%s5651_s2 + $0x4] sm:$0x1] }
  0x14   :  { %s4803_s12 = sld [smem:[#allocation3 + $0x6]]  ;;  %s4808_s15 = sld [smem:[#allocation3 + $0x7]]  ;;  %v87_v6 = vld [vmem:[%s5651_s2 + $0x5] sm:$0x1]  ;;  %v93_v7 = vld [vmem:[%s5651_s2 + $0x6] sm:$0x1] }
  0x15   :  { %s4810_s16 = sld [smem:[#allocation3 + $0x8]]  ;;  %s4821_s29 = sld [smem:[#allocation3 + $0x9]]  ;;  %v99_v14 = vld [vmem:[%s5651_s2 + $0x7] sm:$0x1]  ;;  %v105_v15 = vld [vmem:[%s5651_s2] sm:$0x1] }
  0x16   :  { %s4838_s30 = sld [smem:[#allocation3 + $0xa]]  ;;  %s4859_s27 = sld [smem:[#allocation3 + $0xb]]  ;;  %v111_v22 = vld [vmem:[%s5651_s2 + $0x1] sm:$0x1]  ;;  %v117_v23 = vld [vmem:[%s5651_s2 + $0x2] sm:$0x1] }
  0x17   :  { %s54_s19 = scalar_lea.vmem %s5650_s1, %s53_s22  ;;  %s61_s14 = scalar_lea.vmem %s5650_s1, %s4018_s23  ;;  %v123_v30 = vld [vmem:[%s5651_s2 + $0x3] sm:$0x1]  ;;  %v129_v33 = vld [vmem:[%s5651_s2 + $0x4] sm:$0x1]  ;;  %v135_v35 = vld [vmem:[%s5651_s2 + $0x5] sm:$0x1] }
  0x18   :  { %v55_v5 = vld [vmem:[%s54_s19] sm:$0x1]  ;;  %s67_s22 = scalar_lea.vmem %s5650_s1, %s4019_s24  ;;  %s73_s23 = scalar_lea.vmem %s5650_s1, %s4020_s25  ;;  %v141_v36 = vld [vmem:[%s5651_s2 + $0x6] sm:$0x1]  ;;  %v147_v38 = vld [vmem:[%s5651_s2 + $0x7] sm:$0x1] }
  0x19   :  { %v57_v8 = vadd.f32 %v56_v0, %v55_v5  ;;  %v62_v9 = vld [vmem:[%s61_s14] sm:$0x1]  ;;  %s79_s13 = scalar_lea.vmem %s5650_s1, %s4796_s0  ;;  %s85_s14 = scalar_lea.vmem %s5650_s1, %s4798_s28  ;;  %v4720_v63 = vmov 0.0   ;;  %v4558_v0 = vld [vmem:[%s5652_s3 + $0x8] sm:$0xff]   ;;  %vm4721_vm2 = vmmov 0   ;;  %v152_v5 = vlaneseq }
  0x1a   :  { %v68_v10 = vld [vmem:[%s67_s22] sm:$0x1]  ;;  %v64_v11 = vadd.f32 %v63_v1, %v62_v9  ;;  %s91_s19 = scalar_lea.vmem %s5650_s1, %s4803_s12  ;;  %s97_s11 = scalar_lea.vmem %s5650_s1, %s4808_s15  ;;  %4266 = vmatprep.subr.bf16.mxu1 %v4720_v63  ;;  %4289 = vmatprep.subr.mxu0 %v4720_v63  ;;  %vm282_vm3 = vcmask 64512   ;;  %vm1606_vm5 = vcmask 1043456  }
  0x1b   :  { %v70_v12 = vadd.f32 %v69_v2, %v68_v10  ;;  %v74_v13 = vld [vmem:[%s73_s23] sm:$0x1]  ;;  %59 = vst.msk [vmem:[#allocation2] sm:$0x1] %vm58_vm0, %v57_v8  ;;  %s103_s17 = scalar_lea.vmem %s5650_s1, %s4810_s16  ;;  %s109_s25 = scalar_lea.vmem %s5650_s1, %s4821_s29  ;;  %4270 = vmatprep.mubr.msk.bf16.mxu1 %vm4721_vm2, %v4720_v63  ;;  %4291 = vmatprep.mubr.msk.f32.mxu0 %vm4721_vm2, %v4720_v63  ;;  %v4956_v8 = vshrl.u32 %v152_v5, 7 }
  0x1c   :  { %v76_v16 = vadd.f32 %v75_v3, %v74_v13  ;;  %v80_v17 = vld [vmem:[%s79_s13] sm:$0x1]  ;;  %65 = vst.msk [vmem:[#allocation2 + $0x1] sm:$0x1] %vm58_vm0, %v64_v11  ;;  %s4029_s16 = sld [smem:[#allocation3 + $0xc]]  ;;  %s4030_s0 = sld [smem:[#allocation3 + $0xd]] }
  0x1d   :  { %v86_v18 = vld [vmem:[%s85_s14] sm:$0x1]  ;;  %71 = vst.msk [vmem:[#allocation2 + $0x2] sm:$0x1] %vm58_vm0, %v70_v12  ;;  %v82_v19 = vadd.f32 %v81_v4, %v80_v17  ;;  %s115_s23 = scalar_lea.vmem %s5650_s1, %s4838_s30  ;;  %s121_s12 = scalar_lea.vmem %s5650_s1, %s4859_s27  ;;  %v4959_v9 = vsub.s32 0, %v4956_v8 }
  0x1e   :  { %v88_v20 = vadd.f32 %v87_v6, %v86_v18  ;;  %v92_v21 = vld [vmem:[%s91_s19] sm:$0x1]  ;;  %77 = vst.msk [vmem:[#allocation2 + $0x3] sm:$0x1] %vm58_vm0, %v76_v16  ;;  %s4031_s19 = sld [smem:[#allocation3 + $0xe]]  ;;  %s4722_s15 = smov 112  }
  0x1f   :  { %v94_v24 = vadd.f32 %v93_v7, %v92_v21  ;;  %v98_v25 = vld [vmem:[%s97_s11] sm:$0x1]  ;;  %83 = vst.msk [vmem:[#allocation2 + $0x4] sm:$0x1] %vm58_vm0, %v82_v19  ;;  %s4032_s11 = sld [smem:[#allocation3 + $0xf]]  ;;  %s4723_s20 = smov 120  }
  0x20   :  { %v104_v26 = vld [vmem:[%s103_s17] sm:$0x1]  ;;  %89 = vst.msk [vmem:[#allocation2 + $0x5] sm:$0x1] %vm58_vm0, %v88_v20  ;;  %v100_v27 = vadd.f32 %v99_v14, %v98_v25  ;;  %v4969_v14 = vsub.s32 1, %v4956_v8  ;;  %s4725_s21 = smov 96  }
  0x21   :  { %v106_v28 = vadd.f32 %v105_v15, %v104_v26  ;;  %v110_v29 = vld [vmem:[%s109_s25] sm:$0x1]  ;;  %95 = vst.msk [vmem:[#allocation2 + $0x6] sm:$0x1] %vm58_vm0, %v94_v24  ;;  %s4724_s25 = smov 104   ;;  %s4726_s26 = smov 64  }
  0x22   :  { %v112_v31 = vadd.f32 %v111_v22, %v110_v29  ;;  %101 = vst.msk [vmem:[#allocation2 + $0x7] sm:$0x1] %vm58_vm0, %v100_v27  ;;  %v116_v32 = vld [vmem:[%s115_s23] sm:$0x1]  ;;  %s127_s27 = scalar_lea.vmem %s5650_s1, %s4029_s16  ;;  %s133_s23 = scalar_lea.vmem %s5650_s1, %s4030_s0 }
  0x23   :  { %107 = vst.msk [vmem:[#allocation2 + $0x8] sm:$0x1] %vm58_vm0, %v106_v28  ;;  %v118_v34 = vadd.f32 %v117_v23, %v116_v32  ;;  %v122_v37 = vld [vmem:[%s121_s12] sm:$0x1] }
  0x24   :  { %113 = vst.msk [vmem:[#allocation2 + $0x9] sm:$0x1] %vm58_vm0, %v112_v31  ;;  %v124_v39 = vadd.f32 %v123_v30, %v122_v37  ;;  %v128_v40 = vld [vmem:[%s127_s27] sm:$0x1]  ;;  %s139_s17 = scalar_lea.vmem %s5650_s1, %s4031_s19 }
  0x25   :  { %119 = vst.msk [vmem:[#allocation2 + $0xa] sm:$0x1] %vm58_vm0, %v118_v34  ;;  %v130_v41 = vadd.f32 %v129_v33, %v128_v40  ;;  %v134_v42 = vld [vmem:[%s133_s23] sm:$0x1]  ;;  %s145_s12 = scalar_lea.vmem %s5650_s1, %s4032_s11 }
  0x26   :  { %125 = vst.msk [vmem:[#allocation2 + $0xb] sm:$0x1] %vm58_vm0, %v124_v39  ;;  %v140_v43 = vld [vmem:[%s139_s17] sm:$0x1]  ;;  %v136_v44 = vadd.f32 %v135_v35, %v134_v42 }
  0x27   :  { %v142_v45 = vadd.f32 %v141_v36, %v140_v43  ;;  %v146_v46 = vld [vmem:[%s145_s12] sm:$0x1]  ;;  %131 = vst.msk [vmem:[#allocation2 + $0xc] sm:$0x1] %vm58_vm0, %v130_v41 }
  0x28   :  { %v148_v48 = vadd.f32 %v147_v38, %v146_v46  ;;  %137 = vst.msk [vmem:[#allocation2 + $0xd] sm:$0x1] %vm58_vm0, %v136_v44  ;;  %v4557_v62 = vld [vmem:[%s5652_s3] sm:$0xff]   ;;  %v155_v44 = vand.u32 127, %v152_v5 }
  0x29   :  { %v4925_v47 = vld [vmem:[#allocation2] sm:$0xff]  ;;  %143 = vst.msk [vmem:[#allocation2 + $0xe] sm:$0x1] %vm58_vm0, %v142_v45  ;;  %4267 = vmatpush3.bf16.msra.mxu1 %v4557_v62 }
  0x2a   :  { %v159_v49 = vsel %vm158_vm1, %v4925_v47, 0.0  ;;  %149 = vst.msk [vmem:[#allocation2 + $0xf] sm:$0x1] %vm58_vm0, %v148_v48  ;;  %4268 = vmatprep.subr.bf16.mxu1 %v4720_v63  ;;  %v4964_v11 = vld [vmem:[%s5656_s7] sm:$0x3f]  ;;  %vm5073_vm4 = vcmp.le.s32.totalorder %v155_v44, %v4956_v8 }
  0x2b   :  { %160 = vadd.xlane.f32.xlu0 %v159_v49  ;;  %v189_v13 = vrot.slane %v4964_v11, %v4959_v9  ;;  %v195_v18 = vrot.slane %v4964_v11, %v4969_v14  ;;  %v4033_v23 = vld [vmem:[%s5657_s8] ss:$0 sm:$0xff] }
  0x2d   :  { %4269 = vmatpush3.bf16.msra.mxu1 %v4558_v0 }
  0x2e   :  { %4274 = vmatprep.subr.mxu1 %v4720_v63 }
  0x31   :  { %v4933_v50 = vld [vmem:[#allocation2 + $0x8] sm:$0xff] }
  0x32   :  { %v162_v51 = vsel %vm158_vm1, %v4933_v50, 0.0 }
  0x33   :  { %163 = vadd.xlane.f32.xlu0 %v162_v51 }
  0xb8   :  { %v161_v52 = vpop.xlane.xlu0 %160 }
  0xb9   :  { %v166_v53 = vmul.f32 0.03125, %v161_v52 }
  0xbb   :  { %v168_v54 = vsub.f32 %v4925_v47, %v166_v53 }
  0xbd   :  { %v170_v55 = vmul.f32 %v168_v54, %v168_v54 }
  0xbf   :  { %v172_v56 = vsel %vm158_vm1, %v170_v55, 0.0 }
  0xc0   :  { %173 = vadd.xlane.f32.xlu1 %v172_v56  ;;  %v164_v57 = vpop.xlane.xlu0 %163 }
  0xc1   :  { %v167_v58 = vmul.f32 0.03125, %v164_v57 }
  0xc3   :  { %v169_v59 = vsub.f32 %v4933_v50, %v167_v58 }
  0xc5   :  { %v171_v60 = vmul.f32 %v169_v59, %v169_v59 }
  0xc7   :  { %v175_v61 = vsel %vm158_vm1, %v171_v60, 0.0 }
  0xc8   :  { %176 = vadd.xlane.f32.xlu1 %v175_v61 }
 0x14d   :  { %v174_v1 = vpop.xlane.xlu1 %173 }
 0x14e   :  { %v178_v2 = vmul.f32 0.03125, %v174_v1 }
 0x150   :  { %v180_v3 = vadd.f32 1e-05, %v178_v2 }
 0x152   :  { %4581 = vrsqrt.f32 %v180_v3 }
 0x155   :  { %v177_v4 = vpop.xlane.xlu1 %176 }
 0x156   :  { %v179_v6 = vmul.f32 0.03125, %v177_v4 }
 0x158   :  { %v181_v7 = vadd.f32 1e-05, %v179_v6 }
 0x15a   :  { %4583 = vrsqrt.f32 %v181_v7 }
 0x15c   :  { %v4582_v10 = vpop.eup %4581 }
 0x15d   :  { %v184_v12 = vmul.f32 %v4582_v10, %v168_v54 }
 0x15f   :  { %v190_v17 = vmul.f32 %v189_v13, %v184_v12 }
 0x161   :  { %v196_v20 = vadd.f32 %v195_v18, %v190_v17 }
 0x164   :  { %v4584_v15 = vpop.eup %4583 }
 0x165   :  { %v185_v16 = vmul.f32 %v4584_v15, %v169_v59 }
 0x167   :  { %v191_v19 = vmul.f32 %v189_v13, %v185_v16 }
 0x169   :  { %v197_v21 = vadd.f32 %v195_v18, %v191_v19 }
 0x16b   :  { %v198_v22 = vpack.c.bf16 %v197_v21, %v196_v20 }
 0x16d   :  { %4271 = vmatmul.mubr.msk.bf16.vlgmr.msra.gmra.mrb[0].mxu1 %vm158_vm1, %v198_v22 }
 0x16e   :  { %4276 = vmatprep.mubr.msk.f32.mxu1 %vm4721_vm2, %v4720_v63 }
 0x240   :  { %v259_v24 = vpop.f32.mrb[0].mxu1 }
 0x241   :  { %v4979_v25 = vadd.f32 %v4033_v23, %v259_v24  ;;  %v4272_v26 = vpop.f32.mrb[1].mxu1 }
 0x242   :  { %v262_v27 = vpop.f32.mrb[2].mxu1 }
 0x243   :  { %272 = vrot.lane.b32.xlu1 %v4979_v25, %s4722_s15  ;;  %268 = vrot.lane.b32.xlu0 %v4979_v25, %s4723_s20  ;;  %v4273_v28 = vpop.f32.mrb[3].mxu1  ;;  %v4985_v29 = vadd.f32 %v4033_v23, %v262_v27 }
 0x247   :  { %276 = vrot.lane.b32.xlu0 %v4979_v25, %s4724_s25  ;;  %270 = vrot.lane.b32.xlu1 %v4985_v29, %s4723_s20 }
 0x24b   :  { %280 = vrot.lane.b32.xlu0 %v4979_v25, %s4725_s21  ;;  %274 = vrot.lane.b32.xlu1 %v4985_v29, %s4722_s15 }
 0x24f   :  { %278 = vrot.lane.b32.xlu1 %v4985_v29, %s4724_s25 }
 0x253   :  { %357 = vrot.lane.b32.xlu1 %v4985_v29, %s4725_s21 }
 0x2b5   :  { %v4999_v30 = vpop.permute.xlu1 %272  ;;  %v5001_v31 = vpop.permute.xlu0 %268 }
 0x2b6   :  { %433 = vrot.lane.b32.xlu0 %v5001_v31, %s4725_s21 }
 0x2b9   :  { %v5005_v32 = vpop.permute.xlu0 %276  ;;  %v5007_v33 = vpop.permute.xlu1 %270 }
 0x2ba   :  { %585 = vrot.lane.b32.xlu0 %v4999_v30, %s4725_s21  ;;  %509 = vrot.lane.b32.xlu1 %v5007_v33, %s4725_s21 }
 0x2bd   :  { %v281_v34 = vpop.permute.xlu0 %280  ;;  %v5013_v35 = vpop.permute.xlu1 %274 }
 0x2be   :  { %737 = vrot.lane.b32.xlu0 %v5005_v32, %s4725_s21  ;;  %4275 = vmatpush3.xpose.msk.msra.mxu1 %vm282_vm3, %v281_v34 }
 0x2bf   :  { %661 = vrot.lane.b32.xlu1 %v5013_v35, %s4725_s21  ;;  %4279 = vmatprep.subr.mxu1 %v4720_v63 }
 0x2c1   :  { %4277 = vmatmul.mubr.msk.f32.vlgmr.msra.gmra.mrb[4].mxu1 %vm282_vm3, %v4979_v25  ;;  %v5023_v36 = vpop.permute.xlu1 %278 }
 0x2c2   :  { %4281 = vmatprep.mubr.msk.f32.mxu1 %vm4721_vm2, %v4720_v63 }
 0x2c3   :  { %813 = vrot.lane.b32.xlu1 %v5023_v36, %s4725_s21 }
 0x2c5   :  { %v358_v37 = vpop.permute.xlu1 %357 }
 0x2c6   :  { %4280 = vmatpush3.xpose.msk.msra.mxu1 %vm282_vm3, %v358_v37 }
 0x2c7   :  { %4284 = vmatprep.subr.mxu1 %v4720_v63 }
 0x2c9   :  { %4282 = vmatmul.mubr.msk.f32.vlgmr.msra.gmra.mrb[6].mxu1 %vm282_vm3, %v4985_v29 }
 0x2ca   :  { %4286 = vmatprep.mubr.msk.f32.mxu1 %vm4721_vm2, %v4720_v63 }
 0x328   :  { %v434_v38 = vpop.permute.xlu0 %433 }
 0x329   :  { %4285 = vmatpush3.xpose.msk.msra.mxu1 %vm282_vm3, %v434_v38 }
 0x32a   :  { %4294 = vmatprep.subr.mxu1 %v4720_v63 }
 0x32c   :  { %v586_v39 = vpop.permute.xlu0 %585  ;;  %4287 = vmatmul.mubr.msk.f32.vlgmr.msra.gmra.mrb[8].mxu1 %vm282_vm3, %v5001_v31  ;;  %v510_v40 = vpop.permute.xlu1 %509 }
 0x32d   :  { %4290 = vmatpush3.xpose.msk.msra.mxu0 %vm282_vm3, %v510_v40  ;;  %4295 = vmatpush3.xpose.msk.msra.mxu1 %vm282_vm3, %v586_v39 }
 0x32e   :  { %4296 = vmatprep.mubr.msk.f32.mxu1 %vm4721_vm2, %v4720_v63  ;;  %4299 = vmatprep.subr.mxu0 %v4720_v63 }
 0x32f   :  { %4304 = vmatprep.subr.mxu1 %v4720_v63 }
 0x330   :  { %v738_v41 = vpop.permute.xlu0 %737  ;;  %4292 = vmatmul.mubr.msk.f32.vlgmr.msra.gmra.mrb[0].mxu0 %vm282_vm3, %v5007_v33  ;;  %4297 = vmatmul.mubr.msk.f32.vlgmr.msra.gmra.mrb[10].mxu1 %vm282_vm3, %v4999_v30 }
 0x331   :  { %v662_v42 = vpop.permute.xlu1 %661  ;;  %4305 = vmatpush3.xpose.msk.msra.mxu1 %vm282_vm3, %v738_v41  ;;  %4301 = vmatprep.mubr.msk.f32.mxu0 %vm4721_vm2, %v4720_v63 }
 0x332   :  { %4300 = vmatpush3.xpose.msk.msra.mxu0 %vm282_vm3, %v662_v42  ;;  %4306 = vmatprep.mubr.msk.f32.mxu1 %vm4721_vm2, %v4720_v63 }
 0x333   :  { %4309 = vmatprep.subr.mxu0 %v4720_v63  ;;  %4314 = vmatprep.subr.mxu1 %v4720_v63 }
 0x334   :  { %4307 = vmatmul.mubr.msk.f32.vlgmr.msra.gmra.mrb[12].mxu1 %vm282_vm3, %v5005_v32 }
 0x335   :  { %4302 = vmatmul.mubr.msk.f32.vlgmr.msra.gmra.mrb[2].mxu0 %vm282_vm3, %v5013_v35  ;;  %v814_v43 = vpop.permute.xlu1 %813  ;;  %4316 = vmatprep.mubr.msk.f32.mxu1 %vm4721_vm2, %v4720_v63 }
 0x336   :  { %4310 = vmatpush3.xpose.msk.msra.mxu0 %vm282_vm3, %v814_v43  ;;  %4311 = vmatprep.mubr.msk.f32.mxu0 %vm4721_vm2, %v4720_v63 }
 0x337   :  { %4319 = vmatprep.subr.mxu0 %v4720_v63 }
 0x339   :  { %4312 = vmatmul.mubr.msk.f32.vlgmr.msra.gmra.mrb[4].mxu0 %vm282_vm3, %v5023_v36 }
 0x33a   :  { %4321 = vmatprep.mubr.msk.f32.mxu0 %vm4721_vm2, %v4720_v63 }
 0x394   :  { %v353_v46 = vpop.f32.mrb[4].mxu1 }
 0x395   :  { %v891_v48 = vsel %vm5073_vm4, %v353_v46, -1e+30  ;;  %v4278_v49 = vpop.f32.mrb[5].mxu1 }
 0x396   :  { %v899_v51 = vsel %vm282_vm3, %v891_v48, -inf }
 0x397   :  { %900 = vmax.xlane.f32.xlu0 %v899_v51 }
 0x39c   :  { %v429_v52 = vpop.f32.mrb[6].mxu1 }
 0x39d   :  { %v892_v53 = vsel %vm5073_vm4, %v429_v52, -1e+30  ;;  %v4283_v54 = vpop.f32.mrb[7].mxu1 }
 0x39e   :  { %v902_v55 = vsel %vm282_vm3, %v892_v53, -inf }
 0x39f   :  { %903 = vmax.xlane.f32.xlu1 %v902_v55 }
 0x3ff   :  { %v505_v56 = vpop.f32.mrb[8].mxu1 }
 0x400   :  { %v893_v57 = vsel %vm5073_vm4, %v505_v56, -1e+30  ;;  %v4288_v58 = vpop.f32.mrb[9].mxu1 }
 0x401   :  { %v905_v59 = vsel %vm282_vm3, %v893_v57, -inf }
 0x402   :  { %906 = vmax.xlane.f32.xlu0 %v905_v59 }
 0x403   :  { %v581_v60 = vpop.f32.mrb[0].mxu0  ;;  %v657_v61 = vpop.f32.mrb[10].mxu1 }
 0x404   :  { %v894_v62 = vsel %vm5073_vm4, %v581_v60, -1e+30  ;;  %v4293_v0 = vpop.f32.mrb[1].mxu0  ;;  %v4298_v1 = vpop.f32.mrb[11].mxu1  ;;  %v895_v3 = vsel %vm5073_vm4, %v657_v61, -1e+30 }
 0x405   :  { %v908_v2 = vsel %vm282_vm3, %v894_v62, -inf  ;;  %v911_v12 = vsel %vm282_vm3, %v895_v3, -inf }
 0x406   :  { %909 = vmax.xlane.f32.xlu0 %v908_v2 }
 0x407   :  { %v809_v4 = vpop.f32.mrb[12].mxu1 }
 0x408   :  { %v733_v5 = vpop.f32.mrb[2].mxu0  ;;  %v4308_v6 = vpop.f32.mrb[13].mxu1  ;;  %v897_v13 = vsel %vm5073_vm4, %v809_v4, -1e+30 }
 0x409   :  { %v896_v7 = vsel %vm5073_vm4, %v733_v5, -1e+30  ;;  %v4303_v10 = vpop.f32.mrb[3].mxu0  ;;  %v917_v19 = vsel %vm282_vm3, %v897_v13, -inf }
 0x40a   :  { %v914_v15 = vsel %vm282_vm3, %v896_v7, -inf  ;;  %912 = vmax.xlane.f32.xlu0 %v911_v12 }
 0x40b   :  { %915 = vmax.xlane.f32.xlu1 %v914_v15 }
 0x40c   :  { %v885_v16 = vpop.f32.mrb[4].mxu0 }
 0x40d   :  { %v898_v17 = vsel %vm5073_vm4, %v885_v16, -1e+30  ;;  %v4313_v18 = vpop.f32.mrb[5].mxu0 }
 0x40e   :  { %v920_v20 = vsel %vm282_vm3, %v898_v17, -inf  ;;  %918 = vmax.xlane.f32.xlu0 %v917_v19 }
 0x40f   :  { %921 = vmax.xlane.f32.xlu1 %v920_v20 }
 0x420   :  { %1063 = vrot.lane.b32.xlu1 %v4985_v29, %s4726_s26 }
 0x424   :  { %1139 = vrot.lane.b32.xlu1 %v5001_v31, %s4726_s26  ;;  %987 = vrot.lane.b32.xlu0 %v4979_v25, %s4726_s26  ;;  %v901_v21 = vpop.xlane.xlu0 %900 }
 0x425   :  { %v923_v22 = vsub.f32 %v891_v48, %v901_v21 }
 0x427   :  { %v931_v23 = vmul.f32 1.442695, %v923_v22 }
 0x428   :  { %1215 = vrot.lane.b32.xlu1 %v5007_v33, %s4726_s26  ;;  %1291 = vrot.lane.b32.xlu0 %v4999_v30, %s4726_s26 }
 0x429   :  { %4585 = vpow2.f32 %v931_v23 }
 0x42c   :  { %1367 = vrot.lane.b32.xlu1 %v5013_v35, %s4726_s26  ;;  %v904_v24 = vpop.xlane.xlu1 %903 }
 0x42d   :  { %v924_v26 = vsub.f32 %v892_v53, %v904_v24 }
 0x42f   :  { %v933_v27 = vmul.f32 1.442695, %v924_v26 }
 0x431   :  { %4587 = vpow2.f32 %v933_v27 }
 0x433   :  { %v5113_v28 = vpop.eup %4585 }
 0x434   :  { %v947_v25 = vsel %vm282_vm3, %v5113_v28, 0.0 }
 0x43b   :  { %v5117_v29 = vpop.eup %4587 }
 0x43c   :  { %v950_v30 = vsel %vm282_vm3, %v5117_v29, 0.0 }
 0x447   :  { %948 = vadd.xlane.f32.xlu0 %v947_v25 }
 0x450   :  { %951 = vadd.xlane.f32.xlu1 %v950_v30 }
 0x48f   :  { %v907_v31 = vpop.xlane.xlu0 %906 }
 0x490   :  { %v925_v33 = vsub.f32 %v893_v57, %v907_v31  ;;  %v1599_v31 = vld [vmem:[%s5653_s4] sm:$0xf] }
 0x492   :  { %v935_v34 = vmul.f32 1.442695, %v925_v33 }
 0x493   :  { %v910_v35 = vpop.xlane.xlu0 %909 }
 0x494   :  { %4589 = vpow2.f32 %v935_v34  ;;  %v926_v37 = vsub.f32 %v894_v62, %v910_v35 }
 0x496   :  { %v937_v38 = vmul.f32 1.442695, %v926_v37 }
 0x497   :  { %v913_v39 = vpop.xlane.xlu0 %912 }
 0x498   :  { %4591 = vpow2.f32 %v937_v38  ;;  %v916_v40 = vpop.xlane.xlu1 %915  ;;  %v927_v41 = vsub.f32 %v895_v3, %v913_v39  ;;  %v1608_v39 = vsel %vm1606_vm5, %v1599_v31, 0 }
 0x499   :  { %v928_v42 = vsub.f32 %v896_v7, %v916_v40 }
 0x49a   :  { %v939_v43 = vmul.f32 1.442695, %v927_v41  ;;  %v1600_v41 = vld [vmem:[%s5653_s4 + $0x4] sm:$0xf] }
 0x49b   :  { %v941_v44 = vmul.f32 1.442695, %v928_v42  ;;  %v919_v46 = vpop.xlane.xlu0 %918  ;;  %v1655_v42 = vsel %vm1606_vm5, %v1600_v41, 0 }
 0x49c   :  { %4593 = vpow2.f32 %v939_v43  ;;  %v922_v48 = vpop.xlane.xlu1 %921  ;;  %v929_v49 = vsub.f32 %v897_v13, %v919_v46  ;;  %v1601_v46 = vld [vmem:[%s5653_s4 + $0x8] sm:$0xf] }
 0x49d   :  { %4595 = vpow2.f32 %v941_v44  ;;  %v930_v51 = vsub.f32 %v898_v17, %v922_v48 }
 0x49e   :  { %v4590_v52 = vpop.eup %4589  ;;  %v943_v53 = vmul.f32 1.442695, %v929_v49 }
 0x49f   :  { %v945_v54 = vmul.f32 1.442695, %v930_v51  ;;  %v988_v55 = vpop.permute.xlu0 %987  ;;  %v953_v56 = vsel %vm282_vm3, %v4590_v52, 0.0 }
 0x4a0   :  { %4597 = vpow2.f32 %v943_v53  ;;  %v1064_v57 = vpop.permute.xlu1 %1063  ;;  %954 = vadd.xlane.f32.xlu0 %v953_v56  ;;  %4315 = vmatpush3.msra.mxu1 %v988_v55  ;;  %v1602_v55 = vld [vmem:[%s5653_s4 + $0xc] sm:$0xf] }
 0x4a1   :  { %4599 = vpow2.f32 %v945_v54  ;;  %4320 = vmatpush3.msra.mxu0 %v1064_v57  ;;  %4324 = vmatprep.subr.mxu1 %v4720_v63 }
 0x4a2   :  { %v4592_v58 = vpop.eup %4591  ;;  %4329 = vmatprep.subr.mxu0 %v4720_v63 }
 0x4a3   :  { %v956_v59 = vsel %vm282_vm3, %v4592_v58, 0.0  ;;  %v1292_v6 = vpop.permute.xlu0 %1291 }
 0x4a4   :  { %957 = vadd.xlane.f32.xlu1 %v956_v59  ;;  %v1140_v5 = vpop.permute.xlu1 %1139  ;;  %v1749_v59 = vsel %vm1606_vm5, %v1602_v55, 0 }
 0x4a6   :  { %v4594_v60 = vpop.eup %4593 }
 0x4a7   :  { %v4596_v61 = vpop.eup %4595  ;;  %v959_v62 = vsel %vm282_vm3, %v4594_v60, 0.0 }
 0x4a8   :  { %v962_v0 = vsel %vm282_vm3, %v4596_v61, 0.0  ;;  %960 = vadd.xlane.f32.xlu0 %v959_v62  ;;  %v1216_v7 = vpop.permute.xlu1 %1215 }
 0x4a9   :  { %963 = vadd.xlane.f32.xlu1 %v962_v0 }
 0x4aa   :  { %v5127_v1 = vpop.eup %4597 }
 0x4ab   :  { %v5129_v2 = vpop.eup %4599  ;;  %v965_v3 = vsel %vm282_vm3, %v5127_v1, 0.0 }
 0x4ac   :  { %v968_v4 = vsel %vm282_vm3, %v5129_v2, 0.0  ;;  %966 = vadd.xlane.f32.xlu0 %v965_v3  ;;  %v1368_v12 = vpop.permute.xlu1 %1367 }
 0x4ad   :  { %969 = vadd.xlane.f32.xlu1 %v968_v4 }
 0x4be   :  { %1519 = vrot.lane.b32.xlu1 %v5023_v36, %s4726_s26 }
 0x4c2   :  { %1443 = vrot.lane.b32.xlu0 %v5005_v32, %s4726_s26 }
 0x4d4   :  { %v949_v10 = vpop.xlane.xlu0 %948 }
 0x4d5   :  { %4601 = vrcp.f32 %v949_v10 }
 0x4dd   :  { %v952_v13 = vpop.xlane.xlu1 %951 }
 0x4de   :  { %4603 = vrcp.f32 %v952_v13 }
 0x4df   :  { %v4602_v15 = vpop.eup %4601 }
 0x4e0   :  { %v979_v16 = vmul.f32 %v4602_v15, %v5113_v28 }
 0x4e2   :  { %4317 = vmatmul.mubr.msk.f32.vlgmr.msra.gmra.mrb[14].mxu1 %vm282_vm3, %v979_v16 }
 0x4e3   :  { %4325 = vmatpush3.msra.mxu1 %v1140_v5  ;;  %4326 = vmatprep.mubr.msk.f32.mxu1 %vm4721_vm2, %v4720_v63 }
 0x4e4   :  { %4334 = vmatprep.subr.mxu1 %v4720_v63 }
 0x4e8   :  { %v4604_v32 = vpop.eup %4603 }
 0x4e9   :  { %v980_v36 = vmul.f32 %v4604_v32, %v5117_v29 }
 0x4eb   :  { %4322 = vmatmul.mubr.msk.f32.vlgmr.msra.gmra.mrb[6].mxu0 %vm282_vm3, %v980_v36 }
 0x4ec   :  { %4330 = vmatpush3.msra.mxu0 %v1216_v7  ;;  %4331 = vmatprep.mubr.msk.f32.mxu0 %vm4721_vm2, %v4720_v63 }
 0x4ed   :  { %4339 = vmatprep.subr.mxu0 %v4720_v63 }
 0x52d   :  { %v955_v17 = vpop.xlane.xlu0 %954 }
 0x52e   :  { %4605 = vrcp.f32 %v955_v17 }
 0x531   :  { %v958_v18 = vpop.xlane.xlu1 %957 }
 0x532   :  { %4607 = vrcp.f32 %v958_v18 }
 0x535   :  { %v961_v19 = vpop.xlane.xlu0 %960 }
 0x536   :  { %v964_v20 = vpop.xlane.xlu1 %963  ;;  %4609 = vrcp.f32 %v961_v19 }
 0x537   :  { %4611 = vrcp.f32 %v964_v20 }
 0x538   :  { %v4606_v21 = vpop.eup %4605 }
 0x539   :  { %v981_v22 = vmul.f32 %v4606_v21, %v4590_v52  ;;  %v967_v23 = vpop.xlane.xlu0 %966  ;;  %v1702_v52 = vsel %vm1606_vm5, %v1601_v46, 0 }
 0x53a   :  { %v970_v24 = vpop.xlane.xlu1 %969  ;;  %4613 = vrcp.f32 %v967_v23 }
 0x53b   :  { %4615 = vrcp.f32 %v970_v24  ;;  %4327 = vmatmul.mubr.msk.f32.vlgmr.msra.gmra.mrb[16].mxu1 %vm282_vm3, %v981_v22 }
 0x53c   :  { %v4608_v26 = vpop.eup %4607  ;;  %4335 = vmatpush3.msra.mxu1 %v1292_v6  ;;  %4336 = vmatprep.mubr.msk.f32.mxu1 %vm4721_vm2, %v4720_v63 }
 0x53d   :  { %v982_v27 = vmul.f32 %v4608_v26, %v4592_v58  ;;  %4344 = vmatprep.subr.mxu1 %v4720_v63  ;;  %v1444_v33 = vpop.permute.xlu0 %1443 }
 0x53e   :  { %v1520_v35 = vpop.permute.xlu1 %1519 }
 0x53f   :  { %4332 = vmatmul.mubr.msk.f32.vlgmr.msra.gmra.mrb[8].mxu0 %vm282_vm3, %v982_v27 }
 0x540   :  { %v4610_v28 = vpop.eup %4609  ;;  %4340 = vmatpush3.msra.mxu0 %v1368_v12  ;;  %4341 = vmatprep.mubr.msk.f32.mxu0 %vm4721_vm2, %v4720_v63 }
 0x541   :  { %v4612_v25 = vpop.eup %4611  ;;  %v983_v29 = vmul.f32 %v4610_v28, %v4594_v60  ;;  %4349 = vmatprep.subr.mxu0 %v4720_v63 }
 0x542   :  { %v984_v30 = vmul.f32 %v4612_v25, %v4596_v61  ;;  %v1810_v25 = vsub.s32 4, %v4956_v8 }
 0x543   :  { %4337 = vmatmul.mubr.msk.f32.vlgmr.msra.gmra.mrb[18].mxu1 %vm282_vm3, %v983_v29 }
 0x544   :  { %v4614_v34 = vpop.eup %4613  ;;  %4342 = vmatmul.mubr.msk.f32.vlgmr.msra.gmra.mrb[10].mxu0 %vm282_vm3, %v984_v30  ;;  %4345 = vmatpush3.msra.mxu1 %v1444_v33 }
 0x545   :  { %v4616_v37 = vpop.eup %4615  ;;  %v985_v38 = vmul.f32 %v4614_v34, %v5127_v1  ;;  %4350 = vmatpush3.msra.mxu0 %v1520_v35  ;;  %4346 = vmatprep.mubr.msk.f32.mxu1 %vm4721_vm2, %v4720_v63 }
 0x546   :  { %v986_v40 = vmul.f32 %v4616_v37, %v5129_v2  ;;  %4351 = vmatprep.mubr.msk.f32.mxu0 %vm4721_vm2, %v4720_v63  ;;  %4354 = vmatprep.subr.bf16.mxu1 %v4720_v63 }
 0x547   :  { %4347 = vmatmul.mubr.msk.f32.vlgmr.msra.gmra.mrb[20].mxu1 %vm282_vm3, %v985_v38  ;;  %4360 = vmatprep.subr.bf16.mxu0 %v4720_v63 }
 0x548   :  { %4352 = vmatmul.mubr.msk.f32.vlgmr.msra.gmra.mrb[12].mxu0 %vm282_vm3, %v986_v40  ;;  %4355 = vmatpush3.bf16.msra.mxu1 %v1608_v39  ;;  %v1811_v39 = vrot.slane %v4964_v11, %v1810_v25 }
 0x549   :  { %4356 = vmatprep.mubr.msk.bf16.mxu1 %vm4721_vm2, %v4720_v63  ;;  %4362 = vmatprep.mubr.msk.bf16.mxu0 %vm4721_vm2, %v4720_v63 }
 0x54a   :  { %4366 = vmatprep.subr.bf16.mxu1 %v4720_v63  ;;  %4361 = vmatpush3.bf16.msra.mxu0 %v1655_v42 }
 0x54b   :  { %4372 = vmatprep.subr.bf16.mxu0 %v4720_v63 }
 0x5b5   :  { %v1059_v43 = vpop.f32.mrb[14].mxu1 }
 0x5b6   :  { %v4318_v44 = vpop.f32.mrb[15].mxu1 }
 0x5be   :  { %v1135_v48 = vpop.f32.mrb[6].mxu0 }
 0x5bf   :  { %v1595_v49 = vpack.c.bf16 %v1135_v48, %v1059_v43  ;;  %v4323_v51 = vpop.f32.mrb[7].mxu0 }
 0x5c1   :  { %4357 = vmatmul.mubr.msk.bf16.vlgmr.msra.gmra.mrb[24].mxu1 %vm282_vm3, %v1595_v49 }
 0x5c2   :  { %4367 = vmatpush3.bf16.msra.mxu1 %v1702_v52  ;;  %4368 = vmatprep.mubr.msk.bf16.mxu1 %vm4721_vm2, %v4720_v63 }
 0x5c3   :  { %4378 = vmatprep.subr.bf16.mxu1 %v4720_v63 }
 0x60e   :  { %v1211_v53 = vpop.f32.mrb[16].mxu1 }
 0x60f   :  { %v4328_v54 = vpop.f32.mrb[17].mxu1 }
 0x612   :  { %v1287_v56 = vpop.f32.mrb[8].mxu0 }
 0x613   :  { %v1596_v57 = vpack.c.bf16 %v1287_v56, %v1211_v53  ;;  %v4333_v58 = vpop.f32.mrb[9].mxu0 }
 0x615   :  { %4363 = vmatmul.mubr.msk.bf16.vlgmr.msra.gmra.mrb[16].mxu0 %vm282_vm3, %v1596_v57 }
 0x616   :  { %v1363_v60 = vpop.f32.mrb[18].mxu1  ;;  %4373 = vmatpush3.bf16.msra.mxu0 %v1749_v59  ;;  %4374 = vmatprep.mubr.msk.bf16.mxu0 %vm4721_vm2, %v4720_v63 }
 0x617   :  { %v1439_v61 = vpop.f32.mrb[10].mxu0  ;;  %v4338_v62 = vpop.f32.mrb[19].mxu1  ;;  %4386 = vmatprep.subr.bf16.mxu0 %v4720_v63 }
 0x618   :  { %v1597_v0 = vpack.c.bf16 %v1439_v61, %v1363_v60  ;;  %v4343_v1 = vpop.f32.mrb[11].mxu0  ;;  %v4559_v60 = vld [vmem:[%s5654_s5] sm:$0xff]   ;;  %v4560_v61 = vld [vmem:[%s5654_s5 + $0x8] sm:$0xff]  }
 0x61a   :  { %4369 = vmatmul.mubr.msk.bf16.vlgmr.msra.gmra.mrb[28].mxu1 %vm282_vm3, %v1597_v0  ;;  %v1515_v2 = vpop.f32.mrb[20].mxu1 }
 0x61b   :  { %v1591_v3 = vpop.f32.mrb[12].mxu0  ;;  %v4348_v4 = vpop.f32.mrb[21].mxu1  ;;  %4382 = vmatprep.mubr.msk.bf16.mxu1 %vm4721_vm2, %v4720_v63  ;;  %4379 = vmatpush3.bf16.msra.mxu1 %v4559_v60 }
 0x61c   :  { %v1598_v5 = vpack.c.bf16 %v1591_v3, %v1515_v2  ;;  %v4353_v6 = vpop.f32.mrb[13].mxu0  ;;  %4380 = vmatprep.subr.bf16.mxu1 %v4720_v63 }
 0x61e   :  { %4375 = vmatmul.mubr.msk.bf16.vlgmr.msra.gmra.mrb[20].mxu0 %vm282_vm3, %v1598_v5  ;;  %v1842_v5 = vsub.s32 2, %v4956_v8 }
 0x61f   :  { %4402 = vmatprep.mubr.msk.bf16.mxu0 %vm4721_vm2, %v4720_v63  ;;  %4381 = vmatpush3.bf16.msra.mxu1 %v4560_v61 }
 0x620   :  { %4406 = vmatprep.subr.bf16.mxu1 %v4720_v63 }
 0x694   :  { %v1644_v7 = vpop.f32.mrb[24].mxu1 }
 0x695   :  { %v4358_v10 = vpop.f32.mrb[25].mxu1  ;;  %v1792_v16 = vsel %vm158_vm1, %v1644_v7, 0.0  ;;  %v1843_v7 = vrot.slane %v4964_v11, %v1842_v5 }
 0x696   :  { %v1647_v12 = vpop.f32.mrb[26].mxu1 }
 0x697   :  { %v4359_v13 = vpop.f32.mrb[27].mxu1  ;;  %v1799_v19 = vsel %vm158_vm1, %v1647_v12, 0.0  ;;  %v1848_v12 = vsub.s32 3, %v4956_v8 }
 0x6e8   :  { %v1691_v15 = vpop.f32.mrb[16].mxu0 }
 0x6e9   :  { %v1793_v32 = vsel %vm158_vm1, %v1691_v15, 0.0  ;;  %v4364_v36 = vpop.f32.mrb[17].mxu0 }
 0x6ea   :  { %v1794_v17 = vadd.f32 %v1793_v32, %v1792_v16  ;;  %v1694_v18 = vpop.f32.mrb[18].mxu0  ;;  %v1849_v32 = vrot.slane %v4964_v11, %v1848_v12 }
 0x6eb   :  { %v1800_v20 = vsel %vm158_vm1, %v1694_v18, 0.0  ;;  %v4365_v21 = vpop.f32.mrb[19].mxu0 }
 0x6ec   :  { %v1801_v22 = vadd.f32 %v1800_v20, %v1799_v19  ;;  %v4561_v20 = vld [vmem:[%s5655_s6] sm:$0xff]   ;;  %v4562_v21 = vld [vmem:[%s5655_s6 + $0x8] sm:$0xff]  }
 0x6ed   :  { %v1738_v23 = vpop.f32.mrb[28].mxu1  ;;  %4387 = vmatpush3.bf16.msra.mxu0 %v4561_v20 }
 0x6ee   :  { %v1795_v24 = vsel %vm158_vm1, %v1738_v23, 0.0  ;;  %v4370_v26 = vpop.f32.mrb[29].mxu1  ;;  %4388 = vmatprep.subr.bf16.mxu0 %v4720_v63  ;;  %v4564_v23 = vld [vmem:[%s5655_s6 + $0x18] sm:$0xff]  }
 0x6ef   :  { %v1796_v27 = vadd.f32 %v1795_v24, %v1794_v17  ;;  %v1741_v28 = vpop.f32.mrb[30].mxu1  ;;  %v4565_v24 = vld [vmem:[%s5655_s6 + $0x20] sm:$0xff]   ;;  %v4566_v26 = vld [vmem:[%s5655_s6 + $0x28] sm:$0xff]  }
 0x6f0   :  { %v1802_v29 = vsel %vm158_vm1, %v1741_v28, 0.0  ;;  %v4371_v30 = vpop.f32.mrb[31].mxu1  ;;  %v4568_v28 = vld [vmem:[%s5655_s6 + $0x38] sm:$0xff]  }
 0x6f1   :  { %v1803_v31 = vadd.f32 %v1802_v29, %v1801_v22  ;;  %v1785_v33 = vpop.f32.mrb[20].mxu0  ;;  %4389 = vmatpush3.bf16.msra.mxu0 %v4562_v21  ;;  %v4563_v22 = vld [vmem:[%s5655_s6 + $0x10] sm:$0xff]   ;;  %v4065_v29 = vld [vmem:[%s5658_s9] ss:$0 sm:$0xff] }
 0x6f2   :  { %v1797_v34 = vsel %vm158_vm1, %v1785_v33, 0.0  ;;  %v4376_v35 = vpop.f32.mrb[21].mxu0  ;;  %4390 = vmatprep.subr.bf16.mxu0 %v4720_v63 }
 0x6f3   :  { %v1798_v37 = vadd.f32 %v1797_v34, %v1796_v27  ;;  %v1788_v38 = vpop.f32.mrb[22].mxu0  ;;  %v4567_v27 = vld [vmem:[%s5655_s6 + $0x30] sm:$0xff]  }
 0x6f4   :  { %v1804_v40 = vsel %vm158_vm1, %v1788_v38, 0.0  ;;  %v4377_v41 = vpop.f32.mrb[23].mxu0 }
 0x6f5   :  { %v1806_v42 = vadd.f32 %v1798_v37, %v4925_v47  ;;  %v1805_v43 = vadd.f32 %v1804_v40, %v1803_v31  ;;  %4391 = vmatpush3.bf16.msra.mxu0 %v4563_v22  ;;  %v5316_v22 = vld [vmem:[%s5656_s7 + $0x8] sm:$0x3f] }
 0x6f6   :  { %4392 = vmatprep.subr.bf16.mxu0 %v4720_v63 }
 0x6f7   :  { %v1807_v44 = vadd.f32 %v1805_v43, %v4933_v50  ;;  %v5219_v46 = vadd.f32 %v1811_v39, %v1806_v42 }
 0x6f9   :  { %v1814_v48 = vsel %vm158_vm1, %v5219_v46, 0.0  ;;  %v5223_v49 = vadd.f32 %v1811_v39, %v1807_v44  ;;  %4393 = vmatpush3.bf16.msra.mxu0 %v4564_v23  ;;  %v2081_v23 = vrot.slane %v5316_v22, %v4959_v9 }
 0x6fa   :  { %1815 = vadd.xlane.f32.xlu0 %v1814_v48  ;;  %4394 = vmatprep.subr.bf16.mxu0 %v4720_v63 }
 0x6fb   :  { %v1817_v51 = vsel %vm158_vm1, %v5223_v49, 0.0 }
 0x6fc   :  { %1818 = vadd.xlane.f32.xlu1 %v1817_v51 }
 0x6fd   :  { %4395 = vmatpush3.bf16.msra.mxu0 %v4565_v24 }
 0x6fe   :  { %4396 = vmatprep.subr.bf16.mxu0 %v4720_v63 }
 0x701   :  { %4397 = vmatpush3.bf16.msra.mxu0 %v4566_v26 }
 0x702   :  { %4398 = vmatprep.subr.bf16.mxu0 %v4720_v63 }
 0x705   :  { %4399 = vmatpush3.bf16.msra.mxu0 %v4567_v27 }
 0x706   :  { %4400 = vmatprep.subr.bf16.mxu0 %v4720_v63 }
 0x709   :  { %4401 = vmatpush3.bf16.msra.mxu0 %v4568_v28 }
 0x70a   :  { %4439 = vmatprep.subr.mxu0 %v4720_v63 }
 0x787   :  { %v1816_v52 = vpop.xlane.xlu0 %1815 }
 0x788   :  { %v1820_v53 = vmul.f32 0.03125, %v1816_v52 }
 0x789   :  { %v1819_v54 = vpop.xlane.xlu1 %1818 }
 0x78a   :  { %v1822_v47 = vsub.f32 %v5219_v46, %v1820_v53  ;;  %v1821_v55 = vmul.f32 0.03125, %v1819_v54 }
 0x78c   :  { %v1823_v50 = vsub.f32 %v5223_v49, %v1821_v55  ;;  %v1824_v56 = vmul.f32 %v1822_v47, %v1822_v47  ;;  %v2046_v55 = vsub.s32 5, %v4956_v8 }
 0x78e   :  { %v1826_v57 = vsel %vm158_vm1, %v1824_v56, 0.0  ;;  %v1825_v58 = vmul.f32 %v1823_v50, %v1823_v50 }
 0x78f   :  { %1827 = vadd.xlane.f32.xlu0 %v1826_v57 }
 0x790   :  { %v1829_v59 = vsel %vm158_vm1, %v1825_v58, 0.0 }
 0x793   :  { %1830 = vadd.xlane.f32.xlu0 %v1829_v59 }
 0x81c   :  { %v1828_v62 = vpop.xlane.xlu0 %1827 }
 0x81d   :  { %v1832_v0 = vmul.f32 0.03125, %v1828_v62 }
 0x81f   :  { %v1834_v1 = vadd.f32 1e-05, %v1832_v0 }
 0x820   :  { %v1831_v2 = vpop.xlane.xlu0 %1830 }
 0x821   :  { %4617 = vrsqrt.f32 %v1834_v1  ;;  %v1833_v3 = vmul.f32 0.03125, %v1831_v2 }
 0x823   :  { %v1835_v4 = vadd.f32 1e-05, %v1833_v3 }
 0x825   :  { %4619 = vrsqrt.f32 %v1835_v4 }
 0x82b   :  { %v4618_v6 = vpop.eup %4617 }
 0x82c   :  { %v1838_v10 = vmul.f32 %v4618_v6, %v1822_v47 }
 0x82e   :  { %v1844_v15 = vmul.f32 %v1843_v7, %v1838_v10 }
 0x82f   :  { %v4620_v13 = vpop.eup %4619 }
 0x830   :  { %v1839_v16 = vmul.f32 %v4620_v13, %v1823_v50  ;;  %v1850_v17 = vadd.f32 %v1849_v32, %v1844_v15  ;;  %v2047_v50 = vrot.slane %v4964_v11, %v2046_v55 }
 0x832   :  { %v1845_v36 = vmul.f32 %v1843_v7, %v1839_v16  ;;  %v4569_v16 = vld [vmem:[%s5652_s3 + $0x10] sm:$0xff]  }
 0x834   :  { %v1851_v18 = vadd.f32 %v1849_v32, %v1845_v36  ;;  %v4570_v32 = vld [vmem:[%s5652_s3 + $0x18] sm:$0xff]  }
 0x836   :  { %v1852_v19 = vpack.c.bf16 %v1851_v18, %v1850_v17 }
 0x838   :  { %4383 = vmatmul.mubr.msk.bf16.vlgmr.msra.gmra.mrb[32].mxu1 %vm158_vm1, %v1852_v19 }
 0x839   :  { %4410 = vmatprep.mubr.msk.bf16.mxu1 %vm4721_vm2, %v4720_v63  ;;  %4407 = vmatpush3.bf16.msra.mxu1 %v4569_v16 }
 0x83a   :  { %4408 = vmatprep.subr.bf16.mxu1 %v4720_v63 }
 0x83d   :  { %4409 = vmatpush3.bf16.msra.mxu1 %v4570_v32 }
 0x83e   :  { %4414 = vmatprep.subr.mxu1 %v4720_v63 }
 0x90b   :  { %v1913_v30 = vpop.f32.mrb[32].mxu1 }
 0x90c   :  { %v1914_v31 = vadd.f32 %v4065_v29, %v1913_v30  ;;  %v4384_v33 = vpop.f32.mrb[33].mxu1  ;;  %v2087_v30 = vrot.slane %v5316_v22, %v4969_v14 }
 0x90d   :  { %v1916_v34 = vpop.f32.mrb[34].mxu1 }
 0x90e   :  { %v4069_v35 = vmul.f32 -1.702, %v1914_v31  ;;  %v1917_v37 = vadd.f32 %v4065_v29, %v1916_v34  ;;  %v4385_v38 = vpop.f32.mrb[35].mxu1 }
 0x910   :  { %v1924_v39 = vmul.f32 1.442695, %v4069_v35  ;;  %v4070_v40 = vmul.f32 -1.702, %v1917_v37 }
 0x912   :  { %4621 = vpow2.f32 %v1924_v39  ;;  %v1926_v41 = vmul.f32 1.442695, %v4070_v40 }
 0x914   :  { %4623 = vpow2.f32 %v1926_v41 }
 0x91c   :  { %v4622_v42 = vpop.eup %4621 }
 0x91d   :  { %v1928_v43 = vadd.f32 1.0, %v4622_v42 }
 0x91e   :  { %v4624_v44 = vpop.eup %4623 }
 0x91f   :  { %4625 = vrcp.f32 %v1928_v43  ;;  %v1929_v48 = vadd.f32 1.0, %v4624_v44 }
 0x921   :  { %4627 = vrcp.f32 %v1929_v48 }
 0x929   :  { %v4626_v51 = vpop.eup %4625 }
 0x92a   :  { %v1934_v53 = vmul.f32 %v4626_v51, %v1914_v31 }
 0x92b   :  { %v4628_v52 = vpop.eup %4627 }
 0x92c   :  { %v1935_v54 = vmul.f32 %v4628_v52, %v1917_v37  ;;  %v4085_v37 = vld [vmem:[%s5657_s8 + $0x1] ss:$0 sm:$0xff] }
 0x92e   :  { %v1936_v47 = vpack.c.bf16 %v1935_v54, %v1934_v53 }
 0x930   :  { %4403 = vmatmul.mubr.bf16.vlgmr.msra.gmra.mrb[24].mxu0 %v1936_v47 }
 0x931   :  { %4441 = vmatprep.mubr.msk.f32.mxu0 %vm4721_vm2, %v4720_v63 }
 0xa03   :  { %v2035_v56 = vpop.f32.mrb[24].mxu0 }
 0xa04   :  { %v2042_v57 = vadd.f32 %v2035_v56, %v5219_v46  ;;  %v4404_v58 = vpop.f32.mrb[25].mxu0 }
 0xa05   :  { %v2038_v59 = vpop.f32.mrb[26].mxu0 }
 0xa06   :  { %v5292_v60 = vadd.f32 %v2047_v50, %v2042_v57  ;;  %v2043_v61 = vadd.f32 %v2038_v59, %v5223_v49  ;;  %v4405_v62 = vpop.f32.mrb[27].mxu0 }
 0xa08   :  { %v5295_v0 = vadd.f32 %v2047_v50, %v2043_v61  ;;  %v2052_v1 = vsel %vm158_vm1, %v5292_v60, 0.0 }
 0xa09   :  { %2053 = vadd.xlane.f32.xlu0 %v2052_v1 }
 0xa0a   :  { %v2055_v2 = vsel %vm158_vm1, %v5295_v0, 0.0 }
 0xa0b   :  { %2056 = vadd.xlane.f32.xlu1 %v2055_v2 }
 0xa96   :  { %v2054_v11 = vpop.xlane.xlu0 %2053 }
 0xa97   :  { %v2058_v3 = vmul.f32 0.03125, %v2054_v11 }
 0xa98   :  { %v2057_v46 = vpop.xlane.xlu1 %2056 }
 0xa99   :  { %v2060_v4 = vsub.f32 %v5292_v60, %v2058_v3  ;;  %v2059_v6 = vmul.f32 0.03125, %v2057_v46 }
 0xa9b   :  { %v2061_v7 = vsub.f32 %v5295_v0, %v2059_v6  ;;  %v2062_v49 = vmul.f32 %v2060_v4, %v2060_v4 }
 0xa9d   :  { %v2064_v10 = vsel %vm158_vm1, %v2062_v49, 0.0  ;;  %v2063_v13 = vmul.f32 %v2061_v7, %v2061_v7 }
 0xa9e   :  { %2065 = vadd.xlane.f32.xlu0 %v2064_v10 }
 0xa9f   :  { %v2067_v15 = vsel %vm158_vm1, %v2063_v13, 0.0 }
 0xaa0   :  { %2068 = vadd.xlane.f32.xlu1 %v2067_v15 }
 0xb2b   :  { %v2066_v36 = vpop.xlane.xlu0 %2065 }
 0xb2c   :  { %v2070_v17 = vmul.f32 0.03125, %v2066_v36 }
 0xb2d   :  { %v2069_v18 = vpop.xlane.xlu1 %2068 }
 0xb2e   :  { %v2072_v19 = vadd.f32 1e-05, %v2070_v17  ;;  %v2071_v20 = vmul.f32 0.03125, %v2069_v18 }
 0xb30   :  { %4629 = vrsqrt.f32 %v2072_v19  ;;  %v2073_v21 = vadd.f32 1e-05, %v2071_v20 }
 0xb32   :  { %4631 = vrsqrt.f32 %v2073_v21 }
 0xb3a   :  { %v4630_v24 = vpop.eup %4629 }
 0xb3b   :  { %v2076_v26 = vmul.f32 %v4630_v24, %v2060_v4 }
 0xb3c   :  { %v4632_v27 = vpop.eup %4631 }
 0xb3d   :  { %v2082_v28 = vmul.f32 %v2081_v23, %v2076_v26  ;;  %v2077_v29 = vmul.f32 %v4632_v27, %v2061_v7 }
 0xb3f   :  { %v2083_v31 = vmul.f32 %v2081_v23, %v2077_v29  ;;  %v2088_v33 = vadd.f32 %v2087_v30, %v2082_v28 }
 0xb41   :  { %v2089_v34 = vadd.f32 %v2087_v30, %v2083_v31 }
 0xb43   :  { %v2090_v35 = vpack.c.bf16 %v2089_v34, %v2088_v33 }
 0xb45   :  { %4411 = vmatmul.mubr.msk.bf16.vlgmr.msra.gmra.mrb[36].mxu1 %vm158_vm1, %v2090_v35 }
 0xb46   :  { %4416 = vmatprep.mubr.msk.f32.mxu1 %vm4721_vm2, %v4720_v63 }
 0xc18   :  { %v2153_v38 = vpop.f32.mrb[36].mxu1 }
 0xc19   :  { %v5328_v39 = vadd.f32 %v4085_v37, %v2153_v38  ;;  %v4412_v40 = vpop.f32.mrb[37].mxu1 }
 0xc1a   :  { %v2156_v41 = vpop.f32.mrb[38].mxu1 }
 0xc1b   :  { %2166 = vrot.lane.b32.xlu1 %v5328_v39, %s4722_s15  ;;  %2162 = vrot.lane.b32.xlu0 %v5328_v39, %s4723_s20  ;;  %v4413_v42 = vpop.f32.mrb[39].mxu1  ;;  %v5334_v43 = vadd.f32 %v4085_v37, %v2156_v41 }
 0xc1f   :  { %2170 = vrot.lane.b32.xlu0 %v5328_v39, %s4724_s25  ;;  %2164 = vrot.lane.b32.xlu1 %v5334_v43, %s4723_s20  ;;  %s4727_s20 = smov [#allocation6]  }
 0xc23   :  { %2174 = vrot.lane.b32.xlu0 %v5328_v39, %s4725_s21  ;;  %2168 = vrot.lane.b32.xlu1 %v5334_v43, %s4722_s15 }
 0xc27   :  { %2172 = vrot.lane.b32.xlu1 %v5334_v43, %s4724_s25  ;;  %s3990_s25 = sshll.u32 %s4727_s20, 4  ;;  %s3991_s25 = int_to_ptr.vmem [resolvable:$true] %s3990_s25 }
 0xc28   :  { %p4698_p6 = scmp.lt.s32.totalorder %s3991_s25, %s3991_s25 }
 0xc2b   :  { %2250 = vrot.lane.b32.xlu1 %v5334_v43, %s4725_s21 }
 0xc8d   :  { %v5348_v44 = vpop.permute.xlu1 %2166  ;;  %v5350_v48 = vpop.permute.xlu0 %2162 }
 0xc8e   :  { %2326 = vrot.lane.b32.xlu0 %v5350_v48, %s4725_s21 }
 0xc91   :  { %v5354_v51 = vpop.permute.xlu0 %2170  ;;  %v5356_v52 = vpop.permute.xlu1 %2164 }
 0xc92   :  { %2478 = vrot.lane.b32.xlu0 %v5348_v44, %s4725_s21  ;;  %2402 = vrot.lane.b32.xlu1 %v5356_v52, %s4725_s21 }
 0xc95   :  { %v2175_v53 = vpop.permute.xlu0 %2174  ;;  %v5362_v54 = vpop.permute.xlu1 %2168 }
 0xc96   :  { %2630 = vrot.lane.b32.xlu0 %v5354_v51, %s4725_s21  ;;  %4415 = vmatpush3.xpose.msk.msra.mxu1 %vm282_vm3, %v2175_v53 }
 0xc97   :  { %2554 = vrot.lane.b32.xlu1 %v5362_v54, %s4725_s21  ;;  %4419 = vmatprep.subr.mxu1 %v4720_v63 }
 0xc99   :  { %4417 = vmatmul.mubr.msk.f32.vlgmr.msra.gmra.mrb[22].mxu1 %vm282_vm3, %v5328_v39  ;;  %v5372_v47 = vpop.permute.xlu1 %2172 }
 0xc9a   :  { %4421 = vmatprep.mubr.msk.f32.mxu1 %vm4721_vm2, %v4720_v63 }
 0xc9b   :  { %2706 = vrot.lane.b32.xlu1 %v5372_v47, %s4725_s21 }
 0xc9d   :  { %v2251_v50 = vpop.permute.xlu1 %2250 }
 0xc9e   :  { %4420 = vmatpush3.xpose.msk.msra.mxu1 %vm282_vm3, %v2251_v50 }
 0xc9f   :  { %4424 = vmatprep.subr.mxu1 %v4720_v63 }
 0xca1   :  { %4422 = vmatmul.mubr.msk.f32.vlgmr.msra.gmra.mrb[40].mxu1 %vm282_vm3, %v5334_v43 }
 0xca2   :  { %4426 = vmatprep.mubr.msk.f32.mxu1 %vm4721_vm2, %v4720_v63 }
 0xd00   :  { %v2327_v56 = vpop.permute.xlu0 %2326 }
 0xd01   :  { %4425 = vmatpush3.xpose.msk.msra.mxu1 %vm282_vm3, %v2327_v56 }
 0xd02   :  { %4429 = vmatprep.subr.mxu1 %v4720_v63 }
 0xd04   :  { %4427 = vmatmul.mubr.msk.f32.vlgmr.msra.gmra.mrb[42].mxu1 %vm282_vm3, %v5350_v48  ;;  %v2403_v57 = vpop.permute.xlu1 %2402  ;;  %v2479_v58 = vpop.permute.xlu0 %2478 }
 0xd05   :  { %4430 = vmatpush3.xpose.msk.msra.mxu1 %vm282_vm3, %v2403_v57  ;;  %4431 = vmatprep.mubr.msk.f32.mxu1 %vm4721_vm2, %v4720_v63 }
 0xd06   :  { %4434 = vmatprep.subr.mxu1 %v4720_v63 }
 0xd08   :  { %4432 = vmatmul.mubr.msk.f32.vlgmr.msra.gmra.mrb[44].mxu1 %vm282_vm3, %v5356_v52  ;;  %v2631_v61 = vpop.permute.xlu0 %2630 }
 0xd09   :  { %v2555_v59 = vpop.permute.xlu1 %2554  ;;  %4435 = vmatpush3.xpose.msk.msra.mxu1 %vm282_vm3, %v2479_v58  ;;  %4436 = vmatprep.mubr.msk.f32.mxu1 %vm4721_vm2, %v4720_v63 }
 0xd0a   :  { %4440 = vmatpush3.xpose.msk.msra.mxu0 %vm282_vm3, %v2555_v59  ;;  %4444 = vmatprep.subr.mxu1 %v4720_v63 }
 0xd0b   :  { %4449 = vmatprep.subr.mxu0 %v4720_v63 }
 0xd0c   :  { %4437 = vmatmul.mubr.msk.f32.vlgmr.msra.gmra.mrb[46].mxu1 %vm282_vm3, %v5348_v44 }
 0xd0d   :  { %4442 = vmatmul.mubr.msk.f32.vlgmr.msra.gmra.mrb[14].mxu0 %vm282_vm3, %v5362_v54  ;;  %v2707_v62 = vpop.permute.xlu1 %2706  ;;  %4445 = vmatpush3.xpose.msk.msra.mxu1 %vm282_vm3, %v2631_v61 }
 0xd0e   :  { %4450 = vmatpush3.xpose.msk.msra.mxu0 %vm282_vm3, %v2707_v62  ;;  %4446 = vmatprep.mubr.msk.f32.mxu1 %vm4721_vm2, %v4720_v63 }
 0xd0f   :  { %4451 = vmatprep.mubr.msk.f32.mxu0 %vm4721_vm2, %v4720_v63  ;;  %4454 = vmatprep.subr.mxu1 %v4720_v63 }
 0xd10   :  { %4447 = vmatmul.mubr.msk.f32.vlgmr.msra.gmra.mrb[48].mxu1 %vm282_vm3, %v5354_v51  ;;  %4459 = vmatprep.subr.mxu0 %v4720_v63 }
 0xd11   :  { %4452 = vmatmul.mubr.msk.f32.vlgmr.msra.gmra.mrb[28].mxu0 %vm282_vm3, %v5372_v47  ;;  %4456 = vmatprep.mubr.msk.f32.mxu1 %vm4721_vm2, %v4720_v63 }
 0xd12   :  { %4461 = vmatprep.mubr.msk.f32.mxu0 %vm4721_vm2, %v4720_v63 }
 0xd6c   :  { %v2246_v1 = vpop.f32.mrb[22].mxu1 }
 0xd6d   :  { %v2782_v2 = vsel %vm5073_vm4, %v2246_v1, -1e+30  ;;  %v4418_v11 = vpop.f32.mrb[23].mxu1 }
 0xd6e   :  { %v2790_v3 = vsel %vm282_vm3, %v2782_v2, -inf }
 0xd6f   :  { %2791 = vmax.xlane.f32.xlu0 %v2790_v3 }
 0xd74   :  { %v2322_v46 = vpop.f32.mrb[40].mxu1 }
 0xd75   :  { %v2783_v4 = vsel %vm5073_vm4, %v2322_v46, -1e+30  ;;  %v4423_v6 = vpop.f32.mrb[41].mxu1 }
 0xd76   :  { %v2793_v7 = vsel %vm282_vm3, %v2783_v4, -inf }
 0xd77   :  { %2794 = vmax.xlane.f32.xlu1 %v2793_v7 }
 0xdd7   :  { %v2398_v49 = vpop.f32.mrb[42].mxu1 }
 0xdd8   :  { %v2784_v10 = vsel %vm5073_vm4, %v2398_v49, -1e+30  ;;  %v4428_v13 = vpop.f32.mrb[43].mxu1 }
 0xdd9   :  { %v2796_v15 = vsel %vm282_vm3, %v2784_v10, -inf }
 0xdda   :  { %2797 = vmax.xlane.f32.xlu0 %v2796_v15 }
 0xddb   :  { %v2474_v16 = vpop.f32.mrb[44].mxu1 }
 0xddc   :  { %v2785_v32 = vsel %vm5073_vm4, %v2474_v16, -1e+30  ;;  %v4433_v36 = vpop.f32.mrb[45].mxu1 }
 0xddd   :  { %v2799_v17 = vsel %vm282_vm3, %v2785_v32, -inf }
 0xdde   :  { %2800 = vmax.xlane.f32.xlu0 %v2799_v17 }
 0xddf   :  { %v2550_v18 = vpop.f32.mrb[46].mxu1 }
 0xde0   :  { %v2786_v19 = vsel %vm5073_vm4, %v2550_v18, -1e+30  ;;  %v2626_v20 = vpop.f32.mrb[14].mxu0  ;;  %v4438_v21 = vpop.f32.mrb[47].mxu1 }
 0xde1   :  { %v2787_v23 = vsel %vm5073_vm4, %v2626_v20, -1e+30  ;;  %v4443_v24 = vpop.f32.mrb[15].mxu0  ;;  %v2802_v26 = vsel %vm282_vm3, %v2786_v19, -inf }
 0xde2   :  { %v2805_v27 = vsel %vm282_vm3, %v2787_v23, -inf  ;;  %2803 = vmax.xlane.f32.xlu0 %v2802_v26 }
 0xde3   :  { %2806 = vmax.xlane.f32.xlu1 %v2805_v27  ;;  %v2702_v28 = vpop.f32.mrb[48].mxu1 }
 0xde4   :  { %v2788_v29 = vsel %vm5073_vm4, %v2702_v28, -1e+30  ;;  %v2778_v30 = vpop.f32.mrb[28].mxu0  ;;  %v4448_v31 = vpop.f32.mrb[49].mxu1 }
 0xde5   :  { %v2789_v33 = vsel %vm5073_vm4, %v2778_v30, -1e+30  ;;  %v4453_v34 = vpop.f32.mrb[29].mxu0  ;;  %v2808_v35 = vsel %vm282_vm3, %v2788_v29, -inf }
 0xde6   :  { %v2811_v37 = vsel %vm282_vm3, %v2789_v33, -inf  ;;  %2809 = vmax.xlane.f32.xlu0 %v2808_v35 }
 0xde7   :  { %2812 = vmax.xlane.f32.xlu1 %v2811_v37 }
 0xdf8   :  { %2954 = vrot.lane.b32.xlu1 %v5334_v43, %s4726_s26 }
 0xdfc   :  { %3030 = vrot.lane.b32.xlu1 %v5350_v48, %s4726_s26  ;;  %2878 = vrot.lane.b32.xlu0 %v5328_v39, %s4726_s26  ;;  %v2792_v45 = vpop.xlane.xlu0 %2791 }
 0xdfd   :  { %v2814_v38 = vsub.f32 %v2782_v2, %v2792_v45 }
 0xdff   :  { %v2822_v40 = vmul.f32 1.442695, %v2814_v38 }
 0xe00   :  { %3106 = vrot.lane.b32.xlu1 %v5356_v52, %s4726_s26  ;;  %3182 = vrot.lane.b32.xlu0 %v5348_v44, %s4726_s26 }
 0xe01   :  { %4633 = vpow2.f32 %v2822_v40 }
 0xe04   :  { %3258 = vrot.lane.b32.xlu1 %v5362_v54, %s4726_s26  ;;  %v2795_v41 = vpop.xlane.xlu1 %2794 }
 0xe05   :  { %v2815_v42 = vsub.f32 %v2783_v4, %v2795_v41 }
 0xe07   :  { %v2824_v43 = vmul.f32 1.442695, %v2815_v42 }
 0xe09   :  { %4635 = vpow2.f32 %v2824_v43 }
 0xe0b   :  { %v5456_v48 = vpop.eup %4633 }
 0xe0c   :  { %v2838_v39 = vsel %vm282_vm3, %v5456_v48, 0.0 }
 0xe13   :  { %v5460_v52 = vpop.eup %4635 }
 0xe14   :  { %v2841_v44 = vsel %vm282_vm3, %v5460_v52, 0.0 }
 0xe1f   :  { %2839 = vadd.xlane.f32.xlu0 %v2838_v39 }
 0xe28   :  { %2842 = vadd.xlane.f32.xlu1 %v2841_v44  ;;  %v4113_v44 = vld [vmem:[%s5653_s4 + $0x10] sm:$0xf] }
 0xe67   :  { %v2798_v53 = vpop.xlane.xlu0 %2797 }
 0xe68   :  { %v2816_v54 = vsub.f32 %v2784_v10, %v2798_v53 }
 0xe6a   :  { %v2826_v50 = vmul.f32 1.442695, %v2816_v54 }
 0xe6b   :  { %v2801_v56 = vpop.xlane.xlu0 %2800 }
 0xe6c   :  { %4637 = vpow2.f32 %v2826_v50  ;;  %v2817_v57 = vsub.f32 %v2785_v32, %v2801_v56 }
 0xe6e   :  { %v2828_v2 = vmul.f32 1.442695, %v2817_v57  ;;  %v3499_v57 = vsel %vm1606_vm5, %v4113_v44, 0 }
 0xe6f   :  { %v2804_v58 = vpop.xlane.xlu0 %2803 }
 0xe70   :  { %v2807_v59 = vpop.xlane.xlu1 %2806  ;;  %v2818_v61 = vsub.f32 %v2786_v19, %v2804_v58 }
 0xe71   :  { %v2819_v62 = vsub.f32 %v2787_v23, %v2807_v59 }
 0xe72   :  { %v2830_v1 = vmul.f32 1.442695, %v2818_v61 }
 0xe73   :  { %v2832_v11 = vmul.f32 1.442695, %v2819_v62  ;;  %v2810_v3 = vpop.xlane.xlu0 %2809 }
 0xe74   :  { %4639 = vpow2.f32 %v2830_v1  ;;  %v2813_v46 = vpop.xlane.xlu1 %2812  ;;  %v2820_v4 = vsub.f32 %v2788_v29, %v2810_v3 }
 0xe75   :  { %4641 = vpow2.f32 %v2832_v11  ;;  %v2821_v6 = vsub.f32 %v2789_v33, %v2813_v46  ;;  %v4114_v11 = vld [vmem:[%s5653_s4 + $0x14] sm:$0xf] }
 0xe76   :  { %v4638_v7 = vpop.eup %4637  ;;  %v2834_v49 = vmul.f32 1.442695, %v2820_v4  ;;  %4643 = vpow2.f32 %v2828_v2  ;;  %v3546_v3 = vsel %vm1606_vm5, %v4114_v11, 0  ;;  %v3702_v11 = vrot.slane %v5316_v22, %v1810_v25 }
 0xe77   :  { %v2836_v10 = vmul.f32 1.442695, %v2821_v6  ;;  %v2879_v13 = vpop.permute.xlu0 %2878  ;;  %v2844_v15 = vsel %vm282_vm3, %v4638_v7, 0.0  ;;  %v4115_v6 = vld [vmem:[%s5653_s4 + $0x18] sm:$0xf] }
 0xe78   :  { %4645 = vpow2.f32 %v2834_v49  ;;  %v2955_v16 = vpop.permute.xlu1 %2954  ;;  %2845 = vadd.xlane.f32.xlu0 %v2844_v15  ;;  %4455 = vmatpush3.msra.mxu1 %v2879_v13  ;;  %v3593_v13 = vsel %vm1606_vm5, %v4115_v6, 0 }
 0xe79   :  { %4460 = vmatpush3.msra.mxu0 %v2955_v16  ;;  %4464 = vmatprep.subr.mxu1 %v4720_v63  ;;  %4647 = vpow2.f32 %v2836_v10 }
 0xe7a   :  { %4469 = vmatprep.subr.mxu0 %v4720_v63 }
 0xe7b   :  { %v3183_v28 = vpop.permute.xlu0 %3182 }
 0xe7c   :  { %v3031_v27 = vpop.permute.xlu1 %3030 }
 0xe7e   :  { %v4640_v32 = vpop.eup %4639 }
 0xe7f   :  { %v5467_v36 = vpop.eup %4641  ;;  %v2850_v17 = vsel %vm282_vm3, %v4640_v32, 0.0 }
 0xe80   :  { %v2853_v18 = vsel %vm282_vm3, %v5467_v36, 0.0  ;;  %2851 = vadd.xlane.f32.xlu0 %v2850_v17  ;;  %v4644_v19 = vpop.eup %4643  ;;  %v3107_v29 = vpop.permute.xlu1 %3106  ;;  %v4116_v17 = vld [vmem:[%s5653_s4 + $0x1c] sm:$0xf] }
 0xe81   :  { %2854 = vadd.xlane.f32.xlu1 %v2853_v18  ;;  %v2847_v23 = vsel %vm282_vm3, %v4644_v19, 0.0 }
 0xe82   :  { %v4646_v20 = vpop.eup %4645 }
 0xe83   :  { %v2856_v21 = vsel %vm282_vm3, %v4646_v20, 0.0  ;;  %v5474_v24 = vpop.eup %4647 }
 0xe84   :  { %2857 = vadd.xlane.f32.xlu0 %v2856_v21  ;;  %v2859_v26 = vsel %vm282_vm3, %v5474_v24, 0.0  ;;  %v3259_v31 = vpop.permute.xlu1 %3258 }
 0xe85   :  { %2848 = vadd.xlane.f32.xlu1 %v2847_v23 }
 0xe89   :  { %2860 = vadd.xlane.f32.xlu1 %v2859_v26 }
 0xe9a   :  { %3410 = vrot.lane.b32.xlu1 %v5372_v47, %s4726_s26  ;;  %3334 = vrot.lane.b32.xlu0 %v5354_v51, %s4726_s26 }
 0xeac   :  { %v2840_v30 = vpop.xlane.xlu0 %2839 }
 0xead   :  { %4649 = vrcp.f32 %v2840_v30 }
 0xeb5   :  { %v2843_v33 = vpop.xlane.xlu1 %2842 }
 0xeb6   :  { %4651 = vrcp.f32 %v2843_v33 }
 0xeb7   :  { %v4650_v34 = vpop.eup %4649 }
 0xeb8   :  { %v2870_v35 = vmul.f32 %v4650_v34, %v5456_v48 }
 0xeba   :  { %4457 = vmatmul.mubr.msk.f32.vlgmr.msra.gmra.mrb[50].mxu1 %vm282_vm3, %v2870_v35 }
 0xebb   :  { %4465 = vmatpush3.msra.mxu1 %v3031_v27  ;;  %4466 = vmatprep.mubr.msk.f32.mxu1 %vm4721_vm2, %v4720_v63 }
 0xebc   :  { %4474 = vmatprep.subr.mxu1 %v4720_v63 }
 0xec0   :  { %v4652_v51 = vpop.eup %4651 }
 0xec1   :  { %v2871_v47 = vmul.f32 %v4652_v51, %v5460_v52 }
 0xec3   :  { %4462 = vmatmul.mubr.msk.f32.vlgmr.msra.gmra.mrb[30].mxu0 %vm282_vm3, %v2871_v47 }
 0xec4   :  { %4470 = vmatpush3.msra.mxu0 %v3107_v29  ;;  %4471 = vmatprep.mubr.msk.f32.mxu0 %vm4721_vm2, %v4720_v63 }
 0xec5   :  { %4479 = vmatprep.subr.mxu0 %v4720_v63 }
 0xf05   :  { %v2846_v37 = vpop.xlane.xlu0 %2845 }
 0xf06   :  { %4653 = vrcp.f32 %v2846_v37 }
 0xf0d   :  { %v2852_v45 = vpop.xlane.xlu0 %2851 }
 0xf0e   :  { %v2855_v38 = vpop.xlane.xlu1 %2854  ;;  %4655 = vrcp.f32 %v2852_v45 }
 0xf10   :  { %v4654_v40 = vpop.eup %4653 }
 0xf11   :  { %v2872_v41 = vmul.f32 %v4654_v40, %v4638_v7  ;;  %v2858_v42 = vpop.xlane.xlu0 %2857 }
 0xf12   :  { %v2849_v43 = vpop.xlane.xlu1 %2848  ;;  %4657 = vrcp.f32 %v2858_v42 }
 0xf13   :  { %4659 = vrcp.f32 %v2849_v43  ;;  %4467 = vmatmul.mubr.msk.f32.vlgmr.msra.gmra.mrb[52].mxu1 %vm282_vm3, %v2872_v41 }
 0xf14   :  { %4475 = vmatpush3.msra.mxu1 %v3183_v28  ;;  %4476 = vmatprep.mubr.msk.f32.mxu1 %vm4721_vm2, %v4720_v63  ;;  %4661 = vrcp.f32 %v2855_v38 }
 0xf15   :  { %4484 = vmatprep.subr.mxu1 %v4720_v63  ;;  %v3335_v53 = vpop.permute.xlu0 %3334 }
 0xf16   :  { %v2861_v48 = vpop.xlane.xlu1 %2860 }
 0xf17   :  { %4663 = vrcp.f32 %v2861_v48 }
 0xf18   :  { %v4656_v39 = vpop.eup %4655 }
 0xf19   :  { %v2874_v52 = vmul.f32 %v4656_v39, %v4640_v32 }
 0xf1a   :  { %v3411_v1 = vpop.permute.xlu1 %3410 }
 0xf1b   :  { %4477 = vmatmul.mubr.msk.f32.vlgmr.msra.gmra.mrb[54].mxu1 %vm282_vm3, %v2874_v52 }
 0xf1c   :  { %v4658_v54 = vpop.eup %4657  ;;  %4485 = vmatpush3.msra.mxu1 %v3335_v53  ;;  %4486 = vmatprep.mubr.msk.f32.mxu1 %vm4721_vm2, %v4720_v63 }
 0xf1d   :  { %v4660_v50 = vpop.eup %4659  ;;  %v2876_v56 = vmul.f32 %v4658_v54, %v4646_v20  ;;  %4494 = vmatprep.subr.bf16.mxu1 %v4720_v63 }
 0xf1e   :  { %v2873_v58 = vmul.f32 %v4660_v50, %v4644_v19  ;;  %v4662_v59 = vpop.eup %4661 }
 0xf1f   :  { %4487 = vmatmul.mubr.msk.f32.vlgmr.msra.gmra.mrb[56].mxu1 %vm282_vm3, %v2876_v56  ;;  %v2875_v61 = vmul.f32 %v4662_v59, %v5467_v36 }
 0xf20   :  { %4472 = vmatmul.mubr.msk.f32.vlgmr.msra.gmra.mrb[32].mxu0 %vm282_vm3, %v2873_v58  ;;  %4495 = vmatpush3.bf16.msra.mxu1 %v3499_v57 }
 0xf21   :  { %4480 = vmatpush3.msra.mxu0 %v3259_v31  ;;  %4481 = vmatprep.mubr.msk.f32.mxu0 %vm4721_vm2, %v4720_v63  ;;  %v4664_v62 = vpop.eup %4663 }
 0xf22   :  { %4489 = vmatprep.subr.mxu0 %v4720_v63  ;;  %4496 = vmatprep.mubr.msk.bf16.mxu1 %vm4721_vm2, %v4720_v63  ;;  %v2877_v2 = vmul.f32 %v4664_v62, %v5474_v24  ;;  %v3640_v24 = vsel %vm1606_vm5, %v4116_v17, 0 }
 0xf23   :  { %4506 = vmatprep.subr.bf16.mxu1 %v4720_v63 }
 0xf24   :  { %4482 = vmatmul.mubr.msk.f32.vlgmr.msra.gmra.mrb[34].mxu0 %vm282_vm3, %v2875_v61 }
 0xf25   :  { %4490 = vmatpush3.msra.mxu0 %v3411_v1  ;;  %4491 = vmatprep.mubr.msk.f32.mxu0 %vm4721_vm2, %v4720_v63 }
 0xf26   :  { %4500 = vmatprep.subr.bf16.mxu0 %v4720_v63 }
 0xf28   :  { %4492 = vmatmul.mubr.msk.f32.vlgmr.msra.gmra.mrb[36].mxu0 %vm282_vm3, %v2877_v2 }
 0xf29   :  { %4502 = vmatprep.mubr.msk.bf16.mxu0 %vm4721_vm2, %v4720_v63  ;;  %4501 = vmatpush3.bf16.msra.mxu0 %v3546_v3 }
 0xf2a   :  { %4512 = vmatprep.subr.bf16.mxu0 %v4720_v63 }
 0xf8d   :  { %v2950_v46 = vpop.f32.mrb[50].mxu1 }
 0xf8e   :  { %v4458_v4 = vpop.f32.mrb[51].mxu1 }
 0xf96   :  { %v3026_v7 = vpop.f32.mrb[30].mxu0 }
 0xf97   :  { %v3486_v49 = vpack.c.bf16 %v3026_v7, %v2950_v46  ;;  %v4463_v10 = vpop.f32.mrb[31].mxu0 }
 0xf99   :  { %4497 = vmatmul.mubr.msk.bf16.vlgmr.msra.gmra.mrb[60].mxu1 %vm282_vm3, %v3486_v49 }
 0xf9a   :  { %4507 = vmatpush3.bf16.msra.mxu1 %v3593_v13  ;;  %4508 = vmatprep.mubr.msk.bf16.mxu1 %vm4721_vm2, %v4720_v63 }
 0xf9b   :  { %4518 = vmatprep.subr.bf16.mxu1 %v4720_v63 }
 0xfe6   :  { %v3102_v15 = vpop.f32.mrb[52].mxu1 }
 0xfe7   :  { %v4468_v16 = vpop.f32.mrb[53].mxu1 }
 0xfee   :  { %v3254_v32 = vpop.f32.mrb[54].mxu1 }
 0xfef   :  { %v4478_v36 = vpop.f32.mrb[55].mxu1 }
 0xff2   :  { %v3406_v18 = vpop.f32.mrb[56].mxu1 }
 0xff3   :  { %v3178_v19 = vpop.f32.mrb[32].mxu0  ;;  %v4488_v20 = vpop.f32.mrb[57].mxu1 }
 0xff4   :  { %v3487_v21 = vpack.c.bf16 %v3178_v19, %v3102_v15  ;;  %v4473_v23 = vpop.f32.mrb[33].mxu0 }
 0xff5   :  { %v4572_v23 = vld [vmem:[%s5654_s5 + $0x18] sm:$0xff]  }
 0xff6   :  { %4503 = vmatmul.mubr.msk.bf16.vlgmr.msra.gmra.mrb[40].mxu0 %vm282_vm3, %v3487_v21  ;;  %v4571_v21 = vld [vmem:[%s5654_s5 + $0x10] sm:$0xff]  }
 0xff7   :  { %v3330_v26 = vpop.f32.mrb[34].mxu0  ;;  %4513 = vmatpush3.bf16.msra.mxu0 %v3640_v24  ;;  %4514 = vmatprep.mubr.msk.bf16.mxu0 %vm4721_vm2, %v4720_v63 }
 0xff8   :  { %v3488_v27 = vpack.c.bf16 %v3330_v26, %v3254_v32  ;;  %v4483_v28 = vpop.f32.mrb[35].mxu0  ;;  %4526 = vmatprep.subr.bf16.mxu0 %v4720_v63 }
 0xffa   :  { %4509 = vmatmul.mubr.msk.bf16.vlgmr.msra.gmra.mrb[64].mxu1 %vm282_vm3, %v3488_v27 }
 0xffb   :  { %v3482_v29 = vpop.f32.mrb[36].mxu0  ;;  %4522 = vmatprep.mubr.msk.bf16.mxu1 %vm4721_vm2, %v4720_v63  ;;  %4519 = vmatpush3.bf16.msra.mxu1 %v4571_v21 }
 0xffc   :  { %v3489_v30 = vpack.c.bf16 %v3482_v29, %v3406_v18  ;;  %v4493_v31 = vpop.f32.mrb[37].mxu0  ;;  %4520 = vmatprep.subr.bf16.mxu1 %v4720_v63 }
 0xffe   :  { %4515 = vmatmul.mubr.msk.bf16.vlgmr.msra.gmra.mrb[44].mxu0 %vm282_vm3, %v3489_v30 }
 0xfff   :  { %4542 = vmatprep.mubr.msk.bf16.mxu0 %vm4721_vm2, %v4720_v63  ;;  %4521 = vmatpush3.bf16.msra.mxu1 %v4572_v23 }
0x106c   :  { %v3535_v33 = vpop.f32.mrb[60].mxu1 }
0x106d   :  { %v4498_v34 = vpop.f32.mrb[61].mxu1  ;;  %v3683_v37 = vsel %vm158_vm1, %v3535_v33, 0.0  ;;  %v3734_v33 = vrot.slane %v5316_v22, %v1842_v5  ;;  %v4574_v5 = vld [vmem:[%s5655_s6 + $0x48] sm:$0xff]  }
0x106e   :  { %v3538_v35 = vpop.f32.mrb[62].mxu1 }
0x106f   :  { %v4499_v51 = vpop.f32.mrb[63].mxu1  ;;  %v3690_v42 = vsel %vm158_vm1, %v3538_v35, 0.0 }
0x10c9   :  { %v3582_v47 = vpop.f32.mrb[40].mxu0 }
0x10ca   :  { %v3684_v45 = vsel %vm158_vm1, %v3582_v47, 0.0  ;;  %v4504_v38 = vpop.f32.mrb[41].mxu0 }
0x10cb   :  { %v3685_v40 = vadd.f32 %v3684_v45, %v3683_v37  ;;  %v3585_v41 = vpop.f32.mrb[42].mxu0  ;;  %v3740_v37 = vrot.slane %v5316_v22, %v1848_v12  ;;  %v4575_v12 = vld [vmem:[%s5655_s6 + $0x50] sm:$0xff]  }
0x10cc   :  { %v3691_v43 = vsel %vm158_vm1, %v3585_v41, 0.0  ;;  %v4505_v48 = vpop.f32.mrb[43].mxu0 }
0x10cd   :  { %v3692_v39 = vadd.f32 %v3691_v43, %v3690_v42  ;;  %v3629_v52 = vpop.f32.mrb[64].mxu1  ;;  %v4573_v42 = vld [vmem:[%s5655_s6 + $0x40] sm:$0xff]   ;;  %v4576_v43 = vld [vmem:[%s5655_s6 + $0x58] sm:$0xff]  }
0x10ce   :  { %v3686_v44 = vsel %vm158_vm1, %v3629_v52, 0.0  ;;  %v4510_v53 = vpop.f32.mrb[65].mxu1  ;;  %4527 = vmatpush3.bf16.msra.mxu0 %v4573_v42  ;;  %v4577_v48 = vld [vmem:[%s5655_s6 + $0x60] sm:$0xff]   ;;  %v4579_v52 = vld [vmem:[%s5655_s6 + $0x70] sm:$0xff]  }
0x10cf   :  { %v3687_v54 = vadd.f32 %v3686_v44, %v3685_v40  ;;  %v3632_v50 = vpop.f32.mrb[66].mxu1  ;;  %4528 = vmatprep.subr.bf16.mxu0 %v4720_v63  ;;  %v4580_v44 = vld [vmem:[%s5655_s6 + $0x78] sm:$0xff]   ;;  %v4126_v53 = vld [vmem:[%s5658_s9 + $0x1] ss:$0 sm:$0xff] }
0x10d0   :  { %v3693_v56 = vsel %vm158_vm1, %v3632_v50, 0.0  ;;  %v4511_v57 = vpop.f32.mrb[67].mxu1 }
0x10d1   :  { %v3694_v58 = vadd.f32 %v3693_v56, %v3692_v39  ;;  %v3676_v59 = vpop.f32.mrb[44].mxu0  ;;  %v4578_v39 = vld [vmem:[%s5655_s6 + $0x68] sm:$0xff]  }
0x10d2   :  { %v3688_v61 = vsel %vm158_vm1, %v3676_v59, 0.0  ;;  %v4516_v62 = vpop.f32.mrb[45].mxu0  ;;  %4529 = vmatpush3.bf16.msra.mxu0 %v4574_v5 }
0x10d3   :  { %v3689_v1 = vadd.f32 %v3688_v61, %v3687_v54  ;;  %v3679_v2 = vpop.f32.mrb[46].mxu0  ;;  %4530 = vmatprep.subr.bf16.mxu0 %v4720_v63 }
0x10d4   :  { %v3695_v3 = vsel %vm158_vm1, %v3679_v2, 0.0  ;;  %v4517_v46 = vpop.f32.mrb[47].mxu0 }
0x10d5   :  { %v3697_v4 = vadd.f32 %v3689_v1, %v5292_v60  ;;  %v3696_v6 = vadd.f32 %v3695_v3, %v3694_v58 }
0x10d6   :  { %4531 = vmatpush3.bf16.msra.mxu0 %v4575_v12 }
0x10d7   :  { %v3698_v7 = vadd.f32 %v3696_v6, %v5295_v0  ;;  %v5561_v49 = vadd.f32 %v3702_v11, %v3697_v4  ;;  %4532 = vmatprep.subr.bf16.mxu0 %v4720_v63 }
0x10d9   :  { %v3705_v10 = vsel %vm158_vm1, %v5561_v49, 0.0  ;;  %v5565_v13 = vadd.f32 %v3702_v11, %v3698_v7 }
0x10da   :  { %3706 = vadd.xlane.f32.xlu0 %v3705_v10  ;;  %4533 = vmatpush3.bf16.msra.mxu0 %v4576_v43 }
0x10db   :  { %v3708_v15 = vsel %vm158_vm1, %v5565_v13, 0.0  ;;  %4534 = vmatprep.subr.bf16.mxu0 %v4720_v63 }
0x10dc   :  { %3709 = vadd.xlane.f32.xlu1 %v3708_v15 }
0x10de   :  { %4535 = vmatpush3.bf16.msra.mxu0 %v4577_v48 }
0x10df   :  { %4536 = vmatprep.subr.bf16.mxu0 %v4720_v63 }
0x10e2   :  { %4537 = vmatpush3.bf16.msra.mxu0 %v4578_v39 }
0x10e3   :  { %4538 = vmatprep.subr.bf16.mxu0 %v4720_v63 }
0x10e6   :  { %4539 = vmatpush3.bf16.msra.mxu0 %v4579_v52 }
0x10e7   :  { %4540 = vmatprep.subr.bf16.mxu0 %v4720_v63 }
0x10ea   :  { %4541 = vmatpush3.bf16.msra.mxu0 %v4580_v44 }
0x1167   :  { %v3707_v25 = vpop.xlane.xlu0 %3706 }
0x1168   :  { %v3711_v16 = vmul.f32 0.03125, %v3707_v25  ;;  %v3941_v25 = vrot.slane %v5316_v22, %v2046_v55 }
0x1169   :  { %v3710_v32 = vpop.xlane.xlu1 %3709 }
0x116a   :  { %v3713_v60 = vsub.f32 %v5561_v49, %v3711_v16  ;;  %v3712_v36 = vmul.f32 0.03125, %v3710_v32 }
0x116c   :  { %v3714_v0 = vsub.f32 %v5565_v13, %v3712_v36  ;;  %v3715_v17 = vmul.f32 %v3713_v60, %v3713_v60 }
0x116e   :  { %v3717_v18 = vsel %vm158_vm1, %v3715_v17, 0.0  ;;  %v3716_v19 = vmul.f32 %v3714_v0, %v3714_v0 }
0x116f   :  { %3718 = vadd.xlane.f32.xlu0 %v3717_v18 }
0x1170   :  { %v3720_v20 = vsel %vm158_vm1, %v3716_v19, 0.0 }
0x1173   :  { %3721 = vadd.xlane.f32.xlu0 %v3720_v20 }
0x11fc   :  { %v3719_v24 = vpop.xlane.xlu0 %3718 }
0x11fd   :  { %v3723_v26 = vmul.f32 0.03125, %v3719_v24 }
0x11ff   :  { %v3725_v27 = vadd.f32 1e-05, %v3723_v26 }
0x1200   :  { %v3722_v28 = vpop.xlane.xlu0 %3721 }
0x1201   :  { %4665 = vrsqrt.f32 %v3725_v27  ;;  %v3724_v29 = vmul.f32 0.03125, %v3722_v28 }
0x1203   :  { %v3726_v30 = vadd.f32 1e-05, %v3724_v29 }
0x1205   :  { %4667 = vrsqrt.f32 %v3726_v30 }
0x120b   :  { %v4666_v31 = vpop.eup %4665 }
0x120c   :  { %v3729_v34 = vmul.f32 %v4666_v31, %v3713_v60 }
0x120e   :  { %v3735_v51 = vmul.f32 %v3734_v33, %v3729_v34 }
0x120f   :  { %v4668_v35 = vpop.eup %4667 }
0x1210   :  { %v3730_v47 = vmul.f32 %v4668_v35, %v3714_v0  ;;  %v3741_v38 = vadd.f32 %v3740_v37, %v3735_v51  ;;  %v3944_v51 = vld [vmem:[%s5659_s10] sm:$0x3]  ;;  %s4693_s10 = scalar_lea.vmem %s3991_s25, 256 }
0x1211   :  { %p4694_p5 = scmp.ne.s32.totalorder %s3991_s25, %s4693_s10  ;;  %p4699_p7 = scmp.lt.s32.totalorder %s4693_s10, %s4693_s10 }
0x1212   :  { %v3736_v45 = vmul.f32 %v3734_v33, %v3730_v47  ;;  %v3974_v47 = vrot.slane %v3944_v51, %v4959_v9 }
0x1213   :  { %p4700_p8 = por %p4699_p7, %p4698_p6 }
0x1214   :  { %v3742_v40 = vadd.f32 %v3740_v37, %v3736_v45 }
0x1215   :  { %p4701_p9 = pnand %p4700_p8, %p4694_p5 }
0x1216   :  { %v3743_v41 = vpack.c.bf16 %v3742_v40, %v3741_v38  ;;  %v3980_v38 = vrot.slane %v3944_v51, %v4969_v14 }
0x1218   :  { %4523 = vmatmul.mubr.msk.bf16.vlgmr.msra.gmra.mrb[68].mxu1 %vm158_vm1, %v3743_v41 }
0x12eb   :  { %v3806_v54 = vpop.f32.mrb[68].mxu1 }
0x12ec   :  { %v3807_v50 = vadd.f32 %v4126_v53, %v3806_v54  ;;  %v4524_v56 = vpop.f32.mrb[69].mxu1 }
0x12ed   :  { %v3809_v57 = vpop.f32.mrb[70].mxu1 }
0x12ee   :  { %v4130_v58 = vmul.f32 -1.702, %v3807_v50  ;;  %v3810_v59 = vadd.f32 %v4126_v53, %v3809_v57  ;;  %v4525_v61 = vpop.f32.mrb[71].mxu1 }
0x12f0   :  { %v3817_v62 = vmul.f32 1.442695, %v4130_v58  ;;  %v4131_v1 = vmul.f32 -1.702, %v3810_v59 }
0x12f2   :  { %4669 = vpow2.f32 %v3817_v62  ;;  %v3819_v63 = vmul.f32 1.442695, %v4131_v1 }
0x12f4   :  { %4671 = vpow2.f32 %v3819_v63 }
0x12fc   :  { %v4670_v2 = vpop.eup %4669 }
0x12fd   :  { %v3821_v11 = vadd.f32 1.0, %v4670_v2 }
0x12fe   :  { %v4672_v3 = vpop.eup %4671 }
0x12ff   :  { %4673 = vrcp.f32 %v3821_v11  ;;  %v3822_v46 = vadd.f32 1.0, %v4672_v3 }
0x1301   :  { %4675 = vrcp.f32 %v3822_v46 }
0x1309   :  { %v4674_v4 = vpop.eup %4673 }
0x130a   :  { %v3827_v7 = vmul.f32 %v4674_v4, %v3807_v50 }
0x130b   :  { %v4676_v6 = vpop.eup %4675 }
0x130c   :  { %v3828_v10 = vmul.f32 %v4676_v6, %v3810_v59 }
0x130e   :  { %v3829_v15 = vpack.c.bf16 %v3828_v10, %v3827_v7 }
0x1310   :  { %4543 = vmatmul.mubr.bf16.vlgmr.msra.gmra.mrb[48].mxu0 %v3829_v15 }
0x13e3   :  { %v3929_v16 = vpop.f32.mrb[48].mxu0 }
0x13e4   :  { %v3936_v32 = vadd.f32 %v3929_v16, %v5561_v49  ;;  %v4544_v60 = vpop.f32.mrb[49].mxu0 }
0x13e5   :  { %v3932_v36 = vpop.f32.mrb[50].mxu0 }
0x13e6   :  { %v3937_v0 = vadd.f32 %v3932_v36, %v5565_v13  ;;  %v4545_v17 = vpop.f32.mrb[51].mxu0  ;;  %v3942_v18 = vadd.f32 %v3941_v25, %v3936_v32 }
0x13e8   :  { %v3945_v19 = vsel %vm158_vm1, %v3942_v18, 0.0  ;;  %v3943_v20 = vadd.f32 %v3941_v25, %v3937_v0 }
0x13e9   :  { %3946 = vadd.xlane.f32.xlu0 %v3945_v19 }
0x13ea   :  { %v3948_v21 = vsel %vm158_vm1, %v3943_v20, 0.0 }
0x13eb   :  { %3949 = vadd.xlane.f32.xlu1 %v3948_v21 }
0x1476   :  { %v3947_v23 = vpop.xlane.xlu0 %3946 }
0x1477   :  { %v3951_v8 = vmul.f32 0.03125, %v3947_v23 }
0x1478   :  { %v3950_v24 = vpop.xlane.xlu1 %3949 }
0x1479   :  { %v3953_v55 = vsub.f32 %v3942_v18, %v3951_v8  ;;  %v3952_v22 = vmul.f32 0.03125, %v3950_v24 }
0x147b   :  { %v3954_v26 = vsub.f32 %v3943_v20, %v3952_v22  ;;  %v3955_v49 = vmul.f32 %v3953_v55, %v3953_v55 }
0x147d   :  { %v3957_v27 = vsel %vm158_vm1, %v3955_v49, 0.0  ;;  %v3956_v28 = vmul.f32 %v3954_v26, %v3954_v26 }
0x147e   :  { %3958 = vadd.xlane.f32.xlu0 %v3957_v27 }
0x147f   :  { %v3960_v13 = vsel %vm158_vm1, %v3956_v28, 0.0 }
0x1480   :  { %3961 = vadd.xlane.f32.xlu1 %v3960_v13 }
0x150b   :  { %v3959_v29 = vpop.xlane.xlu0 %3958 }
0x150c   :  { %v3963_v30 = vmul.f32 0.03125, %v3959_v29 }
0x150d   :  { %v3962_v31 = vpop.xlane.xlu1 %3961 }
0x150e   :  { %v3965_v33 = vadd.f32 1e-05, %v3963_v30  ;;  %v3964_v34 = vmul.f32 0.03125, %v3962_v31 }
0x1510   :  { %4677 = vrsqrt.f32 %v3965_v33  ;;  %v3966_v35 = vadd.f32 1e-05, %v3964_v34 }
0x1512   :  { %4679 = vrsqrt.f32 %v3966_v35 }
0x151a   :  { %v4678_v37 = vpop.eup %4677 }
0x151b   :  { %v3969_v45 = vmul.f32 %v4678_v37, %v3953_v55 }
0x151c   :  { %v4680_v40 = vpop.eup %4679 }
0x151d   :  { %v3970_v41 = vmul.f32 %v4680_v40, %v3954_v26  ;;  %v3975_v42 = vmul.f32 %v3974_v47, %v3969_v45 }
0x151f   :  { %v3976_v5 = vmul.f32 %v3974_v47, %v3970_v41  ;;  %v3981_v12 = vadd.f32 %v3980_v38, %v3975_v42 }
0x1521   :  { %v3982_v43 = vadd.f32 %v3980_v38, %v3976_v5  ;;  %3983 = vst.msk [vmem:[#allocation6] sm:$0xff] %vm158_vm1, %v3981_v12 }
0x1523   :  { %3984 = vst.msk [vmem:[#allocation6 + $0x8] sm:$0xff] %vm158_vm1, %v3982_v43 }
0x1524   :  { %4704 = shalt.err (!%p4701_p9)
}
0x1525   :  { %s5665_s27 = sld [smem:[#allocation9_spill]] }
0x152b   :  { %s4705_s28 = scalar_lea.hbm %s5665_s27, 256 }
0x152c   :  { %p4706_p10 = scmp.ne.s32.totalorder %s5665_s27, %s4705_s28  ;;  %p4709_p11 = scmp.lt.u32.totalorder %s4705_s28, %s5665_s27 }
0x152e   :  { %p4711_p12 = pnand %p4709_p11, %p4706_p10 }
0x1530   :  { %4714 = shalt.err (!%p4711_p12)
}
0x1531   :  { %s4728_s5 = smov 128   ;;  %s4729_s13 = smov 8  }
0x1532   :  { %3996 = dma.vmem_to_hbm [thread:$0]  %s3991_s25, 256, %s5665_s27, [#allocation4], %s4728_s5, %s4728_s5, %s4729_s13  }
0x1533   :  { %4717 = dma.done.wait [#allocation4], 256  }
0x1534   :  { %4718 = vsyncadd [#allocation4], 4294967040 }
0x1535   :  { %4000 = vsyncpa [#allocation4], 1 }
0x1536   :  { %4001 = vsyncpa [#allocation5], 1 }

</bundles_post_ra>
